<compile_context>
chip_gen: v5e
topology: v5e:2x2
jax: 0.10.0
libtpu: 0.0.40
codegen_flags: <defaults>
</compile_context>

<pallas_src>
import functools

import jax
import jax.numpy as jnp
from jax.experimental import pallas as pl
from jax.experimental.pallas import tpu as pltpu

EPS = 1e-5  # nn.BatchNorm2d default eps


# ----------------------------- kernels -----------------------------------------


def _stats(y):
    """Per-channel [sum; sum-of-squares] of a (rows, C) fp32 tensor -> (2, C)."""
    return jnp.concatenate(
        [jnp.sum(y, axis=0, keepdims=True),
         jnp.sum(y * y, axis=0, keepdims=True)], axis=0)


def _stage1_kernel(x_ref, w_ref, z1_ref, st_ref, *, TH, W, Cin, P):
    """conv_d(1x1) + conv1(1x1) as one GEMM (shared LHS, [wd | w1] column order).

    Only z1 (conv1 output) is written back (bf16); the downsample half is computed
    solely for its BN partial stats and recomputed cheaply in stage 4.
    """
    rows = TH * W
    x = x_ref[...].reshape(rows, Cin)                                   # bf16
    z = jnp.dot(x, w_ref[...], preferred_element_type=jnp.float32)      # (rows, 5P) f32
    st_ref[...] = _stats(z)                                             # [:, :4P]=bn_d, [:, 4P:]=bn1
    z1_ref[...] = z[:, 4 * P:].astype(jnp.bfloat16).reshape(TH, W, P)


def _stage2_kernel(z1_ref, s1_ref, b1_ref, w2_ref, y2_ref, st_ref, *, H, W, P):
    """Fused bn1+relu, then 3x3 conv (stride 1, pad 1) as a single im2col GEMM."""
    rows = H * W
    a = jnp.maximum(z1_ref[...].reshape(rows, P) * s1_ref[...] + b1_ref[...], 0.0)
    a = a.astype(jnp.bfloat16).reshape(H, W, P)
    # Zero-padded halo built as values (no scratch-ref round trip / double write).
    zc = jnp.zeros((H, 1, P), jnp.bfloat16)
    zr = jnp.zeros((1, W + 2, P), jnp.bfloat16)
    ap = jnp.concatenate([zr, jnp.concatenate([zc, a, zc], axis=1), zr], axis=0)
    # im2col: 9 shifted views concatenated on the lane axis -> one GEMM with K = 9P.
    patches = jnp.concatenate(
        [ap[kh:kh + H, kw:kw + W, :] for kh in range(3) for kw in range(3)],
        axis=-1).reshape(rows, 9 * P)
    y = jnp.dot(patches, w2_ref[...], preferred_element_type=jnp.float32)  # (rows, P)
    st_ref[...] = _stats(y)
    y2_ref[...] = y.astype(jnp.bfloat16).reshape(H, W, P)


def _stage3_kernel(y2_ref, s2_ref, b2_ref, w3_ref, y3_ref, st_ref, *, TH, W, P):
    """Fused bn2+relu, conv3(1x1) GEMM + partial bn3 stats."""
    rows = TH * W
    a = jnp.maximum(y2_ref[...].reshape(rows, P) * s2_ref[...] + b2_ref[...], 0.0)
    y = jnp.dot(a.astype(jnp.bfloat16), w3_ref[...],
                preferred_element_type=jnp.float32)                      # (rows, 4P)
    st_ref[...] = _stats(y)
    y3_ref[...] = y.astype(jnp.bfloat16).reshape(TH, W, 4 * P)


def _stage4_kernel(y3_ref, x_ref, wd_ref, s3_ref, b3_ref, sd_ref, bd_ref, out_ref,
                   *, TH, W, Cin, P):
    """Recompute zd = x @ wd (same bf16 operands as stage 1 => same values as the
    stats were taken from), then bn3(main) + bn_d(residual) + add + relu."""
    rows = TH * W
    C = 4 * P
    zd = jnp.dot(x_ref[...].reshape(rows, Cin), wd_ref[...],
                 preferred_element_type=jnp.float32)                     # (rows, 4P)
    y3 = y3_ref[...].reshape(rows, C).astype(jnp.float32)
    out = jnp.maximum(y3 * s3_ref[...] + b3_ref[...] +
                      zd * sd_ref[...] + bd_ref[...], 0.0)
    out_ref[...] = out.reshape(TH, W, C)


# ----------------------------- wrapper ------------------------------------------


def _bn_scale_bias(stats, count, gamma, beta):
    """Fold training-mode BN (biased variance) into per-channel scale/bias (1, C)."""
    # NOTE: single-pass E[y^2]-E[y]^2 variance; fine at these magnitudes.
    mean = stats[0] / count
    var = stats[1] / count - mean * mean
    scale = gamma.astype(jnp.float32) * jax.lax.rsqrt(var + EPS)
    bias = beta.astype(jnp.float32) - mean * scale
    return scale.reshape(1, -1), bias.reshape(1, -1)


def _pick_tile_h(H, W, target_rows=512):
    """Largest divisor of H whose (TH*W) row count stays near `target_rows`."""
    best = 1
    for th in range(1, H + 1):
        if H % th == 0 and th * W <= max(target_rows, W):
            best = th
    return best


def normal_rm_bottleneck_forward(x_nchw, params, stride=1, tile_h=None):
    """Forward pass. x_nchw: (N, inplanes, H, W) float32 (PyTorch layout)."""
    # TODO(synk): stride > 1 (strided conv2 + strided downsample) not implemented.
    assert stride == 1
    N, Cin, H, W = x_nchw.shape
    P = params['w1'].shape[0]                             # planes
    C4 = 4 * P
    count = N * H * W                                     # global BN element count

    TH = _pick_tile_h(H, W) if tile_h is None else tile_h
    assert H % TH == 0, f"tile_h={TH} must divide H={H}"
    HT = H // TH

    # NCHW -> NHWC with the bf16 cast fused into the same transpose pass
    # (halves the stage-1 / stage-4 input DMA bytes).
    # NOTE: if the surrounding graph can produce/consume NHWC, drop both wrapper
    # transposes entirely; they are full HBM passes over the largest tensors.
    xb = jnp.transpose(x_nchw, (0, 2, 3, 1)).astype(jnp.bfloat16)

    # Repack PyTorch OIHW conv weights into matmul layouts, pre-cast to bf16.
    w1 = params['w1'][:, :, 0, 0].T                                 # (Cin, P)
    wd = params['wd'][:, :, 0, 0].T                                 # (Cin, 4P)
    wd_b = wd.astype(jnp.bfloat16)                                  # (Cin, 4P) for stage 4
    wcat = jnp.concatenate([wd, w1], axis=1).astype(jnp.bfloat16)   # (Cin, 5P), [wd | w1]
    w2r = jnp.transpose(params['w2'], (2, 3, 1, 0)).reshape(9 * P, P).astype(jnp.bfloat16)
    w3r = params['w3'][:, :, 0, 0].T.astype(jnp.bfloat16)           # (P, 4P)

    # VMEM budget: with (TH, W, C) tiles the per-step footprint (2x double-buffered
    # in/out blocks + resident weights + stage-2's im2col temporaries) is a few MiB
    # at ResNet sizes, so 32 MiB is generous everywhere and leaves headroom on
    # v7x's 64 MiB per-TC VMEM.
    VMEM = 32 * 1024 * 1024
    cp2d = pltpu.CompilerParams(dimension_semantics=("parallel", "parallel"),
                                vmem_limit_bytes=VMEM)
    cp1d = pltpu.CompilerParams(dimension_semantics=("parallel",),
                                vmem_limit_bytes=VMEM)

    # --- BlockSpec helpers -------------------------------------------------------
    def spec_img2(*dims):      # (N, H, W, C) tiled per (batch, h-tile); N squeezed
        return pl.BlockSpec((None, TH) + dims, lambda n, h: (n, h, 0, 0))

    def spec_stat2(*dims):     # tiny per-(batch, h-tile) partial-stats block
        return pl.BlockSpec((None, None) + dims,
                            lambda n, h: (n, h) + (0,) * len(dims))

    def spec_full2(shape):     # resident operand (weights / folded BN vectors)
        return pl.BlockSpec(shape, lambda n, h: (0,) * len(shape))

    def spec_img1(*dims):      # per-batch block on the 1-D (N,) grid (stage 2)
        return pl.BlockSpec((None,) + dims, lambda n: (n,) + (0,) * len(dims))

    def spec_full1(shape):
        return pl.BlockSpec(shape, lambda n: (0,) * len(shape))

    f32, bf16 = jnp.float32, jnp.bfloat16

    # ---- stage 1: fused [conv_d | conv1] GEMM, partial stats, z1 (bf16) only ----
    z1, st1 = pl.pallas_call(
        functools.partial(_stage1_kernel, TH=TH, W=W, Cin=Cin, P=P),
        grid=(N, HT),
        in_specs=[spec_img2(W, Cin), spec_full2((Cin, 5 * P))],
        out_specs=[spec_img2(W, P), spec_stat2(2, 5 * P)],
        out_shape=[jax.ShapeDtypeStruct((N, H, W, P), bf16),
                   jax.ShapeDtypeStruct((N, HT, 2, 5 * P), f32)],
        compiler_params=cp2d,
    )(xb, wcat)
    st1g = jnp.sum(st1, axis=(0, 1))                                 # global (2, 5P)
    sd, bd = _bn_scale_bias(st1g[:, :C4], count, params['gd'], params['bd'])
    s1, b1 = _bn_scale_bias(st1g[:, C4:], count, params['g1'], params['b1'])

    # ---- stage 2: bn1+relu, 3x3 conv via im2col GEMM, partial stats (per image) ----
    y2, st2 = pl.pallas_call(
        functools.partial(_stage2_kernel, H=H, W=W, P=P),
        grid=(N,),
        in_specs=[spec_img1(H, W, P), spec_full1((1, P)), spec_full1((1, P)),
                  spec_full1((9 * P, P))],
        out_specs=[spec_img1(H, W, P), spec_img1(2, P)],
        out_shape=[jax.ShapeDtypeStruct((N, H, W, P), bf16),
                   jax.ShapeDtypeStruct((N, 2, P), f32)],
        compiler_params=cp1d,
    )(z1, s1, b1, w2r)
    s2, b2 = _bn_scale_bias(jnp.sum(st2, axis=0), count, params['g2'], params['b2'])

    # ---- stage 3: bn2+relu, conv3 GEMM, partial stats ----
    y3, st3 = pl.pallas_call(
        functools.partial(_stage3_kernel, TH=TH, W=W, P=P),
        grid=(N, HT),
        in_specs=[spec_img2(W, P), spec_full2((1, P)), spec_full2((1, P)),
                  spec_full2((P, C4))],
        out_specs=[spec_img2(W, C4), spec_stat2(2, C4)],
        out_shape=[jax.ShapeDtypeStruct((N, H, W, C4), bf16),
                   jax.ShapeDtypeStruct((N, HT, 2, C4), f32)],
        compiler_params=cp2d,
    )(y2, s2, b2, w3r)
    s3, b3 = _bn_scale_bias(jnp.sum(st3, axis=(0, 1)), count, params['g3'], params['b3'])

    # ---- stage 4: recompute zd, bn3 + bn_d + residual add + relu ----
    out_nhwc = pl.pallas_call(
        functools.partial(_stage4_kernel, TH=TH, W=W, Cin=Cin, P=P),
        grid=(N, HT),
        in_specs=[spec_img2(W, C4), spec_img2(W, Cin), spec_full2((Cin, C4)),
                  spec_full2((1, C4)), spec_full2((1, C4)),
                  spec_full2((1, C4)), spec_full2((1, C4))],
        out_specs=spec_img2(W, C4),
        out_shape=jax.ShapeDtypeStruct((N, H, W, C4), f32),
        compiler_params=cp2d,
    )(y3, xb, wd_b, s3, b3, sd, bd)

    return jnp.transpose(out_nhwc, (0, 3, 1, 2))                     # back to NCHW


# ----------------------------- reference & smoke test ---------------------------


def reference_forward(x, params, matmul_dtype=jnp.float32, round_intermediates=False):
    """Pure-JAX (XLA) reference in NCHW.  matmul_dtype=bf16 mirrors the kernel's
    MXU operand precision (fp32 accumulation); round_intermediates=True mirrors the
    kernel's bf16 storage of the main-branch inter-stage activations."""
    if round_intermediates:
        rd = lambda t: t.astype(jnp.bfloat16).astype(jnp.float32)
    else:
        rd = lambda t: t

    def conv(a, w, pad=0):
        return jax.lax.conv_general_dilated(
            a.astype(matmul_dtype), w.astype(matmul_dtype), (1, 1),
            [(pad, pad), (pad, pad)],
            dimension_numbers=('NCHW', 'OIHW', 'NCHW'),
            preferred_element_type=jnp.float32)

    def bn(a, g, b):
        mean = jnp.mean(a, axis=(0, 2, 3), keepdims=True)
        var = jnp.mean((a - mean) ** 2, axis=(0, 2, 3), keepdims=True)
        return (a - mean) * jax.lax.rsqrt(var + EPS) * g.reshape(1, -1, 1, 1) \
            + b.reshape(1, -1, 1, 1)

    relu = lambda t: jnp.maximum(t, 0.0)
    residual = x
    y = relu(bn(rd(conv(x, params['w1'])), params['g1'], params['b1']))
    y = relu(bn(rd(conv(y, params['w2'], pad=1)), params['g2'], params['b2']))
    y = bn(rd(conv(y, params['w3'])), params['g3'], params['b3'])
    residual = bn(conv(residual, params['wd']), params['gd'], params['bd'])
    return relu(y + residual)


if __name__ == "__main__":
    key = jax.random.PRNGKey(0)
    N, inplanes, H, W = 2, 16, 16, 16
    planes = 8
    outplanes = 4 * planes                  # 32 != inplanes -> downsample branch exists

    ks = jax.random.split(key, 13)
    params = {
        'w1': 0.1 * jax.random.normal(ks[0], (planes, inplanes, 1, 1), jnp.float32),
        'g1': 1.0 + 0.1 * jax.random.normal(ks[1], (planes,), jnp.float32),
        'b1': 0.1 * jax.random.normal(ks[2], (planes,), jnp.float32),
        'w2': 0.1 * jax.random.normal(ks[3], (planes, planes, 3, 3), jnp.float32),
        'g2': 1.0 + 0.1 * jax.random.normal(ks[4], (planes,), jnp.float32),
        'b2': 0.1 * jax.random.normal(ks[5], (planes,), jnp.float32),
        'w3': 0.1 * jax.random.normal(ks[6], (outplanes, planes, 1, 1), jnp.float32),
        'g3': 1.0 + 0.1 * jax.random.normal(ks[7], (outplanes,), jnp.float32),
        'b3': 0.1 * jax.random.normal(ks[8], (outplanes,), jnp.float32),
        'wd': 0.1 * jax.random.normal(ks[9], (outplanes, inplanes, 1, 1), jnp.float32),
        'gd': 1.0 + 0.1 * jax.random.normal(ks[10], (outplanes,), jnp.float32),
        'bd': 0.1 * jax.random.normal(ks[11], (outplanes,), jnp.float32),
    }
    x = jax.random.normal(ks[12], (N, inplanes, H, W), jnp.float32)

    # tile_h=8 exercises the spatial-tile grid (N, H/TH) = (2, 2) at toy sizes.
    fwd = jax.jit(functools.partial(normal_rm_bottleneck_forward, stride=1, tile_h=8))
    out = jax.block_until_ready(fwd(x, params))
    assert out.shape == (N, outplanes, H, W)

    # Structural check: reference with matching bf16-operand matmuls and bf16-rounded
    # inter-stage activations (fp32 accumulation everywhere).
    ref_bf16 = reference_forward(x, params, matmul_dtype=jnp.bfloat16,
                                 round_intermediates=True)
    err_bf16 = float(jnp.max(jnp.abs(out - ref_bf16)))
    assert err_bf16 < 5e-2, f"kernel vs bf16-path reference diff too large: {err_bf16}"

    # Semantic sanity check vs pure-fp32 module math (bf16 MXU inputs + bf16
    # intermediate storage => looser bound).
    ref_f32 = reference_forward(x, params, matmul_dtype=jnp.float32)
    err_f32 = float(jnp.max(jnp.abs(out - ref_f32)))
    assert err_f32 < 2.5e-1, f"kernel vs fp32 reference diff too large: {err_f32}"

    print("KERNEL_OK")
</pallas_src>

<mosaic_0001>
module attributes {stable_mosaic.version = 11 : i64} {
  func.func @_stage2_kernel(%arg0: i32, %arg1: memref<1x16x16x8xbf16, #tpu.memory_space<vmem>>, %arg2: memref<1x8xf32, #tpu.memory_space<vmem>>, %arg3: memref<1x8xf32, #tpu.memory_space<vmem>>, %arg4: memref<72x8xbf16, #tpu.memory_space<vmem>>, %arg5: memref<1x16x16x8xbf16, #tpu.memory_space<vmem>>, %arg6: memref<1x2x8xf32, #tpu.memory_space<vmem>>) attributes {dimension_semantics = [#tpu.dimension_semantics<parallel>], iteration_bounds = array<i64: 2>, scalar_prefetch = 0 : i64, scratch_operands = 0 : i64, tpu.core_type = #tpu.core_type<tc>, window_params = [{transform_indices = @transform_0, window_bounds = array<i64: 1, 16, 16, 8>}, {pipeline_mode = #tpu.pipeline_mode<synchronous>, transform_indices = @transform_1, window_bounds = array<i64: 1, 8>}, {pipeline_mode = #tpu.pipeline_mode<synchronous>, transform_indices = @transform_2, window_bounds = array<i64: 1, 8>}, {pipeline_mode = #tpu.pipeline_mode<synchronous>, transform_indices = @transform_3, window_bounds = array<i64: 72, 8>}, {transform_indices = @transform_4, window_bounds = array<i64: 1, 16, 16, 8>}, {transform_indices = @transform_5, window_bounds = array<i64: 1, 2, 8>}]} {
    %c0 = arith.constant 0 : index
    %c0_0 = arith.constant 0 : index
    %c0_1 = arith.constant 0 : index
    %c0_2 = arith.constant 0 : index
    %0 = vector.load %arg1[%c0, %c0_0, %c0_1, %c0_2] : memref<1x16x16x8xbf16, #tpu.memory_space<vmem>>, vector<1x16x16x8xbf16>
    %1 = vector.shape_cast %0 : vector<1x16x16x8xbf16> to vector<16x16x8xbf16>
    %2 = vector.shape_cast %1 : vector<16x16x8xbf16> to vector<256x8xbf16>
    %c0_3 = arith.constant 0 : index
    %c0_4 = arith.constant 0 : index
    %3 = vector.load %arg2[%c0_3, %c0_4] : memref<1x8xf32, #tpu.memory_space<vmem>>, vector<1x8xf32>
    %4 = arith.extf %2 : vector<256x8xbf16> to vector<256x8xf32>
    %5 = vector.broadcast %3 : vector<1x8xf32> to vector<256x8xf32>
    %6 = arith.mulf %4, %5 : vector<256x8xf32>
    %c0_5 = arith.constant 0 : index
    %c0_6 = arith.constant 0 : index
    %7 = vector.load %arg3[%c0_5, %c0_6] : memref<1x8xf32, #tpu.memory_space<vmem>>, vector<1x8xf32>
    %8 = vector.broadcast %7 : vector<1x8xf32> to vector<256x8xf32>
    %9 = arith.addf %6, %8 : vector<256x8xf32>
    %cst = arith.constant 0.000000e+00 : f32
    %10 = vector.broadcast %cst : f32 to vector<256x8xf32>
    %11 = arith.maximumf %9, %10 : vector<256x8xf32>
    %12 = arith.truncf %11 : vector<256x8xf32> to vector<256x8xbf16>
    %13 = vector.shape_cast %12 : vector<256x8xbf16> to vector<16x16x8xbf16>
    %cst_7 = arith.constant 0.000000e+00 : bf16
    %14 = vector.broadcast %cst_7 : bf16 to vector<16x1x8xbf16>
    %cst_8 = arith.constant 0.000000e+00 : bf16
    %15 = vector.broadcast %cst_8 : bf16 to vector<1x18x8xbf16>
    %16 = tpu.concatenate %14, %13, %14 in 1 : vector<16x1x8xbf16>, vector<16x16x8xbf16>, vector<16x1x8xbf16> -> vector<16x18x8xbf16>
    %17 = tpu.concatenate %15, %16, %15 in 0 : vector<1x18x8xbf16>, vector<16x18x8xbf16>, vector<1x18x8xbf16> -> vector<18x18x8xbf16>
    %18 = vector.extract_strided_slice %17 {offsets = [0, 0, 0], sizes = [16, 16, 8], strides = [1, 1, 1]} : vector<18x18x8xbf16> to vector<16x16x8xbf16>
    %19 = vector.extract_strided_slice %17 {offsets = [0, 1, 0], sizes = [16, 16, 8], strides = [1, 1, 1]} : vector<18x18x8xbf16> to vector<16x16x8xbf16>
    %20 = vector.extract_strided_slice %17 {offsets = [0, 2, 0], sizes = [16, 16, 8], strides = [1, 1, 1]} : vector<18x18x8xbf16> to vector<16x16x8xbf16>
    %21 = vector.extract_strided_slice %17 {offsets = [1, 0, 0], sizes = [16, 16, 8], strides = [1, 1, 1]} : vector<18x18x8xbf16> to vector<16x16x8xbf16>
    %22 = vector.extract_strided_slice %17 {offsets = [1, 1, 0], sizes = [16, 16, 8], strides = [1, 1, 1]} : vector<18x18x8xbf16> to vector<16x16x8xbf16>
    %23 = vector.extract_strided_slice %17 {offsets = [1, 2, 0], sizes = [16, 16, 8], strides = [1, 1, 1]} : vector<18x18x8xbf16> to vector<16x16x8xbf16>
    %24 = vector.extract_strided_slice %17 {offsets = [2, 0, 0], sizes = [16, 16, 8], strides = [1, 1, 1]} : vector<18x18x8xbf16> to vector<16x16x8xbf16>
    %25 = vector.extract_strided_slice %17 {offsets = [2, 1, 0], sizes = [16, 16, 8], strides = [1, 1, 1]} : vector<18x18x8xbf16> to vector<16x16x8xbf16>
    %26 = vector.extract_strided_slice %17 {offsets = [2, 2, 0], sizes = [16, 16, 8], strides = [1, 1, 1]} : vector<18x18x8xbf16> to vector<16x16x8xbf16>
    %27 = tpu.concatenate %18, %19, %20, %21, %22, %23, %24, %25, %26 in 2 : vector<16x16x8xbf16>, vector<16x16x8xbf16>, vector<16x16x8xbf16>, vector<16x16x8xbf16>, vector<16x16x8xbf16>, vector<16x16x8xbf16>, vector<16x16x8xbf16>, vector<16x16x8xbf16>, vector<16x16x8xbf16> -> vector<16x16x72xbf16>
    %28 = vector.shape_cast %27 : vector<16x16x72xbf16> to vector<256x72xbf16>
    %c0_9 = arith.constant 0 : index
    %c0_10 = arith.constant 0 : index
    %29 = vector.load %arg4[%c0_9, %c0_10] : memref<72x8xbf16, #tpu.memory_space<vmem>>, vector<72x8xbf16>
    %cst_11 = arith.constant dense<0.000000e+00> : vector<256x8xf32>
    %30 = tpu.matmul %28, %29, %cst_11 {dimension_numbers = #tpu.dot_dimension_numbers<[1], [0], [0], [1], [0, 0, 1, 1], [], []>} : vector<256x72xbf16>, vector<72x8xbf16>, vector<256x8xf32> -> vector<256x8xf32>
    %cst_12 = arith.constant dense<0.000000e+00> : vector<8xf32>
    %31 = vector.multi_reduction <add>, %30, %cst_12 [0] : vector<256x8xf32> to vector<8xf32>
    %32 = vector.shape_cast %31 : vector<8xf32> to vector<1x8xf32>
    %33 = arith.mulf %30, %30 : vector<256x8xf32>
    %cst_13 = arith.constant dense<0.000000e+00> : vector<8xf32>
    %34 = vector.multi_reduction <add>, %33, %cst_13 [0] : vector<256x8xf32> to vector<8xf32>
    %35 = vector.shape_cast %34 : vector<8xf32> to vector<1x8xf32>
    %36 = tpu.concatenate %32, %35 in 0 : vector<1x8xf32>, vector<1x8xf32> -> vector<2x8xf32>
    %c0_14 = arith.constant 0 : index
    %c0_15 = arith.constant 0 : index
    %c0_16 = arith.constant 0 : index
    %37 = vector.load %arg6[%c0_14, %c0_15, %c0_16] : memref<1x2x8xf32, #tpu.memory_space<vmem>>, vector<1x2x8xf32>
    %38 = vector.shape_cast %37 : vector<1x2x8xf32> to vector<2x8xf32>
    %39 = vector.shape_cast %36 : vector<2x8xf32> to vector<1x2x8xf32>
    tpu.vector_store %arg6[%c0_14, %c0_15, %c0_16], %39 {strides = array<i32>} : memref<1x2x8xf32, #tpu.memory_space<vmem>>, vector<1x2x8xf32>,
    %40 = arith.truncf %30 : vector<256x8xf32> to vector<256x8xbf16>
    %41 = vector.shape_cast %40 : vector<256x8xbf16> to vector<16x16x8xbf16>
    %c0_17 = arith.constant 0 : index
    %c0_18 = arith.constant 0 : index
    %c0_19 = arith.constant 0 : index
    %c0_20 = arith.constant 0 : index
    %42 = vector.load %arg5[%c0_17, %c0_18, %c0_19, %c0_20] : memref<1x16x16x8xbf16, #tpu.memory_space<vmem>>, vector<1x16x16x8xbf16>
    %43 = vector.shape_cast %42 : vector<1x16x16x8xbf16> to vector<16x16x8xbf16>
    %44 = vector.shape_cast %41 : vector<16x16x8xbf16> to vector<1x16x16x8xbf16>
    tpu.vector_store %arg5[%c0_17, %c0_18, %c0_19, %c0_20], %44 {strides = array<i32>} : memref<1x16x16x8xbf16, #tpu.memory_space<vmem>>, vector<1x16x16x8xbf16>,
    return
  }
  func.func @transform_0(%arg0: i32) -> (i32, i32, i32, i32) {
    %c0_i32 = arith.constant 0 : i32
    %c0_i32_0 = arith.constant 0 : i32
    %c0_i32_1 = arith.constant 0 : i32
    %c0_i32_2 = arith.constant 0 : i32
    return %arg0, %c0_i32, %c0_i32_0, %c0_i32_1 : i32, i32, i32, i32
  }
  func.func @transform_1(%arg0: i32) -> (i32, i32) {
    %c0_i32 = arith.constant 0 : i32
    %c0_i32_0 = arith.constant 0 : i32
    %c0_i32_1 = arith.constant 0 : i32
    return %c0_i32, %c0_i32_0 : i32, i32
  }
  func.func @transform_2(%arg0: i32) -> (i32, i32) {
    %c0_i32 = arith.constant 0 : i32
    %c0_i32_0 = arith.constant 0 : i32
    %c0_i32_1 = arith.constant 0 : i32
    return %c0_i32, %c0_i32_0 : i32, i32
  }
  func.func @transform_3(%arg0: i32) -> (i32, i32) {
    %c0_i32 = arith.constant 0 : i32
    %c0_i32_0 = arith.constant 0 : i32
    %c0_i32_1 = arith.constant 0 : i32
    return %c0_i32, %c0_i32_0 : i32, i32
  }
  func.func @transform_4(%arg0: i32) -> (i32, i32, i32, i32) {
    %c0_i32 = arith.constant 0 : i32
    %c0_i32_0 = arith.constant 0 : i32
    %c0_i32_1 = arith.constant 0 : i32
    %c0_i32_2 = arith.constant 0 : i32
    return %arg0, %c0_i32, %c0_i32_0, %c0_i32_1 : i32, i32, i32, i32
  }
  func.func @transform_5(%arg0: i32) -> (i32, i32, i32) {
    %c0_i32 = arith.constant 0 : i32
    %c0_i32_0 = arith.constant 0 : i32
    %c0_i32_1 = arith.constant 0 : i32
    return %arg0, %c0_i32, %c0_i32_0 : i32, i32, i32
  }
}

module attributes {stable_mosaic.version = 11 : i64} {
  func.func @_stage1_kernel(%arg0: i32, %arg1: i32, %arg2: memref<1x8x16x16xbf16, #tpu.memory_space<vmem>>, %arg3: memref<16x40xbf16, #tpu.memory_space<vmem>>, %arg4: memref<1x8x16x8xbf16, #tpu.memory_space<vmem>>, %arg5: memref<1x1x2x40xf32, #tpu.memory_space<vmem>>) attributes {dimension_semantics = [#tpu.dimension_semantics<parallel>, #tpu.dimension_semantics<parallel>], iteration_bounds = array<i64: 2, 2>, scalar_prefetch = 0 : i64, scratch_operands = 0 : i64, tpu.core_type = #tpu.core_type<tc>, window_params = [{transform_indices = @transform_0, window_bounds = array<i64: 1, 8, 16, 16>}, {pipeline_mode = #tpu.pipeline_mode<synchronous>, transform_indices = @transform_1, window_bounds = array<i64: 16, 40>}, {transform_indices = @transform_2, window_bounds = array<i64: 1, 8, 16, 8>}, {transform_indices = @transform_3, window_bounds = array<i64: 1, 1, 2, 40>}]} {
    %c0 = arith.constant 0 : index
    %c0_0 = arith.constant 0 : index
    %c0_1 = arith.constant 0 : index
    %c0_2 = arith.constant 0 : index
    %0 = vector.load %arg2[%c0, %c0_0, %c0_1, %c0_2] : memref<1x8x16x16xbf16, #tpu.memory_space<vmem>>, vector<1x8x16x16xbf16>
    %1 = vector.shape_cast %0 : vector<1x8x16x16xbf16> to vector<8x16x16xbf16>
    %2 = vector.shape_cast %1 : vector<8x16x16xbf16> to vector<128x16xbf16>
    %c0_3 = arith.constant 0 : index
    %c0_4 = arith.constant 0 : index
    %3 = vector.load %arg3[%c0_3, %c0_4] : memref<16x40xbf16, #tpu.memory_space<vmem>>, vector<16x40xbf16>
    %cst = arith.constant dense<0.000000e+00> : vector<128x40xf32>
    %4 = tpu.matmul %2, %3, %cst {dimension_numbers = #tpu.dot_dimension_numbers<[1], [0], [0], [1], [0, 0, 1, 1], [], []>} : vector<128x16xbf16>, vector<16x40xbf16>, vector<128x40xf32> -> vector<128x40xf32>
    %cst_5 = arith.constant dense<0.000000e+00> : vector<40xf32>
    %5 = vector.multi_reduction <add>, %4, %cst_5 [0] : vector<128x40xf32> to vector<40xf32>
    %6 = vector.shape_cast %5 : vector<40xf32> to vector<1x40xf32>
    %7 = arith.mulf %4, %4 : vector<128x40xf32>
    %cst_6 = arith.constant dense<0.000000e+00> : vector<40xf32>
    %8 = vector.multi_reduction <add>, %7, %cst_6 [0] : vector<128x40xf32> to vector<40xf32>
    %9 = vector.shape_cast %8 : vector<40xf32> to vector<1x40xf32>
    %10 = tpu.concatenate %6, %9 in 0 : vector<1x40xf32>, vector<1x40xf32> -> vector<2x40xf32>
    %c0_7 = arith.constant 0 : index
    %c0_8 = arith.constant 0 : index
    %c0_9 = arith.constant 0 : index
    %c0_10 = arith.constant 0 : index
    %11 = vector.load %arg5[%c0_7, %c0_8, %c0_9, %c0_10] : memref<1x1x2x40xf32, #tpu.memory_space<vmem>>, vector<1x1x2x40xf32>
    %12 = vector.shape_cast %11 : vector<1x1x2x40xf32> to vector<2x40xf32>
    %13 = vector.shape_cast %10 : vector<2x40xf32> to vector<1x1x2x40xf32>
    tpu.vector_store %arg5[%c0_7, %c0_8, %c0_9, %c0_10], %13 {strides = array<i32>} : memref<1x1x2x40xf32, #tpu.memory_space<vmem>>, vector<1x1x2x40xf32>,
    %14 = vector.extract_strided_slice %4 {offsets = [0, 32], sizes = [128, 8], strides = [1, 1]} : vector<128x40xf32> to vector<128x8xf32>
    %15 = arith.truncf %14 : vector<128x8xf32> to vector<128x8xbf16>
    %16 = vector.shape_cast %15 : vector<128x8xbf16> to vector<8x16x8xbf16>
    %c0_11 = arith.constant 0 : index
    %c0_12 = arith.constant 0 : index
    %c0_13 = arith.constant 0 : index
    %c0_14 = arith.constant 0 : index
    %17 = vector.load %arg4[%c0_11, %c0_12, %c0_13, %c0_14] : memref<1x8x16x8xbf16, #tpu.memory_space<vmem>>, vector<1x8x16x8xbf16>
    %18 = vector.shape_cast %17 : vector<1x8x16x8xbf16> to vector<8x16x8xbf16>
    %19 = vector.shape_cast %16 : vector<8x16x8xbf16> to vector<1x8x16x8xbf16>
    tpu.vector_store %arg4[%c0_11, %c0_12, %c0_13, %c0_14], %19 {strides = array<i32>} : memref<1x8x16x8xbf16, #tpu.memory_space<vmem>>, vector<1x8x16x8xbf16>,
    return
  }
  func.func @transform_0(%arg0: i32, %arg1: i32) -> (i32, i32, i32, i32) {
    %c0_i32 = arith.constant 0 : i32
    %c0_i32_0 = arith.constant 0 : i32
    %c0_i32_1 = arith.constant 0 : i32
    return %arg0, %arg1, %c0_i32, %c0_i32_0 : i32, i32, i32, i32
  }
  func.func @transform_1(%arg0: i32, %arg1: i32) -> (i32, i32) {
    %c0_i32 = arith.constant 0 : i32
    %c0_i32_0 = arith.constant 0 : i32
    %c0_i32_1 = arith.constant 0 : i32
    return %c0_i32, %c0_i32_0 : i32, i32
  }
  func.func @transform_2(%arg0: i32, %arg1: i32) -> (i32, i32, i32, i32) {
    %c0_i32 = arith.constant 0 : i32
    %c0_i32_0 = arith.constant 0 : i32
    %c0_i32_1 = arith.constant 0 : i32
    return %arg0, %arg1, %c0_i32, %c0_i32_0 : i32, i32, i32, i32
  }
  func.func @transform_3(%arg0: i32, %arg1: i32) -> (i32, i32, i32, i32) {
    %c0_i32 = arith.constant 0 : i32
    %c0_i32_0 = arith.constant 0 : i32
    %c0_i32_1 = arith.constant 0 : i32
    return %arg0, %arg1, %c0_i32, %c0_i32_0 : i32, i32, i32, i32
  }
}

module attributes {stable_mosaic.version = 11 : i64} {
  func.func @_stage3_kernel(%arg0: i32, %arg1: i32, %arg2: memref<1x8x16x8xbf16, #tpu.memory_space<vmem>>, %arg3: memref<1x8xf32, #tpu.memory_space<vmem>>, %arg4: memref<1x8xf32, #tpu.memory_space<vmem>>, %arg5: memref<8x32xbf16, #tpu.memory_space<vmem>>, %arg6: memref<1x8x16x32xbf16, #tpu.memory_space<vmem>>, %arg7: memref<1x1x2x32xf32, #tpu.memory_space<vmem>>) attributes {dimension_semantics = [#tpu.dimension_semantics<parallel>, #tpu.dimension_semantics<parallel>], iteration_bounds = array<i64: 2, 2>, scalar_prefetch = 0 : i64, scratch_operands = 0 : i64, tpu.core_type = #tpu.core_type<tc>, window_params = [{transform_indices = @transform_0, window_bounds = array<i64: 1, 8, 16, 8>}, {pipeline_mode = #tpu.pipeline_mode<synchronous>, transform_indices = @transform_1, window_bounds = array<i64: 1, 8>}, {pipeline_mode = #tpu.pipeline_mode<synchronous>, transform_indices = @transform_2, window_bounds = array<i64: 1, 8>}, {pipeline_mode = #tpu.pipeline_mode<synchronous>, transform_indices = @transform_3, window_bounds = array<i64: 8, 32>}, {transform_indices = @transform_4, window_bounds = array<i64: 1, 8, 16, 32>}, {transform_indices = @transform_5, window_bounds = array<i64: 1, 1, 2, 32>}]} {
    %c0 = arith.constant 0 : index
    %c0_0 = arith.constant 0 : index
    %c0_1 = arith.constant 0 : index
    %c0_2 = arith.constant 0 : index
    %0 = vector.load %arg2[%c0, %c0_0, %c0_1, %c0_2] : memref<1x8x16x8xbf16, #tpu.memory_space<vmem>>, vector<1x8x16x8xbf16>
    %1 = vector.shape_cast %0 : vector<1x8x16x8xbf16> to vector<8x16x8xbf16>
    %2 = vector.shape_cast %1 : vector<8x16x8xbf16> to vector<128x8xbf16>
    %c0_3 = arith.constant 0 : index
    %c0_4 = arith.constant 0 : index
    %3 = vector.load %arg3[%c0_3, %c0_4] : memref<1x8xf32, #tpu.memory_space<vmem>>, vector<1x8xf32>
    %4 = arith.extf %2 : vector<128x8xbf16> to vector<128x8xf32>
    %5 = vector.broadcast %3 : vector<1x8xf32> to vector<128x8xf32>
    %6 = arith.mulf %4, %5 : vector<128x8xf32>
    %c0_5 = arith.constant 0 : index
    %c0_6 = arith.constant 0 : index
    %7 = vector.load %arg4[%c0_5, %c0_6] : memref<1x8xf32, #tpu.memory_space<vmem>>, vector<1x8xf32>
    %8 = vector.broadcast %7 : vector<1x8xf32> to vector<128x8xf32>
    %9 = arith.addf %6, %8 : vector<128x8xf32>
    %cst = arith.constant 0.000000e+00 : f32
    %10 = vector.broadcast %cst : f32 to vector<128x8xf32>
    %11 = arith.maximumf %9, %10 : vector<128x8xf32>
    %12 = arith.truncf %11 : vector<128x8xf32> to vector<128x8xbf16>
    %c0_7 = arith.constant 0 : index
    %c0_8 = arith.constant 0 : index
    %13 = vector.load %arg5[%c0_7, %c0_8] : memref<8x32xbf16, #tpu.memory_space<vmem>>, vector<8x32xbf16>
    %cst_9 = arith.constant dense<0.000000e+00> : vector<128x32xf32>
    %14 = tpu.matmul %12, %13, %cst_9 {dimension_numbers = #tpu.dot_dimension_numbers<[1], [0], [0], [1], [0, 0, 1, 1], [], []>} : vector<128x8xbf16>, vector<8x32xbf16>, vector<128x32xf32> -> vector<128x32xf32>
    %cst_10 = arith.constant dense<0.000000e+00> : vector<32xf32>
    %15 = vector.multi_reduction <add>, %14, %cst_10 [0] : vector<128x32xf32> to vector<32xf32>
    %16 = vector.shape_cast %15 : vector<32xf32> to vector<1x32xf32>
    %17 = arith.mulf %14, %14 : vector<128x32xf32>
    %cst_11 = arith.constant dense<0.000000e+00> : vector<32xf32>
    %18 = vector.multi_reduction <add>, %17, %cst_11 [0] : vector<128x32xf32> to vector<32xf32>
    %19 = vector.shape_cast %18 : vector<32xf32> to vector<1x32xf32>
    %20 = tpu.concatenate %16, %19 in 0 : vector<1x32xf32>, vector<1x32xf32> -> vector<2x32xf32>
    %c0_12 = arith.constant 0 : index
    %c0_13 = arith.constant 0 : index
    %c0_14 = arith.constant 0 : index
    %c0_15 = arith.constant 0 : index
    %21 = vector.load %arg7[%c0_12, %c0_13, %c0_14, %c0_15] : memref<1x1x2x32xf32, #tpu.memory_space<vmem>>, vector<1x1x2x32xf32>
    %22 = vector.shape_cast %21 : vector<1x1x2x32xf32> to vector<2x32xf32>
    %23 = vector.shape_cast %20 : vector<2x32xf32> to vector<1x1x2x32xf32>
    tpu.vector_store %arg7[%c0_12, %c0_13, %c0_14, %c0_15], %23 {strides = array<i32>} : memref<1x1x2x32xf32, #tpu.memory_space<vmem>>, vector<1x1x2x32xf32>,
    %24 = arith.truncf %14 : vector<128x32xf32> to vector<128x32xbf16>
    %25 = vector.shape_cast %24 : vector<128x32xbf16> to vector<8x16x32xbf16>
    %c0_16 = arith.constant 0 : index
    %c0_17 = arith.constant 0 : index
    %c0_18 = arith.constant 0 : index
    %c0_19 = arith.constant 0 : index
    %26 = vector.load %arg6[%c0_16, %c0_17, %c0_18, %c0_19] : memref<1x8x16x32xbf16, #tpu.memory_space<vmem>>, vector<1x8x16x32xbf16>
    %27 = vector.shape_cast %26 : vector<1x8x16x32xbf16> to vector<8x16x32xbf16>
    %28 = vector.shape_cast %25 : vector<8x16x32xbf16> to vector<1x8x16x32xbf16>
    tpu.vector_store %arg6[%c0_16, %c0_17, %c0_18, %c0_19], %28 {strides = array<i32>} : memref<1x8x16x32xbf16, #tpu.memory_space<vmem>>, vector<1x8x16x32xbf16>,
    return
  }
  func.func @transform_0(%arg0: i32, %arg1: i32) -> (i32, i32, i32, i32) {
    %c0_i32 = arith.constant 0 : i32
    %c0_i32_0 = arith.constant 0 : i32
    %c0_i32_1 = arith.constant 0 : i32
    return %arg0, %arg1, %c0_i32, %c0_i32_0 : i32, i32, i32, i32
  }
  func.func @transform_1(%arg0: i32, %arg1: i32) -> (i32, i32) {
    %c0_i32 = arith.constant 0 : i32
    %c0_i32_0 = arith.constant 0 : i32
    %c0_i32_1 = arith.constant 0 : i32
    return %c0_i32, %c0_i32_0 : i32, i32
  }
  func.func @transform_2(%arg0: i32, %arg1: i32) -> (i32, i32) {
    %c0_i32 = arith.constant 0 : i32
    %c0_i32_0 = arith.constant 0 : i32
    %c0_i32_1 = arith.constant 0 : i32
    return %c0_i32, %c0_i32_0 : i32, i32
  }
  func.func @transform_3(%arg0: i32, %arg1: i32) -> (i32, i32) {
    %c0_i32 = arith.constant 0 : i32
    %c0_i32_0 = arith.constant 0 : i32
    %c0_i32_1 = arith.constant 0 : i32
    return %c0_i32, %c0_i32_0 : i32, i32
  }
  func.func @transform_4(%arg0: i32, %arg1: i32) -> (i32, i32, i32, i32) {
    %c0_i32 = arith.constant 0 : i32
    %c0_i32_0 = arith.constant 0 : i32
    %c0_i32_1 = arith.constant 0 : i32
    return %arg0, %arg1, %c0_i32, %c0_i32_0 : i32, i32, i32, i32
  }
  func.func @transform_5(%arg0: i32, %arg1: i32) -> (i32, i32, i32, i32) {
    %c0_i32 = arith.constant 0 : i32
    %c0_i32_0 = arith.constant 0 : i32
    %c0_i32_1 = arith.constant 0 : i32
    return %arg0, %arg1, %c0_i32, %c0_i32_0 : i32, i32, i32, i32
  }
}

module attributes {stable_mosaic.version = 11 : i64} {
  func.func @_stage4_kernel(%arg0: i32, %arg1: i32, %arg2: memref<1x8x16x32xbf16, #tpu.memory_space<vmem>>, %arg3: memref<1x8x16x16xbf16, #tpu.memory_space<vmem>>, %arg4: memref<16x32xbf16, #tpu.memory_space<vmem>>, %arg5: memref<1x32xf32, #tpu.memory_space<vmem>>, %arg6: memref<1x32xf32, #tpu.memory_space<vmem>>, %arg7: memref<1x32xf32, #tpu.memory_space<vmem>>, %arg8: memref<1x32xf32, #tpu.memory_space<vmem>>, %arg9: memref<1x8x16x32xf32, #tpu.memory_space<vmem>>) attributes {dimension_semantics = [#tpu.dimension_semantics<parallel>, #tpu.dimension_semantics<parallel>], iteration_bounds = array<i64: 2, 2>, scalar_prefetch = 0 : i64, scratch_operands = 0 : i64, tpu.core_type = #tpu.core_type<tc>, window_params = [{transform_indices = @transform_0, window_bounds = array<i64: 1, 8, 16, 32>}, {transform_indices = @transform_1, window_bounds = array<i64: 1, 8, 16, 16>}, {pipeline_mode = #tpu.pipeline_mode<synchronous>, transform_indices = @transform_2, window_bounds = array<i64: 16, 32>}, {pipeline_mode = #tpu.pipeline_mode<synchronous>, transform_indices = @transform_3, window_bounds = array<i64: 1, 32>}, {pipeline_mode = #tpu.pipeline_mode<synchronous>, transform_indices = @transform_4, window_bounds = array<i64: 1, 32>}, {pipeline_mode = #tpu.pipeline_mode<synchronous>, transform_indices = @transform_5, window_bounds = array<i64: 1, 32>}, {pipeline_mode = #tpu.pipeline_mode<synchronous>, transform_indices = @transform_6, window_bounds = array<i64: 1, 32>}, {transform_indices = @transform_7, window_bounds = array<i64: 1, 8, 16, 32>}]} {
    %c0 = arith.constant 0 : index
    %c0_0 = arith.constant 0 : index
    %c0_1 = arith.constant 0 : index
    %c0_2 = arith.constant 0 : index
    %0 = vector.load %arg3[%c0, %c0_0, %c0_1, %c0_2] : memref<1x8x16x16xbf16, #tpu.memory_space<vmem>>, vector<1x8x16x16xbf16>
    %1 = vector.shape_cast %0 : vector<1x8x16x16xbf16> to vector<8x16x16xbf16>
    %2 = vector.shape_cast %1 : vector<8x16x16xbf16> to vector<128x16xbf16>
    %c0_3 = arith.constant 0 : index
    %c0_4 = arith.constant 0 : index
    %3 = vector.load %arg4[%c0_3, %c0_4] : memref<16x32xbf16, #tpu.memory_space<vmem>>, vector<16x32xbf16>
    %cst = arith.constant dense<0.000000e+00> : vector<128x32xf32>
    %4 = tpu.matmul %2, %3, %cst {dimension_numbers = #tpu.dot_dimension_numbers<[1], [0], [0], [1], [0, 0, 1, 1], [], []>} : vector<128x16xbf16>, vector<16x32xbf16>, vector<128x32xf32> -> vector<128x32xf32>
    %c0_5 = arith.constant 0 : index
    %c0_6 = arith.constant 0 : index
    %c0_7 = arith.constant 0 : index
    %c0_8 = arith.constant 0 : index
    %5 = vector.load %arg2[%c0_5, %c0_6, %c0_7, %c0_8] : memref<1x8x16x32xbf16, #tpu.memory_space<vmem>>, vector<1x8x16x32xbf16>
    %6 = vector.shape_cast %5 : vector<1x8x16x32xbf16> to vector<8x16x32xbf16>
    %7 = vector.shape_cast %6 : vector<8x16x32xbf16> to vector<128x32xbf16>
    %8 = arith.extf %7 : vector<128x32xbf16> to vector<128x32xf32>
    %c0_9 = arith.constant 0 : index
    %c0_10 = arith.constant 0 : index
    %9 = vector.load %arg5[%c0_9, %c0_10] : memref<1x32xf32, #tpu.memory_space<vmem>>, vector<1x32xf32>
    %10 = vector.broadcast %9 : vector<1x32xf32> to vector<128x32xf32>
    %11 = arith.mulf %8, %10 : vector<128x32xf32>
    %c0_11 = arith.constant 0 : index
    %c0_12 = arith.constant 0 : index
    %12 = vector.load %arg6[%c0_11, %c0_12] : memref<1x32xf32, #tpu.memory_space<vmem>>, vector<1x32xf32>
    %13 = vector.broadcast %12 : vector<1x32xf32> to vector<128x32xf32>
    %14 = arith.addf %11, %13 : vector<128x32xf32>
    %c0_13 = arith.constant 0 : index
    %c0_14 = arith.constant 0 : index
    %15 = vector.load %arg7[%c0_13, %c0_14] : memref<1x32xf32, #tpu.memory_space<vmem>>, vector<1x32xf32>
    %16 = vector.broadcast %15 : vector<1x32xf32> to vector<128x32xf32>
    %17 = arith.mulf %4, %16 : vector<128x32xf32>
    %18 = arith.addf %14, %17 : vector<128x32xf32>
    %c0_15 = arith.constant 0 : index
    %c0_16 = arith.constant 0 : index
    %19 = vector.load %arg8[%c0_15, %c0_16] : memref<1x32xf32, #tpu.memory_space<vmem>>, vector<1x32xf32>
    %20 = vector.broadcast %19 : vector<1x32xf32> to vector<128x32xf32>
    %21 = arith.addf %18, %20 : vector<128x32xf32>
    %cst_17 = arith.constant 0.000000e+00 : f32
    %22 = vector.broadcast %cst_17 : f32 to vector<128x32xf32>
    %23 = arith.maximumf %21, %22 : vector<128x32xf32>
    %24 = vector.shape_cast %23 : vector<128x32xf32> to vector<8x16x32xf32>
    %c0_18 = arith.constant 0 : index
    %c0_19 = arith.constant 0 : index
    %c0_20 = arith.constant 0 : index
    %c0_21 = arith.constant 0 : index
    %25 = vector.load %arg9[%c0_18, %c0_19, %c0_20, %c0_21] : memref<1x8x16x32xf32, #tpu.memory_space<vmem>>, vector<1x8x16x32xf32>
    %26 = vector.shape_cast %25 : vector<1x8x16x32xf32> to vector<8x16x32xf32>
    %27 = vector.shape_cast %24 : vector<8x16x32xf32> to vector<1x8x16x32xf32>
    tpu.vector_store %arg9[%c0_18, %c0_19, %c0_20, %c0_21], %27 {strides = array<i32>} : memref<1x8x16x32xf32, #tpu.memory_space<vmem>>, vector<1x8x16x32xf32>,
    return
  }
  func.func @transform_0(%arg0: i32, %arg1: i32) -> (i32, i32, i32, i32) {
    %c0_i32 = arith.constant 0 : i32
    %c0_i32_0 = arith.constant 0 : i32
    %c0_i32_1 = arith.constant 0 : i32
    return %arg0, %arg1, %c0_i32, %c0_i32_0 : i32, i32, i32, i32
  }
  func.func @transform_1(%arg0: i32, %arg1: i32) -> (i32, i32, i32, i32) {
    %c0_i32 = arith.constant 0 : i32
    %c0_i32_0 = arith.constant 0 : i32
    %c0_i32_1 = arith.constant 0 : i32
    return %arg0, %arg1, %c0_i32, %c0_i32_0 : i32, i32, i32, i32
  }
  func.func @transform_2(%arg0: i32, %arg1: i32) -> (i32, i32) {
    %c0_i32 = arith.constant 0 : i32
    %c0_i32_0 = arith.constant 0 : i32
    %c0_i32_1 = arith.constant 0 : i32
    return %c0_i32, %c0_i32_0 : i32, i32
  }
  func.func @transform_3(%arg0: i32, %arg1: i32) -> (i32, i32) {
    %c0_i32 = arith.constant 0 : i32
    %c0_i32_0 = arith.constant 0 : i32
    %c0_i32_1 = arith.constant 0 : i32
    return %c0_i32, %c0_i32_0 : i32, i32
  }
  func.func @transform_4(%arg0: i32, %arg1: i32) -> (i32, i32) {
    %c0_i32 = arith.constant 0 : i32
    %c0_i32_0 = arith.constant 0 : i32
    %c0_i32_1 = arith.constant 0 : i32
    return %c0_i32, %c0_i32_0 : i32, i32
  }
  func.func @transform_5(%arg0: i32, %arg1: i32) -> (i32, i32) {
    %c0_i32 = arith.constant 0 : i32
    %c0_i32_0 = arith.constant 0 : i32
    %c0_i32_1 = arith.constant 0 : i32
    return %c0_i32, %c0_i32_0 : i32, i32
  }
  func.func @transform_6(%arg0: i32, %arg1: i32) -> (i32, i32) {
    %c0_i32 = arith.constant 0 : i32
    %c0_i32_0 = arith.constant 0 : i32
    %c0_i32_1 = arith.constant 0 : i32
    return %c0_i32, %c0_i32_0 : i32, i32
  }
  func.func @transform_7(%arg0: i32, %arg1: i32) -> (i32, i32, i32, i32) {
    %c0_i32 = arith.constant 0 : i32
    %c0_i32_0 = arith.constant 0 : i32
    %c0_i32_1 = arith.constant 0 : i32
    return %arg0, %arg1, %c0_i32, %c0_i32_0 : i32, i32, i32, i32
  }
}

</mosaic_0001>

<bundles_post_ra>
// kernel: normal_rm_bottleneck_forward.4
= control target key start
LH: loop header
LB: loop body
LE: loop exit
PB: predicated region body
PF: predicated region fallthrough
CT: control target
= control target key end

     0   :  { %s888_s12 = smov 0   ;;  %s890_s13 = smov 0   ;;  %s1100_s0 = inlined_call_operand.vmem [shape: bf16[2,16,16,16], index: 0, kind: input, shape index: {}]   ;;  %s1101_s1 = inlined_call_operand.vmem [shape: bf16[16,40], index: 1, kind: input, shape index: {}]   ;;  %s1102_s2 = inlined_call_operand.vmem [shape: bf16[2,16,16,8], index: 2, kind: output, shape index: {0}]   ;;  %s1103_s3 = inlined_call_operand.vmem [shape: f32[2,2,2,40], index: 3, kind: output, shape index: {1}]  }
   0x1   :  { %s892_s14 = smov 0   ;;  %s894_s15 = smov 0  }
   0x2   :  { %s896_s16 = smov 0  }
   0x3 LB: > { %s23_s17 = sadd.s32 1, %s857_s14  ;;  %s26_s18 = sadd.s32 1, %s861_s15  ;;  %s865_s16 = sphi %s896_s16, %s14_s16   ;;  %s861_s15 = sphi %s894_s15, %s1107_s15   ;;  %s857_s14 = sphi %s892_s14, %s1106_s14   ;;  %s853_s13 = sphi %s890_s13, %s1105_s13   ;;  %s849_s12 = sphi %s888_s12, %s1104_s12  }
   0x4   : > { %p24_p0 = scmp.ge.s32.totalorder %s23_s17, 2  ;;  %p717_p1 = scmp.ge.s32.totalorder %s865_s16, 1 }
   0x5   : > { %p164_p2 = scmp.lt.s32.totalorder %s865_s16, 5 }
   0x6   : > { %s1109_s17 = smov (%p24_p0, %s23_s17), 0  ;;  %s1111_s18 = smov (!%p24_p0, %s26_s18), %s861_s15 }
   0x7   : > { %p165_p3 = pnand %p717_p1, %p164_p2  ;;  %p28_p4 = scmp.ge.s32.totalorder %s1111_s18, 2 }
   0x8   : > { %s718_s21 = sshll.u32 (!%p165_p3), %s849_s12, 3  ;;  %p207_p5 = scmp.lt.s32.totalorder (!%p165_p3), %s853_s13, 1 }
   0x9   : > { %s1113_s18 = smov (%p28_p4, %s1111_s18), 0  ;;  %168 = sbr.rel (%p165_p3) target bundleno = 313 (0x139), region = 28 }
   0xa   : > { %p209_p6 = scmp.lt.s32.totalorder (!%p165_p3), %s718_s21, 15  ;;  %s867_s29 = smov (!%p165_p3), 96  }
   0xb   : > { %p230_p7 = scmp.lt.s32.totalorder (!%p165_p3), %s849_s12, 1 }
   0xe   : > { %v782_v0 = vld [vmem:[%s1101_s1] sm:$0xff]  ;;  %s1115_s13 = smov (!%p207_p5, %s853_s13), 1  ;;  %s1117_s21 = smov (!%p209_p6, %s718_s21), 15  ;;  %vm301_vm0 = vcmask 130048   ;;  %vm375_vm1 = vcmask 326656   ;;  %vm466_vm2 = vcmask 1040384  }
   0xf   : > { %333 = vmatpush.bf16.msra.mxu0 %v782_v0  ;;  %783 = vmatpush.bf16.msra.mxu1 %v782_v0  ;;  %s720_s22 = sshll.u32 %s1115_s13, 5  ;;  %s719_s23 = sshll.u32 %s1117_s21, 1  ;;  %vm468_vm3 = vcmask 320512   ;;  %vm550_vm4 = vcmask 60416  }
  0x10   : > { %784 = vmatpush.bf16.msra.mxu2 %v782_v0  ;;  %785 = vmatpush.bf16.msra.mxu3 %v782_v0  ;;  %s927_s24 = sadd.s32 %s720_s22, %s719_s23  ;;  %s1119_s12 = smov (!%p230_p7, %s849_s12), 1 }
  0x11   : > { %s721_s25 = sshll.u32 %s927_s24, 2  ;;  %s726_s30 = sshll.u32 %s1115_s13, 1 }
  0x12   : > { %s215_s28 = scalar_lea.vmem %s1100_s0, %s721_s25  ;;  %s233_s4 = sadd.s32 %s726_s30, %s1119_s12 }
  0x13   : > { %v774_v1 = vld [vmem:[%s215_s28] sm:$0xff]  ;;  %v776_v2 = vld [vmem:[%s215_s28 + $0x10] sm:$0xff]  ;;  %v775_v5 = vld [vmem:[%s215_s28 + $0x8] sm:$0xff]  ;;  %s727_s5 = sshll.u32 %s233_s4, 1  ;;  %s1051_s11 = scalar_lea.vmem %s1102_s2, %s721_s25 }
  0x14   : > { %v778_v3 = vld [vmem:[%s215_s28 + $0x20] sm:$0xff]  ;;  %v780_v4 = vld [vmem:[%s215_s28 + $0x30] sm:$0xff]  ;;  %764 = vmatmul.msk.bf16.vlgmr.msra.gmra.mxu0 %vm301_vm0, %v774_v1  ;;  %766 = vmatmul.msk.bf16.vlgmr.msra.gmra.mxu1 %vm301_vm0, %v776_v2  ;;  %v777_v6 = vld [vmem:[%s215_s28 + $0x18] sm:$0xff]  ;;  %s235_s8 = scalar_lea.vmem %s1103_s3, %s727_s5 }
  0x15   : > { %768 = vmatmul.msk.bf16.vlgmr.msra.gmra.mxu2 %vm301_vm0, %v778_v3  ;;  %770 = vmatmul.msk.bf16.vlgmr.msra.gmra.mxu3 %vm301_vm0, %v780_v4  ;;  %v779_v7 = vld [vmem:[%s215_s28 + $0x28] sm:$0xff]  ;;  %v781_v8 = vld [vmem:[%s215_s28 + $0x38] sm:$0xff] }
  0x24   : > { %765 = vmatmul.msk.bf16.gmra.mxu0 %vm301_vm0, %v775_v5  ;;  %767 = vmatmul.msk.bf16.gmra.mxu1 %vm301_vm0, %v777_v6 }
  0x25   : > { %769 = vmatmul.msk.bf16.gmra.mxu2 %vm301_vm0, %v779_v7  ;;  %771 = vmatmul.msk.bf16.gmra.mxu3 %vm301_vm0, %v781_v8 }
  0x91   : > { %v335_v9 = vpop.f32.mrf.mxu0  ;;  %v345_v10 = vpop.f32.mrf.mxu1 }
  0x92   : > { %v474_v11 = vpack.c.bf16 %v345_v10, %v345_v10  ;;  %v470_v12 = vpack.c.bf16 %v335_v9, %v335_v9  ;;  %v413_v26 = vmul.f32 %v335_v9, %v335_v9  ;;  %v376_v30 = vsel %vm375_vm1, %v335_v9, 0.0 }
  0x93   : > { %v417_v40 = vmul.f32 %v345_v10, %v345_v10  ;;  %v383_v48 = vsel %vm375_vm1, %v345_v10, 0.0 }
  0x94   : > { %510 = vrot.lane.b32.xlu2 %v474_v11, %s867_s29  ;;  %502 = vrot.lane.b32.xlu0 %v470_v12, %s867_s29  ;;  %v429_v34 = vsel %vm375_vm1, %v413_v26, 0.0 }
  0x95   : > { %v436_v55 = vsel %vm375_vm1, %v417_v40, 0.0 }
  0x98   : > { %v945_v13 = vpop.f32.mrf.mxu2  ;;  %v947_v14 = vpop.f32.mrf.mxu3 }
  0x99   : > { %v478_v15 = vpack.c.bf16 %v945_v13, %v945_v13  ;;  %v337_v16 = vpop.f32.mrf.mxu0  ;;  %v347_v17 = vpop.f32.mrf.mxu1  ;;  %v482_v18 = vpack.c.bf16 %v947_v14, %v947_v14  ;;  %v421_v4 = vmul.f32 %v945_v13, %v945_v13  ;;  %v391_v9 = vsel %vm375_vm1, %v945_v13, 0.0 }
  0x9a   : > { %v475_v21 = vpack.c.bf16 %v347_v17, %v347_v17  ;;  %v414_v23 = vmul.f32 %v337_v16, %v337_v16  ;;  %v471_v24 = vpack.c.bf16 %v337_v16, %v337_v16  ;;  %v377_v27 = vsel %vm375_vm1, %v337_v16, 0.0 }
  0x9b   : > { %v378_v33 = vadd.f32 %v377_v27, %v376_v30  ;;  %v418_v49 = vmul.f32 %v347_v17, %v347_v17  ;;  %v385_v56 = vsel %vm375_vm1, %v347_v17, 0.0  ;;  %v444_v16 = vsel %vm375_vm1, %v421_v4, 0.0 }
  0x9c   : > { %518 = vrot.lane.b32.xlu2 %v478_v15, %s867_s29  ;;  %526 = vrot.lane.b32.xlu0 %v482_v18, %s867_s29  ;;  %v430_v31 = vsel %vm375_vm1, %v414_v23, 0.0 }
  0x9d   : > { %v431_v37 = vadd.f32 %v430_v31, %v429_v34  ;;  %v438_v61 = vsel %vm375_vm1, %v418_v49, 0.0  ;;  %v399_v34 = vsel %vm375_vm1, %v947_v14, 0.0 }
  0xa0   : > { %v955_v19 = vpop.f32.mrf.mxu2  ;;  %v960_v29 = vpop.f32.mrf.mxu3 }
  0xa1   : > { %v340_v20 = vpop.f32.mrf.mxu0  ;;  %v957_v22 = vpop.f32.mrf.mxu1  ;;  %v479_v44 = vpack.c.bf16 %v955_v19, %v955_v19  ;;  %v422_v10 = vmul.f32 %v955_v19, %v955_v19  ;;  %v393_v17 = vsel %vm375_vm1, %v955_v19, 0.0  ;;  %v425_v19 = vmul.f32 %v947_v14, %v947_v14 }
  0xa2   : > { %v472_v25 = vpack.c.bf16 %v340_v20, %v340_v20  ;;  %v415_v28 = vmul.f32 %v340_v20, %v340_v20  ;;  %v379_v32 = vsel %vm375_vm1, %v340_v20, 0.0  ;;  %v419_v51 = vmul.f32 %v957_v22, %v957_v22 }
  0xa3   : > { %v380_v38 = vadd.f32 %v379_v32, %v378_v33  ;;  %v387_v57 = vsel %vm375_vm1, %v957_v22, 0.0  ;;  %v476_v3 = vpack.c.bf16 %v957_v22, %v957_v22  ;;  %v446_v22 = vsel %vm375_vm1, %v422_v10, 0.0 }
  0xa4   : > { %512 = vrot.lane.b32.xlu2 %v475_v21, %s867_s29  ;;  %504 = vrot.lane.b32.xlu0 %v471_v24, %s867_s29  ;;  %v432_v35 = vsel %vm375_vm1, %v415_v28, 0.0  ;;  %v440_v62 = vsel %vm375_vm1, %v419_v51, 0.0  ;;  %v452_v40 = vsel %vm375_vm1, %v425_v19, 0.0  ;;  %v401_v14 = vsel %vm375_vm1, %v960_v29, 0.0 }
  0xa5   : > { %506 = vrot.lane.b32.xlu1 %v472_v25, %s867_s29  ;;  %v433_v45 = vadd.f32 %v432_v35, %v431_v37  ;;  %v426_v35 = vmul.f32 %v960_v29, %v960_v29 }
  0xa8   : > { %v360_v36 = vpop.f32.mrf.mxu2  ;;  %v979_v52 = vpop.f32.mrf.mxu3 }
  0xa9   : > { %v342_v39 = vpop.f32.mrf.mxu0  ;;  %v480_v41 = vpack.c.bf16 %v360_v36, %v360_v36  ;;  %v973_v47 = vpop.f32.mrf.mxu1  ;;  %v423_v18 = vmul.f32 %v360_v36, %v360_v36  ;;  %v395_v23 = vsel %vm375_vm1, %v360_v36, 0.0  ;;  %v484_v25 = vpack.c.bf16 %v979_v52, %v979_v52 }
  0xaa   : > { %v381_v42 = vsel %vm375_vm1, %v342_v39, 0.0  ;;  %v416_v43 = vmul.f32 %v342_v39, %v342_v39  ;;  %v420_v58 = vmul.f32 %v973_v47, %v973_v47  ;;  %v389_v0 = vsel %vm375_vm1, %v973_v47, 0.0 }
  0xab   : > { %v382_v46 = vadd.f32 %v381_v42, %v380_v38  ;;  %v473_v11 = vpack.c.bf16 %v342_v39, %v342_v39  ;;  %v448_v30 = vsel %vm375_vm1, %v423_v18, 0.0  ;;  %v477_v37 = vpack.c.bf16 %v973_v47, %v973_v47 }
  0xac   : > { %v434_v50 = vsel %vm375_vm1, %v416_v43, 0.0  ;;  %520 = vrot.lane.b32.xlu0 %v479_v44, %s867_s29  ;;  %v442_v6 = vsel %vm375_vm1, %v420_v58, 0.0  ;;  %v454_v44 = vsel %vm375_vm1, %v426_v35, 0.0 }
  0xad   : > { %v384_v53 = vadd.f32 %v383_v48, %v382_v46  ;;  %v435_v54 = vadd.f32 %v434_v50, %v433_v45  ;;  %522 = vrot.lane.b32.xlu1 %v480_v41, %s867_s29  ;;  %v427_v41 = vmul.f32 %v979_v52, %v979_v52  ;;  %v403_v45 = vsel %vm375_vm1, %v979_v52, 0.0 }
  0xaf   : > { %v437_v59 = vadd.f32 %v436_v55, %v435_v54  ;;  %v386_v60 = vadd.f32 %v385_v56, %v384_v53  ;;  %v456_v49 = vsel %vm375_vm1, %v427_v41, 0.0  ;;  %v483_v54 = vpack.c.bf16 %v960_v29, %v960_v29 }
  0xb0   : > { %v362_v63 = vpop.f32.mrf.mxu2  ;;  %v372_v20 = vpop.f32.mrf.mxu3 }
  0xb1   : > { %v388_v1 = vadd.f32 %v387_v57, %v386_v60  ;;  %v439_v2 = vadd.f32 %v438_v61, %v437_v59  ;;  %v481_v5 = vpack.c.bf16 %v362_v63, %v362_v63  ;;  %v424_v24 = vmul.f32 %v362_v63, %v362_v63 }
  0xb2   : > { %v485_v28 = vpack.c.bf16 %v372_v20, %v372_v20  ;;  %v397_v31 = vsel %vm375_vm1, %v362_v63, 0.0  ;;  %v428_v46 = vmul.f32 %v372_v20, %v372_v20  ;;  %v405_v50 = vsel %vm375_vm1, %v372_v20, 0.0 }
  0xb3   : > { %v441_v7 = vadd.f32 %v440_v62, %v439_v2  ;;  %v390_v8 = vadd.f32 %v389_v0, %v388_v1  ;;  %524 = vrot.lane.b32.xlu2 %v481_v5, %s867_s29  ;;  %v450_v36 = vsel %vm375_vm1, %v424_v24, 0.0 }
  0xb4   : > { %514 = vrot.lane.b32.xlu0 %v476_v3, %s867_s29  ;;  %v458_v55 = vsel %vm375_vm1, %v428_v46, 0.0 }
  0xb5   : > { %v392_v12 = vadd.f32 %v391_v9, %v390_v8  ;;  %v443_v15 = vadd.f32 %v442_v6, %v441_v7  ;;  %508 = vrot.lane.b32.xlu1 %v473_v11, %s867_s29 }
  0xb7   : > { %v394_v13 = vadd.f32 %v393_v17, %v392_v12  ;;  %v445_v21 = vadd.f32 %v444_v16, %v443_v15 }
  0xb9   : > { %v396_v26 = vadd.f32 %v395_v23, %v394_v13  ;;  %v447_v27 = vadd.f32 %v446_v22, %v445_v21 }
  0xbb   : > { %v449_v32 = vadd.f32 %v448_v30, %v447_v27  ;;  %v398_v33 = vadd.f32 %v397_v31, %v396_v26  ;;  %530 = vrot.lane.b32.xlu2 %v484_v25, %s867_s29 }
  0xbc   : > { %532 = vrot.lane.b32.xlu0 %v485_v28, %s867_s29 }
  0xbd   : > { %v400_v38 = vadd.f32 %v399_v34, %v398_v33  ;;  %v451_v39 = vadd.f32 %v450_v36, %v449_v32  ;;  %516 = vrot.lane.b32.xlu1 %v477_v37, %s867_s29 }
  0xbf   : > { %v402_v42 = vadd.f32 %v401_v14, %v400_v38  ;;  %v453_v43 = vadd.f32 %v452_v40, %v451_v39 }
  0xc1   : > { %v404_v47 = vadd.f32 %v403_v45, %v402_v42  ;;  %v455_v48 = vadd.f32 %v454_v44, %v453_v43 }
  0xc3   : > { %v457_v51 = vadd.f32 %v456_v49, %v455_v48  ;;  %v406_v53 = vadd.f32 %v405_v50, %v404_v47 }
  0xc5   : > { %v407_v56 = vrot.slane %v406_v53, 4  ;;  %v459_v57 = vadd.f32 %v458_v55, %v457_v51  ;;  %528 = vrot.lane.b32.xlu1 %v483_v54, %s867_s29 }
  0xc7   : > { %v408_v52 = vadd.f32 %v407_v56, %v406_v53  ;;  %v460_v58 = vrot.slane %v459_v57, 4 }
  0xc9   : > { %v409_v59 = vrot.slane %v408_v52, 2  ;;  %v461_v60 = vadd.f32 %v460_v58, %v459_v57 }
  0xcb   : > { %v410_v61 = vadd.f32 %v409_v59, %v408_v52  ;;  %v462_v62 = vrot.slane %v461_v60, 2 }
  0xcd   : > { %v411_v63 = vrot.slane %v410_v61, 1  ;;  %v463_v0 = vadd.f32 %v462_v62, %v461_v60 }
  0xcf   : > { %v464_v29 = vrot.slane %v463_v0, 1  ;;  %v412_v1 = vadd.f32 %v411_v63, %v410_v61 }
  0xd1   : > { %v465_v2 = vadd.f32 %v464_v29, %v463_v0 }
  0xd3   : > { %v467_v3 = vsel %vm466_vm2, %v412_v1, %v465_v2 }
  0xd4   : > { %469 = vst.msk [vmem:[%s235_s8] sm:$0x3] %vm468_vm3, %v467_v3 }
  0xee   : > { %v511_v4 = vpop.permute.xlu2 %510 }
  0xef   : > { %555 = vst.msk [vmem:[%s1051_s11 + $0x10] sm:$0xf] %vm550_vm4, %v511_v4 }
  0xf6   : > { %v519_v5 = vpop.permute.xlu2 %518 }
  0xf7   : > { %559 = vst.msk [vmem:[%s1051_s11 + $0x20] sm:$0xf] %vm550_vm4, %v519_v5 }
  0xfe   : > { %v513_v6 = vpop.permute.xlu2 %512 }
  0xff   : > { %556 = vst.msk [vmem:[%s1051_s11 + $0x14] sm:$0xf] %vm550_vm4, %v513_v6 }
 0x106   : > { %v503_v7 = vpop.permute.xlu0 %502 }
 0x107   : > { %551 = vst.msk [vmem:[%s1051_s11] sm:$0xf] %vm550_vm4, %v503_v7 }
 0x10d   : > { %v525_v8 = vpop.permute.xlu2 %524 }
 0x10e   : > { %562 = vst.msk [vmem:[%s1051_s11 + $0x2c] sm:$0xf] %vm550_vm4, %v525_v8  ;;  %v527_v9 = vpop.permute.xlu0 %526 }
 0x10f   : > { %563 = vst.msk [vmem:[%s1051_s11 + $0x30] sm:$0xf] %vm550_vm4, %v527_v9 }
 0x115   : > { %v531_v10 = vpop.permute.xlu2 %530 }
 0x116   : > { %565 = vst.msk [vmem:[%s1051_s11 + $0x38] sm:$0xf] %vm550_vm4, %v531_v10  ;;  %v505_v11 = vpop.permute.xlu0 %504 }
 0x117   : > { %552 = vst.msk [vmem:[%s1051_s11 + $0x4] sm:$0xf] %vm550_vm4, %v505_v11  ;;  %v507_v12 = vpop.permute.xlu1 %506 }
 0x118   : > { %553 = vst.msk [vmem:[%s1051_s11 + $0x8] sm:$0xf] %vm550_vm4, %v507_v12 }
 0x11e   : > { %v521_v15 = vpop.permute.xlu0 %520 }
 0x11f   : > { %560 = vst.msk [vmem:[%s1051_s11 + $0x24] sm:$0xf] %vm550_vm4, %v521_v15  ;;  %v523_v16 = vpop.permute.xlu1 %522 }
 0x120   : > { %561 = vst.msk [vmem:[%s1051_s11 + $0x28] sm:$0xf] %vm550_vm4, %v523_v16 }
 0x126   : > { %v515_v17 = vpop.permute.xlu0 %514 }
 0x127   : > { %557 = vst.msk [vmem:[%s1051_s11 + $0x18] sm:$0xf] %vm550_vm4, %v515_v17  ;;  %v509_v18 = vpop.permute.xlu1 %508 }
 0x128   : > { %554 = vst.msk [vmem:[%s1051_s11 + $0xc] sm:$0xf] %vm550_vm4, %v509_v18 }
 0x12e   : > { %v533_v20 = vpop.permute.xlu0 %532 }
 0x12f   : > { %566 = vst.msk [vmem:[%s1051_s11 + $0x3c] sm:$0xf] %vm550_vm4, %v533_v20  ;;  %v517_v13 = vpop.permute.xlu1 %516 }
 0x130   : > { %558 = vst.msk [vmem:[%s1051_s11 + $0x1c] sm:$0xf] %vm550_vm4, %v517_v13 }
 0x137   : > { %v529_v21 = vpop.permute.xlu1 %528 }
 0x138   : > { %564 = vst.msk [vmem:[%s1051_s11 + $0x34] sm:$0xf] %vm550_vm4, %v529_v21 }
 0x139 PF: > { %s14_s16 = sadd.s32 1, %s865_s16   ;;  %s1104_s12 = smov %s857_s14 }
 0x13a   : > { %p11_p8 = scmp.ge.s32.totalorder %s14_s16, 6   ;;  %s1105_s13 = smov %s861_s15 }
 0x13b   : > { %s1106_s14 = smov %s1109_s17  ;;  %s1107_s15 = smov %s1113_s18 }
 0x13c   :  { %13 = sbr.rel (!%p11_p8) target bundleno = 3 (0x3), region = 70 }

// kernel: normal_rm_bottleneck_forward.6
= control target key start
LH: loop header
LB: loop body
LE: loop exit
PB: predicated region body
PF: predicated region fallthrough
CT: control target
= control target key end

     0   :  { %s919_s18 = smov 0   ;;  %s921_s19 = smov 0   ;;  %s1153_s0 = inlined_call_operand.vmem [shape: bf16[2,16,16,8], index: 0, kind: input, shape index: {}]   ;;  %s1154_s1 = inlined_call_operand.vmem [shape: f32[1,8], index: 1, kind: input, shape index: {}]   ;;  %s1155_s2 = inlined_call_operand.vmem [shape: f32[1,8], index: 2, kind: input, shape index: {}]   ;;  %s1156_s3 = inlined_call_operand.vmem [shape: bf16[8,32], index: 3, kind: input, shape index: {}]   ;;  %s1157_s4 = inlined_call_operand.vmem [shape: bf16[2,16,16,32], index: 4, kind: output, shape index: {0}]   ;;  %s1158_s5 = inlined_call_operand.vmem [shape: f32[2,2,2,32], index: 5, kind: output, shape index: {1}]  }
   0x1   :  { %s923_s20 = smov 0   ;;  %s925_s21 = smov 0  }
   0x2   :  { %s927_s22 = smov 0  }
   0x3 LB: > { %s25_s23 = sadd.s32 1, %s879_s20  ;;  %s28_s24 = sadd.s32 1, %s883_s21  ;;  %s887_s22 = sphi %s927_s22, %s16_s22   ;;  %s883_s21 = sphi %s925_s21, %s1162_s21   ;;  %s879_s20 = sphi %s923_s20, %s1161_s20   ;;  %s875_s19 = sphi %s921_s19, %s1160_s19   ;;  %s871_s18 = sphi %s919_s18, %s1159_s18  }
   0x4   : > { %p26_p0 = scmp.ge.s32.totalorder %s25_s23, 2  ;;  %p744_p1 = scmp.ge.s32.totalorder %s887_s22, 1 }
   0x5   : > { %p214_p2 = scmp.lt.s32.totalorder %s887_s22, 5 }
   0x6   : > { %s1164_s23 = smov (%p26_p0, %s25_s23), 0  ;;  %s1166_s24 = smov (!%p26_p0, %s28_s24), %s883_s21 }
   0x7   : > { %p215_p3 = pnand %p744_p1, %p214_p2  ;;  %p30_p4 = scmp.ge.s32.totalorder %s1166_s24, 2 }
   0x8   : > { %s745_s27 = sshll.u32 (!%p215_p3), %s871_s18, 3  ;;  %p261_p5 = scmp.lt.s32.totalorder (!%p215_p3), %s875_s19, 1 }
   0x9   : > { %s1168_s24 = smov (%p30_p4, %s1166_s24), 0  ;;  %218 = sbr.rel (%p215_p3) target bundleno = 223 (0xdf), region = 36 }
   0xa   : > { %p263_p6 = scmp.lt.s32.totalorder (!%p215_p3), %s745_s27, 15  ;;  %p284_p7 = scmp.lt.s32.totalorder (!%p215_p3), %s871_s18, 1 }
   0xe   : > { %v387_v0 = vld [vmem:[%s1156_s3] sm:$0xf]  ;;  %vm413_vm0 = vcmask 1043456   ;;  %s1170_s19 = smov (!%p261_p5, %s875_s19), 1  ;;  %s1172_s27 = smov (!%p263_p6, %s745_s27), 15  ;;  %vm388_vm1 = vcmask 64512  }
   0xf   : > { %v415_v1 = vsel %vm413_vm0, %v387_v0, 0  ;;  %s747_s28 = sshll.u32 %s1170_s19, 5  ;;  %s746_s29 = sshll.u32 %s1172_s27, 1  ;;  %v971_v2 = vld [vmem:[%s1154_s1] ss:$0 sm:$0xff]  ;;  %vm577_vm2 = vcmask 257024  }
  0x10   : > { %424 = vmatpush.bf16.msra.mxu0 %v415_v1  ;;  %804 = vmatpush.bf16.msra.mxu1 %v415_v1  ;;  %s958_s30 = sadd.s32 %s747_s28, %s746_s29  ;;  %v979_v8 = vld [vmem:[%s1155_s2] ss:$0 sm:$0xff]  ;;  %vm466_vm3 = vcmask 261120   ;;  %s1174_s18 = smov (!%p284_p7, %s871_s18), 1  ;;  %vm557_vm4 = vcmask 1040384   ;;  %vm559_vm5 = vcmask 254976  }
  0x11   : > { %805 = vmatpush.bf16.msra.mxu2 %v415_v1  ;;  %806 = vmatpush.bf16.msra.mxu3 %v415_v1  ;;  %s748_s6 = sshll.u32 %s958_s30, 2  ;;  %s753_s17 = sshll.u32 %s1170_s19, 1 }
  0x12   : > { %s966_s9 = scalar_lea.vmem %s1153_s0, %s748_s6  ;;  %s1031_s16 = scalar_lea.vmem %s1157_s4, %s748_s6 }
  0x13   : > { %v766_v3 = vld [vmem:[%s966_s9] sm:$0xff]   ;;  %v798_v4 = vld [vmem:[%s966_s9 + $0x10] sm:$0xff]   ;;  %v797_v32 = vld [vmem:[%s966_s9 + $0x8] sm:$0xff]   ;;  %s287_s25 = sadd.s32 %s753_s17, %s1174_s18 }
  0x14   : > { %v800_v5 = vld [vmem:[%s966_s9 + $0x20] sm:$0xff]   ;;  %v767_v6 = vunpack.c.l.bf16 %v766_v3  ;;  %v768_v7 = vunpack.c.h.bf16 %v766_v3  ;;  %v775_v9 = vunpack.c.l.bf16 %v798_v4  ;;  %v776_v10 = vunpack.c.h.bf16 %v798_v4  ;;  %v802_v11 = vld [vmem:[%s966_s9 + $0x30] sm:$0xff]   ;;  %v799_v37 = vld [vmem:[%s966_s9 + $0x18] sm:$0xff]   ;;  %s754_s26 = sshll.u32 %s287_s25, 1 }
  0x15   : > { %v783_v12 = vunpack.c.l.bf16 %v800_v5  ;;  %v784_v13 = vunpack.c.h.bf16 %v800_v5  ;;  %v791_v14 = vunpack.c.l.bf16 %v802_v11  ;;  %v792_v15 = vunpack.c.h.bf16 %v802_v11  ;;  %v801_v42 = vld [vmem:[%s966_s9 + $0x28] sm:$0xff]   ;;  %v803_v47 = vld [vmem:[%s966_s9 + $0x38] sm:$0xff]   ;;  %s289_s29 = scalar_lea.vmem %s1158_s5, %s754_s26 }
  0x16   : > { %v327_v16 = vmul.f32 %v971_v2, %v767_v6  ;;  %v328_v17 = vmul.f32 %v971_v2, %v768_v7  ;;  %v331_v18 = vmul.f32 %v971_v2, %v775_v9  ;;  %v332_v19 = vmul.f32 %v971_v2, %v776_v10 }
  0x17   : > { %v335_v20 = vmul.f32 %v971_v2, %v783_v12  ;;  %v336_v21 = vmul.f32 %v971_v2, %v784_v13  ;;  %v339_v22 = vmul.f32 %v971_v2, %v791_v14  ;;  %v340_v23 = vmul.f32 %v971_v2, %v792_v15 }
  0x18   : > { %v347_v24 = vadd.f32 %v979_v8, %v327_v16  ;;  %v348_v25 = vadd.f32 %v979_v8, %v328_v17  ;;  %v351_v26 = vadd.f32 %v979_v8, %v331_v18  ;;  %v352_v27 = vadd.f32 %v979_v8, %v332_v19 }
  0x19   : > { %v355_v28 = vadd.f32 %v979_v8, %v335_v20  ;;  %v356_v29 = vadd.f32 %v979_v8, %v336_v21  ;;  %v359_v30 = vadd.f32 %v979_v8, %v339_v22  ;;  %v360_v31 = vadd.f32 %v979_v8, %v340_v23 }
  0x1a   : > { %v363_v33 = vmax.f32 %v347_v24, 0.0  ;;  %v364_v34 = vmax.f32 %v348_v25, 0.0  ;;  %v367_v35 = vmax.f32 %v351_v26, 0.0  ;;  %v368_v36 = vmax.f32 %v352_v27, 0.0 }
  0x1b   : > { %v371_v38 = vmax.f32 %v355_v28, 0.0  ;;  %v372_v39 = vmax.f32 %v356_v29, 0.0  ;;  %v375_v40 = vmax.f32 %v359_v30, 0.0  ;;  %v376_v41 = vmax.f32 %v360_v31, 0.0 }
  0x1c   : > { %v379_v43 = vpack.c.bf16 %v364_v34, %v363_v33  ;;  %v381_v44 = vpack.c.bf16 %v368_v36, %v367_v35  ;;  %v771_v45 = vunpack.c.l.bf16 %v797_v32  ;;  %v772_v46 = vunpack.c.h.bf16 %v797_v32 }
  0x1d   : > { %v383_v48 = vpack.c.bf16 %v372_v39, %v371_v38  ;;  %v385_v49 = vpack.c.bf16 %v376_v41, %v375_v40  ;;  %v779_v50 = vunpack.c.l.bf16 %v799_v37  ;;  %v780_v51 = vunpack.c.h.bf16 %v799_v37 }
  0x1e   : > { %755 = vmatmul.msk.bf16.vlgmr.msra.gmra.mxu0 %vm388_vm1, %v379_v43  ;;  %757 = vmatmul.msk.bf16.vlgmr.msra.gmra.mxu1 %vm388_vm1, %v381_v44  ;;  %v329_v52 = vmul.f32 %v971_v2, %v771_v45  ;;  %v330_v53 = vmul.f32 %v971_v2, %v772_v46  ;;  %v787_v54 = vunpack.c.l.bf16 %v801_v42  ;;  %v788_v55 = vunpack.c.h.bf16 %v801_v42 }
  0x1f   : > { %759 = vmatmul.msk.bf16.vlgmr.msra.gmra.mxu2 %vm388_vm1, %v383_v48  ;;  %761 = vmatmul.msk.bf16.vlgmr.msra.gmra.mxu3 %vm388_vm1, %v385_v49  ;;  %v333_v56 = vmul.f32 %v971_v2, %v779_v50  ;;  %v334_v57 = vmul.f32 %v971_v2, %v780_v51  ;;  %v795_v58 = vunpack.c.l.bf16 %v803_v47  ;;  %v796_v59 = vunpack.c.h.bf16 %v803_v47 }
  0x20   : > { %v337_v60 = vmul.f32 %v971_v2, %v787_v54  ;;  %v338_v61 = vmul.f32 %v971_v2, %v788_v55  ;;  %v349_v0 = vadd.f32 %v979_v8, %v329_v52  ;;  %v350_v1 = vadd.f32 %v979_v8, %v330_v53 }
  0x21   : > { %v341_v62 = vmul.f32 %v971_v2, %v795_v58  ;;  %v342_v63 = vmul.f32 %v971_v2, %v796_v59  ;;  %v353_v3 = vadd.f32 %v979_v8, %v333_v56  ;;  %v354_v4 = vadd.f32 %v979_v8, %v334_v57 }
  0x22   : > { %v357_v5 = vadd.f32 %v979_v8, %v337_v60  ;;  %v358_v6 = vadd.f32 %v979_v8, %v338_v61  ;;  %v365_v10 = vmax.f32 %v349_v0, 0.0  ;;  %v366_v11 = vmax.f32 %v350_v1, 0.0 }
  0x23   : > { %v361_v7 = vadd.f32 %v979_v8, %v341_v62  ;;  %v362_v9 = vadd.f32 %v979_v8, %v342_v63  ;;  %v369_v2 = vmax.f32 %v353_v3, 0.0  ;;  %v370_v12 = vmax.f32 %v354_v4, 0.0 }
  0x24   : > { %v373_v13 = vmax.f32 %v357_v5, 0.0  ;;  %v374_v14 = vmax.f32 %v358_v6, 0.0  ;;  %v380_v17 = vpack.c.bf16 %v366_v11, %v365_v10 }
  0x25   : > { %v377_v15 = vmax.f32 %v361_v7, 0.0  ;;  %v378_v16 = vmax.f32 %v362_v9, 0.0  ;;  %v382_v18 = vpack.c.bf16 %v370_v12, %v369_v2 }
  0x26   : > { %v384_v19 = vpack.c.bf16 %v374_v14, %v373_v13 }
  0x27   : > { %v386_v20 = vpack.c.bf16 %v378_v16, %v377_v15 }
  0x2e   : > { %756 = vmatmul.msk.bf16.gmra.mxu0 %vm388_vm1, %v380_v17  ;;  %758 = vmatmul.msk.bf16.gmra.mxu1 %vm388_vm1, %v382_v18 }
  0x2f   : > { %760 = vmatmul.msk.bf16.gmra.mxu2 %vm388_vm1, %v384_v19  ;;  %762 = vmatmul.msk.bf16.gmra.mxu3 %vm388_vm1, %v386_v20 }
  0x9b   : > { %v426_v8 = vpop.f32.mrf.mxu0  ;;  %v436_v21 = vpop.f32.mrf.mxu1 }
  0x9c   : > { %v561_v22 = vpack.c.bf16 %v426_v8, %v426_v8  ;;  %v565_v23 = vpack.c.bf16 %v436_v21, %v436_v21  ;;  %v504_v40 = vmul.f32 %v426_v8, %v426_v8  ;;  %v467_v44 = vsel %vm466_vm3, %v426_v8, 0.0 }
  0x9d   : > { %v508_v57 = vmul.f32 %v436_v21, %v436_v21  ;;  %v474_v0 = vsel %vm466_vm3, %v436_v21, 0.0 }
  0x9e   : > { %578 = vst.msk [vmem:[%s1031_s16] sm:$0xf] %vm577_vm2, %v561_v22  ;;  %v520_v48 = vsel %vm466_vm3, %v504_v40, 0.0 }
  0x9f   : > { %582 = vst.msk [vmem:[%s1031_s16 + $0x10] sm:$0xf] %vm577_vm2, %v565_v23  ;;  %v527_v7 = vsel %vm466_vm3, %v508_v57, 0.0 }
  0xa2   : > { %v1037_v24 = vpop.f32.mrf.mxu2  ;;  %v1039_v25 = vpop.f32.mrf.mxu3 }
  0xa3   : > { %v428_v26 = vpop.f32.mrf.mxu0  ;;  %v438_v27 = vpop.f32.mrf.mxu1  ;;  %v569_v28 = vpack.c.bf16 %v1037_v24, %v1037_v24  ;;  %v573_v31 = vpack.c.bf16 %v1039_v25, %v1039_v25  ;;  %v512_v19 = vmul.f32 %v1037_v24, %v1037_v24 }
  0xa4   : > { %v562_v29 = vpack.c.bf16 %v428_v26, %v428_v26  ;;  %v566_v30 = vpack.c.bf16 %v438_v27, %v438_v27  ;;  %v505_v37 = vmul.f32 %v428_v26, %v428_v26  ;;  %v468_v41 = vsel %vm466_vm3, %v428_v26, 0.0 }
  0xa5   : > { %586 = vst.msk [vmem:[%s1031_s16 + $0x20] sm:$0xf] %vm577_vm2, %v569_v28  ;;  %v469_v47 = vadd.f32 %v468_v41, %v467_v44  ;;  %v509_v1 = vmul.f32 %v438_v27, %v438_v27  ;;  %v476_v9 = vsel %vm466_vm3, %v438_v27, 0.0  ;;  %v482_v26 = vsel %vm466_vm3, %v1037_v24, 0.0 }
  0xa6   : > { %579 = vst.msk [vmem:[%s1031_s16 + $0x4] sm:$0xf] %vm577_vm2, %v562_v29  ;;  %v521_v45 = vsel %vm466_vm3, %v505_v37, 0.0 }
  0xa7   : > { %583 = vst.msk [vmem:[%s1031_s16 + $0x14] sm:$0xf] %vm577_vm2, %v566_v30  ;;  %v522_v52 = vadd.f32 %v521_v45, %v520_v48  ;;  %v529_v12 = vsel %vm466_vm3, %v509_v1, 0.0 }
  0xa8   : > { %590 = vst.msk [vmem:[%s1031_s16 + $0x30] sm:$0xf] %vm577_vm2, %v573_v31 }
  0xaa   : > { %v1053_v32 = vpop.f32.mrf.mxu2  ;;  %v1055_v33 = vpop.f32.mrf.mxu3 }
  0xab   : > { %v431_v34 = vpop.f32.mrf.mxu0  ;;  %v441_v35 = vpop.f32.mrf.mxu1  ;;  %v570_v36 = vpack.c.bf16 %v1053_v32, %v1053_v32  ;;  %v574_v43 = vpack.c.bf16 %v1055_v33, %v1055_v33  ;;  %v513_v27 = vmul.f32 %v1053_v32, %v1053_v32  ;;  %v517_v48 = vmul.f32 %v1055_v33, %v1055_v33 }
  0xac   : > { %v563_v38 = vpack.c.bf16 %v431_v34, %v431_v34  ;;  %v567_v39 = vpack.c.bf16 %v441_v35, %v441_v35  ;;  %v506_v42 = vmul.f32 %v431_v34, %v431_v34  ;;  %v470_v46 = vsel %vm466_vm3, %v431_v34, 0.0 }
  0xad   : > { %587 = vst.msk [vmem:[%s1031_s16 + $0x24] sm:$0xf] %vm577_vm2, %v570_v36  ;;  %v471_v53 = vadd.f32 %v470_v46, %v469_v47  ;;  %v510_v10 = vmul.f32 %v441_v35, %v441_v35  ;;  %v478_v13 = vsel %vm466_vm3, %v441_v35, 0.0  ;;  %v535_v34 = vsel %vm466_vm3, %v512_v19, 0.0 }
  0xae   : > { %580 = vst.msk [vmem:[%s1031_s16 + $0x8] sm:$0xf] %vm577_vm2, %v563_v38  ;;  %v523_v49 = vsel %vm466_vm3, %v506_v42, 0.0  ;;  %v484_v35 = vsel %vm466_vm3, %v1053_v32, 0.0  ;;  %v537_v38 = vsel %vm466_vm3, %v513_v27, 0.0  ;;  %v490_v47 = vsel %vm466_vm3, %v1039_v25, 0.0 }
  0xaf   : > { %584 = vst.msk [vmem:[%s1031_s16 + $0x18] sm:$0xf] %vm577_vm2, %v567_v39  ;;  %v524_v61 = vadd.f32 %v523_v49, %v522_v52  ;;  %v531_v20 = vsel %vm466_vm3, %v510_v10, 0.0 }
  0xb0   : > { %591 = vst.msk [vmem:[%s1031_s16 + $0x34] sm:$0xf] %vm577_vm2, %v574_v43  ;;  %v516_v43 = vmul.f32 %v1039_v25, %v1039_v25  ;;  %v545_v25 = vsel %vm466_vm3, %v517_v48, 0.0 }
  0xb2   : > { %v451_v50 = vpop.f32.mrf.mxu2  ;;  %v1075_v51 = vpop.f32.mrf.mxu3 }
  0xb3   : > { %v433_v54 = vpop.f32.mrf.mxu0  ;;  %v443_v55 = vpop.f32.mrf.mxu1  ;;  %v571_v56 = vpack.c.bf16 %v451_v50, %v451_v50  ;;  %v575_v4 = vpack.c.bf16 %v1075_v51, %v1075_v51  ;;  %v514_v36 = vmul.f32 %v451_v50, %v451_v50  ;;  %v486_v39 = vsel %vm466_vm3, %v451_v50, 0.0 }
  0xb4   : > { %v472_v58 = vsel %vm466_vm3, %v433_v54, 0.0  ;;  %v507_v59 = vmul.f32 %v433_v54, %v433_v54  ;;  %v564_v60 = vpack.c.bf16 %v433_v54, %v433_v54  ;;  %v568_v63 = vpack.c.bf16 %v443_v55, %v443_v55 }
  0xb5   : > { %v473_v62 = vadd.f32 %v472_v58, %v471_v53  ;;  %588 = vst.msk [vmem:[%s1031_s16 + $0x28] sm:$0xf] %vm577_vm2, %v571_v56  ;;  %v511_v14 = vmul.f32 %v443_v55, %v443_v55  ;;  %v480_v8 = vsel %vm466_vm3, %v443_v55, 0.0  ;;  %v539_v44 = vsel %vm466_vm3, %v514_v36, 0.0 }
  0xb6   : > { %v525_v3 = vsel %vm466_vm3, %v507_v59, 0.0  ;;  %581 = vst.msk [vmem:[%s1031_s16 + $0xc] sm:$0xf] %vm577_vm2, %v564_v60  ;;  %v543_v53 = vsel %vm466_vm3, %v516_v43, 0.0  ;;  %v492_v54 = vsel %vm466_vm3, %v1055_v33, 0.0  ;;  %v518_v55 = vmul.f32 %v1075_v51, %v1075_v51 }
  0xb7   : > { %v475_v5 = vadd.f32 %v474_v0, %v473_v62  ;;  %v526_v6 = vadd.f32 %v525_v3, %v524_v61  ;;  %585 = vst.msk [vmem:[%s1031_s16 + $0x1c] sm:$0xf] %vm577_vm2, %v568_v63  ;;  %v533_v28 = vsel %vm466_vm3, %v511_v14, 0.0  ;;  %v494_v58 = vsel %vm466_vm3, %v1075_v51, 0.0 }
  0xb8   : > { %592 = vst.msk [vmem:[%s1031_s16 + $0x38] sm:$0xf] %vm577_vm2, %v575_v4  ;;  %v547_v62 = vsel %vm466_vm3, %v518_v55, 0.0 }
  0xb9   : > { %v528_v11 = vadd.f32 %v527_v7, %v526_v6  ;;  %v477_v2 = vadd.f32 %v476_v9, %v475_v5 }
  0xba   : > { %v453_v15 = vpop.f32.mrf.mxu2  ;;  %v463_v18 = vpop.f32.mrf.mxu3 }
  0xbb   : > { %v479_v16 = vadd.f32 %v478_v13, %v477_v2  ;;  %v530_v17 = vadd.f32 %v529_v12, %v528_v11  ;;  %v572_v21 = vpack.c.bf16 %v453_v15, %v453_v15  ;;  %v576_v29 = vpack.c.bf16 %v463_v18, %v463_v18 }
  0xbc   : > { %v515_v40 = vmul.f32 %v453_v15, %v453_v15  ;;  %v488_v45 = vsel %vm466_vm3, %v453_v15, 0.0  ;;  %v519_v59 = vmul.f32 %v463_v18, %v463_v18  ;;  %v496_v63 = vsel %vm466_vm3, %v463_v18, 0.0 }
  0xbd   : > { %v481_v22 = vadd.f32 %v480_v8, %v479_v16  ;;  %v532_v23 = vadd.f32 %v531_v20, %v530_v17  ;;  %589 = vst.msk [vmem:[%s1031_s16 + $0x2c] sm:$0xf] %vm577_vm2, %v572_v21 }
  0xbe   : > { %593 = vst.msk [vmem:[%s1031_s16 + $0x3c] sm:$0xf] %vm577_vm2, %v576_v29  ;;  %v541_v49 = vsel %vm466_vm3, %v515_v40, 0.0  ;;  %v549_v1 = vsel %vm466_vm3, %v519_v59, 0.0 }
  0xbf   : > { %v483_v30 = vadd.f32 %v482_v26, %v481_v22  ;;  %v534_v31 = vadd.f32 %v533_v28, %v532_v23 }
  0xc1   : > { %v536_v37 = vadd.f32 %v535_v34, %v534_v31  ;;  %v485_v24 = vadd.f32 %v484_v35, %v483_v30 }
  0xc3   : > { %v487_v41 = vadd.f32 %v486_v39, %v485_v24  ;;  %v538_v42 = vadd.f32 %v537_v38, %v536_v37 }
  0xc5   : > { %v540_v32 = vadd.f32 %v539_v44, %v538_v42  ;;  %v489_v46 = vadd.f32 %v488_v45, %v487_v41 }
  0xc7   : > { %v491_v50 = vadd.f32 %v490_v47, %v489_v46  ;;  %v542_v52 = vadd.f32 %v541_v49, %v540_v32 }
  0xc9   : > { %v544_v56 = vadd.f32 %v543_v53, %v542_v52  ;;  %v493_v57 = vadd.f32 %v492_v54, %v491_v50 }
  0xcb   : > { %v495_v60 = vadd.f32 %v494_v58, %v493_v57  ;;  %v546_v61 = vadd.f32 %v545_v25, %v544_v56 }
  0xcd   : > { %v548_v33 = vadd.f32 %v547_v62, %v546_v61  ;;  %v497_v0 = vadd.f32 %v496_v63, %v495_v60 }
  0xcf   : > { %v498_v3 = vrot.slane %v497_v0, 4  ;;  %v550_v4 = vadd.f32 %v549_v1, %v548_v33 }
  0xd1   : > { %v499_v5 = vadd.f32 %v498_v3, %v497_v0  ;;  %v551_v6 = vrot.slane %v550_v4, 4 }
  0xd3   : > { %v500_v7 = vrot.slane %v499_v5, 2  ;;  %v552_v51 = vadd.f32 %v551_v6, %v550_v4 }
  0xd5   : > { %v501_v9 = vadd.f32 %v500_v7, %v499_v5  ;;  %v553_v10 = vrot.slane %v552_v51, 2 }
  0xd7   : > { %v502_v11 = vrot.slane %v501_v9, 1  ;;  %v554_v2 = vadd.f32 %v553_v10, %v552_v51 }
  0xd9   : > { %v555_v12 = vrot.slane %v554_v2, 1  ;;  %v503_v13 = vadd.f32 %v502_v11, %v501_v9 }
  0xdb   : > { %v556_v14 = vadd.f32 %v555_v12, %v554_v2 }
  0xdd   : > { %v558_v15 = vsel %vm557_vm4, %v503_v13, %v556_v14 }
  0xde   : > { %560 = vst.msk [vmem:[%s289_s29] sm:$0x3] %vm559_vm5, %v558_v15 }
  0xdf PF: > { %s16_s22 = sadd.s32 1, %s887_s22   ;;  %s1159_s18 = smov %s879_s20 }
  0xe0   : > { %p13_p8 = scmp.ge.s32.totalorder %s16_s22, 6   ;;  %s1160_s19 = smov %s883_s21 }
  0xe1   : > { %s1161_s20 = smov %s1164_s23  ;;  %s1162_s21 = smov %s1168_s24 }
  0xe2   :  { %15 = sbr.rel (!%p13_p8) target bundleno = 3 (0x3), region = 78 }

// kernel: normal_rm_bottleneck_forward.7
= control target key start
LH: loop header
LB: loop body
LE: loop exit
PB: predicated region body
PF: predicated region fallthrough
CT: control target
= control target key end

     0   :  { %12 = vsyncpa [#allocation3], 0  ;;  %s1391_s0 = inlined_call_operand.vmem [shape: bf16[2,16,16,32], index: 0, kind: input, shape index: {}]   ;;  %s1392_s1 = inlined_call_operand.vmem [shape: bf16[2,16,16,16], index: 1, kind: input, shape index: {}]   ;;  %s1393_s2 = inlined_call_operand.vmem [shape: bf16[16,32], index: 2, kind: input, shape index: {}]   ;;  %s1394_s3 = inlined_call_operand.vmem [shape: f32[1,32], index: 3, kind: input, shape index: {}]   ;;  %s1395_s4 = inlined_call_operand.vmem [shape: f32[1,32], index: 4, kind: input, shape index: {}]   ;;  %s1396_s5 = inlined_call_operand.vmem [shape: f32[1,32], index: 5, kind: input, shape index: {}]   ;;  %s1397_s6 = inlined_call_operand.vmem [shape: f32[1,32], index: 6, kind: input, shape index: {}]   ;;  %s1398_s7 = inlined_call_operand.hbm [shape: f32[2,16,16,32], index: 7, kind: output, shape index: {}]  }
   0x1   :  { %14 = vsyncpa [#allocation3 + $0x1], 0  ;;  %s1107_s24 = smov 0   ;;  %s1109_s25 = smov 0  }
   0x2   :  { %s1111_s26 = smov 0   ;;  %s1113_s27 = smov 0  }
   0x3   :  { %s1115_s28 = smov 0   ;;  %s1117_s29 = smov 0  }
   0x4   :  { %s1119_s30 = smov 0   ;;  %s1121_s8 = smov 0  }
   0x5 LB: > { %s775_s9 = sadd.s32 4294967295, %s1063_s8   ;;  %s776_s10 = sadd.s32 4294967294, %s1063_s8   ;;  %s1063_s8 = sphi %s1121_s8, %s20_s8   ;;  %s1059_s30 = sphi %s1119_s30, %s1407_s30   ;;  %s1055_s29 = sphi %s1117_s29, %s1406_s29   ;;  %s1051_s28 = sphi %s1115_s28, %s1405_s28   ;;  %s1047_s27 = sphi %s1113_s27, %s1404_s27   ;;  %s1043_s26 = sphi %s1111_s26, %s1403_s26   ;;  %s1039_s25 = sphi %s1109_s25, %s1402_s25   ;;  %s1035_s24 = sphi %s1107_s24, %s1401_s24  }
   0x6   : > { %s29_s11 = sadd.s32 1, %s1055_s29  ;;  %s32_s12 = sadd.s32 1, %s1059_s30 }
   0x7   : > { %p30_p0 = scmp.ge.s32.totalorder %s29_s11, 2  ;;  %p212_p1 = scmp.ne.s32.totalorder %s1043_s26, %s1039_s25 }
   0x8   : > { %p213_p2 = scmp.eq.s32.totalorder %s775_s9, 3  ;;  %p218_p5 = scmp.ne.s32.totalorder %s1039_s25, %s1035_s24 }
   0x9   : > { %s1409_s11 = smov (%p30_p0, %s29_s11), 0  ;;  %s1411_s12 = smov (!%p30_p0, %s32_s12), %s1059_s30 }
   0xa   : > { %s198_s13 = ssub.s32 %s1055_s29, %s1409_s11  ;;  %p1158_p3 = por %p213_p2, %p212_p1 }
   0xb   : > { %p34_p4 = scmp.ge.s32.totalorder %s1411_s12, 2  ;;  %p219_p6 = scmp.eq.s32.totalorder %s776_s10, 3 }
   0xc   : > { %p779_p7 = scmp.ge.s32.totalorder %s1063_s8, 1  ;;  %p280_p9 = scmp.lt.s32.totalorder %s1063_s8, 5 }
   0xd   : > { %s1413_s12 = smov (%p34_p4, %s1411_s12), 0  ;;  %p1167_p8 = por %p219_p6, %p218_p5 }
   0xe   : > { %s197_s16 = ssub.s32 %s1059_s30, %s1413_s12  ;;  %s202_s17 = sadd.s32 1, %s1043_s26 }
   0xf   : > { %s199_s18 = sor.u32 %s198_s13, %s197_s16  ;;  %p281_p10 = pnand %p779_p7, %p280_p9 }
  0x10   : > { %p200_p11 = scmp.eq.s32.totalorder %s199_s18, 0  ;;  %s781_s22 = sshll.u32 (!%p281_p10), %s1047_s27, 3 }
  0x11   : > { %284 = sbr.rel (%p281_p10) target bundleno = 199 (0xc7), region = 48  ;;  %p328_p12 = scmp.lt.s32.totalorder (!%p281_p10), %s1051_s28, 1 }
  0x12   : > { %s1176_s19 = scalar_select %p200_p11, %s1043_s26, %s202_s17  }
  0x13   : > { %p330_p13 = scmp.lt.s32.totalorder (!%p281_p10), %s781_s22, 15  ;;  %s989_s17 = scalar_lea.hbm (!%p281_p10), %s1398_s7, 512 }
  0x16   : > { %v848_v0 = vld [vmem:[%s1393_s2] sm:$0xff]  ;;  %s329_s23 = scalar_select %p328_p12, %s1051_s28, 1  ;;  %vm415_vm0 = vcmask 130048   ;;  %vm633_vm1 = vcmask 261120  }
  0x17   : > { %447 = vmatpush.bf16.msra.mxu0 %v848_v0  ;;  %889 = vmatpush.bf16.msra.mxu1 %v848_v0  ;;  %s1415_s22 = smov (!%p330_p13, %s781_s22), 15  ;;  %v1205_v12 = vld [vmem:[%s1394_s3] ss:$0 sm:$0xff] }
  0x18   : > { %890 = vmatpush.bf16.msra.mxu2 %v848_v0  ;;  %891 = vmatpush.bf16.msra.mxu3 %v848_v0  ;;  %s783_s9 = sshll.u32 %s329_s23, 5  ;;  %s782_s10 = sshll.u32 %s1415_s22, 1  ;;  %v1211_v15 = vld [vmem:[%s1395_s4] ss:$0 sm:$0xff] }
  0x19   : > { %s334_s13 = sadd.s32 %s783_s9, %s782_s10  ;;  %v1219_v19 = vld [vmem:[%s1396_s5] ss:$0 sm:$0xff] }
  0x1a   : > { %s784_s16 = sshll.u32 %s334_s13, 2  ;;  %v1228_v29 = vld [vmem:[%s1397_s6] ss:$0 sm:$0xff]  ;;  %s836_s13 = sshll.u32 %s1051_s28, 5 }
  0x1b   : > { %s347_s20 = scalar_lea.vmem %s1392_s1, %s784_s16  ;;  %s1198_s23 = scalar_lea.vmem %s1391_s0, %s784_s16 }
  0x1c   : > { %v840_v1 = vld [vmem:[%s347_s20] sm:$0xff]  ;;  %v842_v2 = vld [vmem:[%s347_s20 + $0x10] sm:$0xff]  ;;  %v841_v5 = vld [vmem:[%s347_s20 + $0x8] sm:$0xff] }
  0x1d   : > { %v844_v3 = vld [vmem:[%s347_s20 + $0x20] sm:$0xff]  ;;  %v846_v4 = vld [vmem:[%s347_s20 + $0x30] sm:$0xff]  ;;  %825 = vmatmul.msk.bf16.vlgmr.msra.gmra.mxu0 %vm415_vm0, %v840_v1  ;;  %827 = vmatmul.msk.bf16.vlgmr.msra.gmra.mxu1 %vm415_vm0, %v842_v2  ;;  %v843_v6 = vld [vmem:[%s347_s20 + $0x18] sm:$0xff] }
  0x1e   : > { %829 = vmatmul.msk.bf16.vlgmr.msra.gmra.mxu2 %vm415_vm0, %v844_v3  ;;  %831 = vmatmul.msk.bf16.vlgmr.msra.gmra.mxu3 %vm415_vm0, %v846_v4  ;;  %v845_v7 = vld [vmem:[%s347_s20 + $0x28] sm:$0xff]  ;;  %v847_v8 = vld [vmem:[%s347_s20 + $0x38] sm:$0xff]  ;;  %v851_v9 = vld [vmem:[%s1198_s23] sm:$0xff]   ;;  %s324_s20 = sand.u32 1, %s1039_s25  }
  0x1f   : > { %v883_v10 = vld [vmem:[%s1198_s23 + $0x10] sm:$0xff]   ;;  %v852_v11 = vunpack.c.l.bf16 %v851_v9  ;;  %v885_v17 = vld [vmem:[%s1198_s23 + $0x20] sm:$0xff]   ;;  %v853_v22 = vunpack.c.h.bf16 %v851_v9  ;;  %s780_s9 = sshll.u32 %s324_s20, 7  ;;  %v1238_v39 = vld [vmem:[%s1198_s23 + $0x8] sm:$0xff]  }
  0x20   : > { %v860_v13 = vunpack.c.l.bf16 %v883_v10  ;;  %v887_v18 = vld [vmem:[%s1198_s23 + $0x30] sm:$0xff]   ;;  %v868_v20 = vunpack.c.l.bf16 %v885_v17  ;;  %v861_v23 = vunpack.c.h.bf16 %v883_v10  ;;  %v869_v37 = vunpack.c.h.bf16 %v885_v17  ;;  %v1241_v40 = vld [vmem:[%s1198_s23 + $0x18] sm:$0xff]   ;;  %s1255_s10 = scalar_lea.vmem [#allocation2], %s780_s9  ;;  %v1264_v63 = vld [vmem:[%s1198_s23 + $0x28] sm:$0xff]   ;;  %s651_s9 = scalar_lea.sflag [#allocation3], %s324_s20 }
  0x21   : > { %v525_v14 = vmul.f32 %v1205_v12, %v852_v11  ;;  %v876_v21 = vunpack.c.l.bf16 %v887_v18  ;;  %v526_v33 = vmul.f32 %v1205_v12, %v853_v22  ;;  %v877_v38 = vunpack.c.h.bf16 %v887_v18  ;;  %v1267_v0 = vld [vmem:[%s1198_s23 + $0x38] sm:$0xff]   ;;  %s849_s23 = sshll.u32 %s1047_s27, 4  ;;  %s666_s21 = sshll.u32 %s1255_s10, 4  ;;  %s667_s21 = int_to_ptr.vmem [resolvable:$true] %s666_s21 }
  0x22   : > { %v529_v16 = vmul.f32 %v1205_v12, %v860_v13  ;;  %v533_v31 = vmul.f32 %v1205_v12, %v868_v20  ;;  %v530_v34 = vmul.f32 %v1205_v12, %v861_v23  ;;  %v856_v51 = vunpack.c.l.bf16 %v1238_v39  ;;  %s663_s27 = sadd.s32 %s849_s23, %s836_s13 }
  0x23   : > { %v545_v24 = vadd.f32 %v1211_v15, %v525_v14  ;;  %v537_v32 = vmul.f32 %v1205_v12, %v876_v21  ;;  %v546_v45 = vadd.f32 %v1211_v15, %v526_v33  ;;  %v864_v52 = vunpack.c.l.bf16 %v1241_v40  ;;  %s837_s28 = sshll.u32 %s663_s27, 3 }
  0x24   : > { %v549_v25 = vadd.f32 %v1211_v15, %v529_v16  ;;  %v553_v43 = vadd.f32 %v1211_v15, %v533_v31  ;;  %v550_v46 = vadd.f32 %v1211_v15, %v530_v34  ;;  %v534_v57 = vmul.f32 %v1205_v12, %v869_v37  ;;  %s665_s18 = scalar_lea.hbm %s1398_s7, %s837_s28 }
  0x25   : > { %v557_v44 = vadd.f32 %v1211_v15, %v537_v32  ;;  %v538_v58 = vmul.f32 %v1205_v12, %v877_v38  ;;  %v527_v3 = vmul.f32 %v1205_v12, %v856_v51  ;;  %v531_v4 = vmul.f32 %v1205_v12, %v864_v52  ;;  %s668_s22 = sshll.u32 %s665_s18, 4  ;;  %s669_s22 = int_to_ptr.hbm [resolvable:$true] %s668_s22 }
  0x26   : > { %v872_v11 = vunpack.c.l.bf16 %v1264_v63  ;;  %v880_v13 = vunpack.c.l.bf16 %v1267_v0  ;;  %v857_v17 = vunpack.c.h.bf16 %v1238_v39  ;;  %v865_v18 = vunpack.c.h.bf16 %v1241_v40  ;;  %s983_s23 = sshra.s32 %s669_s22, 4  ;;  %s984_s23 = int_to_ptr.hbm [resolvable:$true] %s983_s23 }
  0x27   : > { %s985_s13 = scalar_lea.hbm %s984_s23, 128  ;;  %p990_p4 = scmp.lt.s32.totalorder %s984_s23, %s1398_s7 }
  0x28   : > { %v535_v33 = vmul.f32 %v1205_v12, %v872_v11  ;;  %v539_v34 = vmul.f32 %v1205_v12, %v880_v13  ;;  %v528_v39 = vmul.f32 %v1205_v12, %v857_v17  ;;  %v532_v40 = vmul.f32 %v1205_v12, %v865_v18  ;;  %p986_p0 = scmp.ne.s32.totalorder %s984_s23, %s985_s13  ;;  %p991_p5 = scmp.lt.s32.totalorder %s989_s17, %s985_s13 }
  0x2a   : > { %p987_p1 = pnand %p986_p0, %p1158_p3  ;;  %p992_p6 = por %p991_p5, %p990_p4 }
  0x2c   : > { %p988_p2 = pneg %p987_p1 }
  0x2d   : > { %826 = vmatmul.msk.bf16.gmra.mxu0 %vm415_vm0, %v841_v5  ;;  %828 = vmatmul.msk.bf16.gmra.mxu1 %vm415_vm0, %v843_v6 }
  0x2e   : > { %830 = vmatmul.msk.bf16.gmra.mxu2 %vm415_vm0, %v845_v7  ;;  %832 = vmatmul.msk.bf16.gmra.mxu3 %vm415_vm0, %v847_v8  ;;  %v554_v7 = vadd.f32 %v1211_v15, %v534_v57  ;;  %v558_v8 = vadd.f32 %v1211_v15, %v538_v58  ;;  %p993_p7 = pnand %p992_p6, %p988_p2 }
  0x9a   : > { %v449_v26 = vpop.f32.mrf.mxu0  ;;  %v459_v27 = vpop.f32.mrf.mxu1 }
  0x9b   : > { %v565_v28 = vmul.f32 %v1219_v19, %v449_v26  ;;  %v569_v30 = vmul.f32 %v1219_v19, %v459_v27 }
  0x9d   : > { %v581_v35 = vadd.f32 %v565_v28, %v545_v24  ;;  %v585_v36 = vadd.f32 %v569_v30, %v549_v25  ;;  %v547_v24 = vadd.f32 %v1211_v15, %v527_v3  ;;  %v551_v25 = vadd.f32 %v1211_v15, %v531_v4 }
  0x9f   : > { %v601_v41 = vadd.f32 %v1228_v29, %v581_v35  ;;  %v605_v42 = vadd.f32 %v1228_v29, %v585_v36 }
  0xa1   : > { %v617_v47 = vmax.f32 %v601_v41, 0.0  ;;  %v621_v48 = vmax.f32 %v605_v42, 0.0  ;;  %v469_v49 = vpop.f32.mrf.mxu2  ;;  %v479_v50 = vpop.f32.mrf.mxu3 }
  0xa2   : > { %v573_v53 = vmul.f32 %v1219_v19, %v469_v49  ;;  %v577_v54 = vmul.f32 %v1219_v19, %v479_v50  ;;  %v451_v55 = vpop.f32.mrf.mxu0  ;;  %v461_v56 = vpop.f32.mrf.mxu1  ;;  %v873_v49 = vunpack.c.h.bf16 %v1264_v63  ;;  %v881_v50 = vunpack.c.h.bf16 %v1267_v0 }
  0xa3   : > { %634 = vst.msk [vmem:[%s1255_s10] sm:$0xff] %vm633_vm1, %v617_v47  ;;  %v566_v59 = vmul.f32 %v1219_v19, %v451_v55  ;;  %v570_v60 = vmul.f32 %v1219_v19, %v461_v56  ;;  %v548_v55 = vadd.f32 %v1211_v15, %v528_v39  ;;  %v552_v56 = vadd.f32 %v1211_v15, %v532_v40 }
  0xa4   : > { %638 = vst.msk [vmem:[%s1255_s10 + $0x20] sm:$0xff] %vm633_vm1, %v621_v48  ;;  %v589_v61 = vadd.f32 %v573_v53, %v553_v43  ;;  %v593_v62 = vadd.f32 %v577_v54, %v557_v44 }
  0xa5   : > { %v582_v1 = vadd.f32 %v566_v59, %v546_v45  ;;  %v586_v2 = vadd.f32 %v570_v60, %v550_v46  ;;  %v555_v45 = vadd.f32 %v1211_v15, %v535_v33  ;;  %v559_v46 = vadd.f32 %v1211_v15, %v539_v34 }
  0xa6   : > { %v609_v5 = vadd.f32 %v1228_v29, %v589_v61  ;;  %v613_v6 = vadd.f32 %v1228_v29, %v593_v62 }
  0xa7   : > { %v602_v9 = vadd.f32 %v1228_v29, %v582_v1  ;;  %v606_v10 = vadd.f32 %v1228_v29, %v586_v2  ;;  %v536_v1 = vmul.f32 %v1205_v12, %v873_v49  ;;  %v540_v2 = vmul.f32 %v1205_v12, %v881_v50 }
  0xa8   : > { %v625_v14 = vmax.f32 %v609_v5, 0.0  ;;  %v629_v16 = vmax.f32 %v613_v6, 0.0 }
  0xa9   : > { %v618_v20 = vmax.f32 %v602_v9, 0.0  ;;  %v622_v21 = vmax.f32 %v606_v10, 0.0  ;;  %v471_v22 = vpop.f32.mrf.mxu2  ;;  %v481_v23 = vpop.f32.mrf.mxu3  ;;  %v556_v10 = vadd.f32 %v1211_v15, %v536_v1  ;;  %v560_v11 = vadd.f32 %v1211_v15, %v540_v2 }
  0xaa   : > { %642 = vst.msk [vmem:[%s1255_s10 + $0x40] sm:$0xff] %vm633_vm1, %v625_v14  ;;  %v574_v26 = vmul.f32 %v1219_v19, %v471_v22  ;;  %v578_v27 = vmul.f32 %v1219_v19, %v481_v23  ;;  %v454_v28 = vpop.f32.mrf.mxu0  ;;  %v464_v30 = vpop.f32.mrf.mxu1 }
  0xab   : > { %646 = vst.msk [vmem:[%s1255_s10 + $0x60] sm:$0xff] %vm633_vm1, %v629_v16  ;;  %v567_v31 = vmul.f32 %v1219_v19, %v454_v28  ;;  %v571_v32 = vmul.f32 %v1219_v19, %v464_v30 }
  0xac   : > { %635 = vst.msk [vmem:[%s1255_s10 + $0x8] sm:$0xff] %vm633_vm1, %v618_v20  ;;  %v590_v35 = vadd.f32 %v574_v26, %v554_v7  ;;  %v594_v36 = vadd.f32 %v578_v27, %v558_v8 }
  0xad   : > { %639 = vst.msk [vmem:[%s1255_s10 + $0x28] sm:$0xff] %vm633_vm1, %v622_v21  ;;  %v583_v37 = vadd.f32 %v567_v31, %v547_v24  ;;  %v587_v38 = vadd.f32 %v571_v32, %v551_v25 }
  0xae   : > { %v610_v41 = vadd.f32 %v1228_v29, %v590_v35  ;;  %v614_v42 = vadd.f32 %v1228_v29, %v594_v36 }
  0xaf   : > { %v603_v43 = vadd.f32 %v1228_v29, %v583_v37  ;;  %v607_v44 = vadd.f32 %v1228_v29, %v587_v38 }
  0xb0   : > { %v626_v47 = vmax.f32 %v610_v41, 0.0  ;;  %v630_v48 = vmax.f32 %v614_v42, 0.0 }
  0xb1   : > { %v619_v51 = vmax.f32 %v603_v43, 0.0  ;;  %v623_v52 = vmax.f32 %v607_v44, 0.0  ;;  %v474_v53 = vpop.f32.mrf.mxu2  ;;  %v484_v54 = vpop.f32.mrf.mxu3 }
  0xb2   : > { %643 = vst.msk [vmem:[%s1255_s10 + $0x48] sm:$0xff] %vm633_vm1, %v626_v47  ;;  %v575_v57 = vmul.f32 %v1219_v19, %v474_v53  ;;  %v579_v58 = vmul.f32 %v1219_v19, %v484_v54  ;;  %v456_v59 = vpop.f32.mrf.mxu0  ;;  %v466_v60 = vpop.f32.mrf.mxu1 }
  0xb3   : > { %647 = vst.msk [vmem:[%s1255_s10 + $0x68] sm:$0xff] %vm633_vm1, %v630_v48  ;;  %v568_v61 = vmul.f32 %v1219_v19, %v456_v59  ;;  %v572_v62 = vmul.f32 %v1219_v19, %v466_v60 }
  0xb4   : > { %636 = vst.msk [vmem:[%s1255_s10 + $0x10] sm:$0xff] %vm633_vm1, %v619_v51  ;;  %v591_v63 = vadd.f32 %v575_v57, %v555_v45  ;;  %v595_v0 = vadd.f32 %v579_v58, %v559_v46 }
  0xb5   : > { %640 = vst.msk [vmem:[%s1255_s10 + $0x30] sm:$0xff] %vm633_vm1, %v623_v52  ;;  %v584_v3 = vadd.f32 %v568_v61, %v548_v55  ;;  %v588_v4 = vadd.f32 %v572_v62, %v552_v56 }
  0xb6   : > { %v611_v5 = vadd.f32 %v1228_v29, %v591_v63  ;;  %v615_v6 = vadd.f32 %v1228_v29, %v595_v0 }
  0xb7   : > { %v604_v7 = vadd.f32 %v1228_v29, %v584_v3  ;;  %v608_v8 = vadd.f32 %v1228_v29, %v588_v4 }
  0xb8   : > { %v627_v9 = vmax.f32 %v611_v5, 0.0  ;;  %v631_v12 = vmax.f32 %v615_v6, 0.0 }
  0xb9   : > { %v620_v13 = vmax.f32 %v604_v7, 0.0  ;;  %v624_v14 = vmax.f32 %v608_v8, 0.0  ;;  %v476_v16 = vpop.f32.mrf.mxu2  ;;  %v486_v17 = vpop.f32.mrf.mxu3 }
  0xba   : > { %644 = vst.msk [vmem:[%s1255_s10 + $0x50] sm:$0xff] %vm633_vm1, %v627_v9  ;;  %v576_v18 = vmul.f32 %v1219_v19, %v476_v16  ;;  %v580_v20 = vmul.f32 %v1219_v19, %v486_v17 }
  0xbb   : > { %648 = vst.msk [vmem:[%s1255_s10 + $0x70] sm:$0xff] %vm633_vm1, %v631_v12 }
  0xbc   : > { %637 = vst.msk [vmem:[%s1255_s10 + $0x18] sm:$0xff] %vm633_vm1, %v620_v13  ;;  %v592_v15 = vadd.f32 %v576_v18, %v556_v10  ;;  %v596_v21 = vadd.f32 %v580_v20, %v560_v11 }
  0xbd   : > { %641 = vst.msk [vmem:[%s1255_s10 + $0x38] sm:$0xff] %vm633_vm1, %v624_v14 }
  0xbe   : > { %v612_v22 = vadd.f32 %v1228_v29, %v592_v15  ;;  %v616_v19 = vadd.f32 %v1228_v29, %v596_v21 }
  0xc0   : > { %v628_v23 = vmax.f32 %v612_v22, 0.0  ;;  %v632_v24 = vmax.f32 %v616_v19, 0.0 }
  0xc2   : > { %645 = vst.msk [vmem:[%s1255_s10 + $0x58] sm:$0xff] %vm633_vm1, %v628_v23 }
  0xc3   : > { %649 = vst.msk [vmem:[%s1255_s10 + $0x78] sm:$0xff] %vm633_vm1, %v632_v24 }
  0xc4   : > { %996 = shalt.err (!%p993_p7)
}
  0xc5   : > { %s1065_s20 = smov 128   ;;  %s1066_s10 = smov 8  }
  0xc6   : > { %892 = dma.vmem_to_hbm [thread:$0]  (%p1158_p3), %s667_s21, 2048, %s669_s22, %s651_s9, %s1065_s20, %s1065_s20, %s1066_s10  }
  0xc7 PF: > { %p898_p9 = scmp.ge.s32.totalorder %s1063_s8, 2  ;;  %s683_s27 = sand.u32 1, %s1035_s24  }
  0xc8   : > { %s684_s28 = scalar_lea.sflag [#allocation3], %s683_s27 }
  0xc9   : > { %p895_p10 = pnand %p898_p9, %p1167_p8 }
  0xcb   : > { %p896_p11 = pneg %p895_p10 }
  0xcd   : > { %1030 = dma.done.wait (%p896_p11), %s684_s28, 2048  }
  0xce   : > { %1032 = vsyncadd (%p896_p11), %s684_s28, 4294965248  ;;  %s20_s8 = sadd.s32 1, %s1063_s8   ;;  %s1401_s24 = smov %s1039_s25 }
  0xcf   : > { %p17_p12 = scmp.ge.s32.totalorder %s20_s8, 6   ;;  %s1402_s25 = smov %s1043_s26 }
  0xd0   : > { %s1403_s26 = smov %s1176_s19  ;;  %s1404_s27 = smov %s1055_s29 }
  0xd1   : > { %s1405_s28 = smov %s1059_s30  ;;  %s1406_s29 = smov %s1409_s11 }
  0xd2   : > { %s1407_s30 = smov %s1413_s12  ;;  %19 = sbr.rel (!%p17_p12) target bundleno = 5 (0x5), region = 86 }
  0xd7   :  { %690 = vsyncpa [#allocation3], 1 }
  0xd8   :  { %692 = vsyncpa [#allocation3 + $0x1], 1 }

// kernel: normal_rm_bottleneck_forward.5
= control target key start
LH: loop header
LB: loop body
LE: loop exit
PB: predicated region body
PF: predicated region fallthrough
CT: control target
= control target key end

     0   :  { %s2200_s18 = smov 0   ;;  %s3361_s0 = inlined_call_operand.vmem [shape: bf16[2,16,16,8], index: 0, kind: input, shape index: {}]   ;;  %s3362_s1 = inlined_call_operand.vmem [shape: f32[1,8], index: 1, kind: input, shape index: {}]   ;;  %s3363_s2 = inlined_call_operand.vmem [shape: f32[1,8], index: 2, kind: input, shape index: {}]   ;;  %s3364_s3 = inlined_call_operand.vmem [shape: bf16[72,8], index: 3, kind: input, shape index: {}]   ;;  %s3365_s4 = inlined_call_operand.vmem [shape: bf16[2,16,16,8], index: 4, kind: output, shape index: {0}]   ;;  %s3366_s5 = inlined_call_operand.vmem [shape: f32[2,2,8], index: 5, kind: output, shape index: {1}]  }
   0x1 LB: > { %s1988_s19 = sadd.s32 4294967295, %s2159_s18   ;;  %p1992_p0 = scmp.ge.s32.totalorder %s2159_s18, 1  ;;  %s2159_s18 = sphi %s2200_s18, %s16_s18  }
   0x2   : > { %p190_p1 = scmp.lt.s32.totalorder %s2159_s18, 3 }
   0x4   : > { %p191_p2 = pnand %p1992_p0, %p190_p1 }
   0x5   : > { %p222_p3 = scmp.lt.s32.totalorder (!%p191_p2), %s1988_s19, 1  ;;  %s2162_s20 = smov (!%p191_p2), 8  }
   0x6   : > { %194 = sbr.rel (%p191_p2) target bundleno = 700 (0x2bc), region = 36  ;;  %s2163_s29 = smov (!%p191_p2), 16  }
   0x7   : > { %s2164_s30 = smov (!%p191_p2), 32   ;;  %s2165_s6 = smov (!%p191_p2), 56  }
   0x8   : > { %s2166_s7 = smov (!%p191_p2), 24   ;;  %s2167_s8 = smov (!%p191_p2), 40  }
   0x9   : > { %s2168_s9 = smov (!%p191_p2), 48   ;;  %s2169_s10 = smov (!%p191_p2), 64  }
   0xb   : > { %v3367_v0 = vmov 0   ;;  %s3372_s19 = smov (!%p222_p3, %s1988_s19), 1  ;;  %v2226_v2 = vld [vmem:[%s3362_s1] ss:$0 sm:$0xff]  ;;  %vm661_vm0 = vcmask 1040384   ;;  %vm948_vm4 = vcmask 1046528  }
   0xc   : > { %v2209_v1 = vrot.slane %v3367_v0, 1  ;;  %s2032_s21 = sshll.u32 %s3372_s19, 7  ;;  %v2234_v8 = vld [vmem:[%s3363_s2] ss:$0 sm:$0xff]  ;;  %vm662_vm1 = vsmask.f32 256 }
   0xd   : > { %s2221_s24 = scalar_lea.vmem %s3361_s0, %s2032_s21  ;;  %vm696_vm2 = vsmask.f32 7424  ;;  %vm2259_vm3 = vmand %vm661_vm0, %vm662_vm1  ;;  %vm1270_vm5 = vcmask 130048   ;;  %vm1237_vm6 = vcmask 64512   ;;  %vm1570_vm7 = vcmask 1043456  }
   0xe   : > { %885 = vrot.lane.b32.xlu0 %v2209_v1, %s2162_s20  ;;  %v2104_v3 = vld [vmem:[%s2221_s24 + $0x18] sm:$0xff]   ;;  %v2102_v4 = vld [vmem:[%s2221_s24 + $0x8] sm:$0xff]   ;;  %v2039_v5 = vld [vmem:[%s2221_s24] sm:$0xff]   ;;  %vm1303_vm8 = vcmask 195584   ;;  %vm1336_vm9 = vcmask 261120   ;;  %vm1369_vm10 = vcmask 326656  }
   0xf   : > { %v2052_v6 = vunpack.c.l.bf16 %v2104_v3  ;;  %v2053_v7 = vunpack.c.h.bf16 %v2104_v3  ;;  %v2044_v9 = vunpack.c.l.bf16 %v2102_v4  ;;  %v2045_v10 = vunpack.c.h.bf16 %v2102_v4  ;;  %v2105_v11 = vld [vmem:[%s2221_s24 + $0x20] sm:$0xff]   ;;  %v2103_v48 = vld [vmem:[%s2221_s24 + $0x10] sm:$0xff]   ;;  %v2106_v53 = vld [vmem:[%s2221_s24 + $0x28] sm:$0xff]  }
  0x10   : > { %v2040_v12 = vunpack.c.l.bf16 %v2039_v5  ;;  %v2041_v13 = vunpack.c.h.bf16 %v2039_v5  ;;  %v2056_v14 = vunpack.c.l.bf16 %v2105_v11  ;;  %v2057_v15 = vunpack.c.h.bf16 %v2105_v11 }
  0x11   : > { %v311_v16 = vmul.f32 %v2226_v2, %v2052_v6  ;;  %v312_v17 = vmul.f32 %v2226_v2, %v2053_v7  ;;  %v307_v18 = vmul.f32 %v2226_v2, %v2044_v9  ;;  %v308_v19 = vmul.f32 %v2226_v2, %v2045_v10 }
  0x12   : > { %v305_v20 = vmul.f32 %v2226_v2, %v2040_v12  ;;  %v306_v21 = vmul.f32 %v2226_v2, %v2041_v13  ;;  %v313_v22 = vmul.f32 %v2226_v2, %v2056_v14  ;;  %v314_v23 = vmul.f32 %v2226_v2, %v2057_v15 }
  0x13   : > { %v347_v24 = vadd.f32 %v2234_v8, %v311_v16  ;;  %v348_v25 = vadd.f32 %v2234_v8, %v312_v17  ;;  %v343_v26 = vadd.f32 %v2234_v8, %v307_v18  ;;  %v344_v27 = vadd.f32 %v2234_v8, %v308_v19 }
  0x14   : > { %v341_v28 = vadd.f32 %v2234_v8, %v305_v20  ;;  %v342_v29 = vadd.f32 %v2234_v8, %v306_v21  ;;  %v349_v30 = vadd.f32 %v2234_v8, %v313_v22  ;;  %v350_v31 = vadd.f32 %v2234_v8, %v314_v23 }
  0x15   : > { %v379_v32 = vmax.f32 %v347_v24, 0.0  ;;  %v380_v33 = vmax.f32 %v348_v25, 0.0  ;;  %v375_v34 = vmax.f32 %v343_v26, 0.0  ;;  %v376_v35 = vmax.f32 %v344_v27, 0.0 }
  0x16   : > { %v373_v36 = vmax.f32 %v341_v28, 0.0  ;;  %v374_v37 = vmax.f32 %v342_v29, 0.0  ;;  %v381_v38 = vmax.f32 %v349_v30, 0.0  ;;  %v382_v39 = vmax.f32 %v350_v31, 0.0 }
  0x17   : > { %v411_v40 = vpack.c.bf16 %v379_v32, %v379_v32  ;;  %v412_v41 = vpack.c.bf16 %v380_v33, %v380_v33  ;;  %v407_v42 = vpack.c.bf16 %v375_v34, %v375_v34  ;;  %v408_v43 = vpack.c.bf16 %v376_v35, %v376_v35 }
  0x18   : > { %v405_v44 = vpack.c.bf16 %v373_v36, %v373_v36  ;;  %v406_v45 = vpack.c.bf16 %v374_v37, %v374_v37  ;;  %v413_v46 = vpack.c.bf16 %v381_v38, %v381_v38  ;;  %v414_v47 = vpack.c.bf16 %v382_v39, %v382_v39 }
  0x19   : > { %v475_v49 = vunpack.c.l.b16 %v411_v40  ;;  %v476_v50 = vunpack.c.l.b16 %v412_v41  ;;  %v471_v51 = vunpack.c.l.b16 %v407_v42  ;;  %v472_v52 = vunpack.c.l.b16 %v408_v43 }
  0x1a   : > { %v469_v54 = vunpack.c.l.b16 %v405_v44  ;;  %v470_v55 = vunpack.c.l.b16 %v406_v45  ;;  %v477_v56 = vunpack.c.l.b16 %v413_v46  ;;  %v478_v57 = vunpack.c.l.b16 %v414_v47 }
  0x1b   : > { %v504_v58 = vpack.c.b16 %v476_v50, %v475_v49  ;;  %v502_v59 = vpack.c.b16 %v472_v52, %v471_v51  ;;  %v2048_v60 = vunpack.c.l.bf16 %v2103_v48  ;;  %v2049_v61 = vunpack.c.h.bf16 %v2103_v48 }
  0x1c   : > { %v501_v62 = vpack.c.b16 %v470_v55, %v469_v54  ;;  %v505_v63 = vpack.c.b16 %v478_v57, %v477_v56  ;;  %v2060_v3 = vunpack.c.l.bf16 %v2106_v53  ;;  %v2061_v4 = vunpack.c.h.bf16 %v2106_v53 }
  0x1d   : > { %v539_v5 = vshrl.u32 %v504_v58, 16  ;;  %v542_v6 = vshll.u32 %v504_v58, 16  ;;  %v525_v7 = vshrl.u32 %v502_v59, 16  ;;  %v528_v9 = vshll.u32 %v502_v59, 16  ;;  %v2108_v59 = vld [vmem:[%s2221_s24 + $0x38] sm:$0xff]  }
  0x1e   : > { %v518_v10 = vshrl.u32 %v501_v62, 16  ;;  %v521_v11 = vshll.u32 %v501_v62, 16  ;;  %v546_v12 = vshrl.u32 %v505_v63, 16  ;;  %v549_v13 = vshll.u32 %v505_v63, 16 }
  0x1f   : > { %v541_v14 = vrot.slane %v539_v5, 7  ;;  %v527_v15 = vrot.slane %v525_v7, 7  ;;  %v309_v16 = vmul.f32 %v2226_v2, %v2048_v60  ;;  %v310_v17 = vmul.f32 %v2226_v2, %v2049_v61  ;;  %v2107_v7 = vld [vmem:[%s2221_s24 + $0x30] sm:$0xff]  }
  0x20   : > { %v520_v19 = vrot.slane %v518_v10, 7  ;;  %v548_v20 = vrot.slane %v546_v12, 7  ;;  %v315_v21 = vmul.f32 %v2226_v2, %v2060_v3  ;;  %v316_v22 = vmul.f32 %v2226_v2, %v2061_v4 }
  0x21   : > { %v544_v23 = vor.u32 %v542_v6, %v541_v14  ;;  %v2267_v24 = vsel %vm2259_vm3, %v541_v14, 0  ;;  %v530_v25 = vor.u32 %v528_v9, %v527_v15  ;;  %v2271_v26 = vsel %vm2259_vm3, %v527_v15, 0 }
  0x22   : > { %v749_v27 = vshll.u32 %v2267_v24, 16  ;;  %v725_v28 = vshll.u32 %v2271_v26, 16  ;;  %v523_v29 = vor.u32 %v521_v11, %v520_v19  ;;  %v2277_v30 = vsel %vm2259_vm3, %v520_v19, 0 }
  0x23   : > { %v2281_v31 = vsel %vm2259_vm3, 0, %v544_v23  ;;  %v2285_v32 = vsel %vm2259_vm3, 0, %v530_v25  ;;  %v713_v33 = vshll.u32 %v2277_v30, 16  ;;  %v551_v34 = vor.u32 %v549_v13, %v548_v20 }
  0x24   : > { %v742_v35 = vshrl.u32 %v2281_v31, 16  ;;  %v744_v36 = vshll.u32 %v2281_v31, 16  ;;  %v751_v37 = vrot.slane %v749_v27, 1  ;;  %v718_v38 = vshrl.u32 %v2285_v32, 16 }
  0x25   : > { %v720_v39 = vshll.u32 %v2285_v32, 16  ;;  %v727_v40 = vrot.slane %v725_v28, 1  ;;  %v2294_v41 = vsel %vm2259_vm3, 0, %v523_v29  ;;  %v715_v42 = vrot.slane %v713_v33, 1 }
  0x26   : > { %v746_v43 = vrot.slane %v744_v36, 1  ;;  %v706_v44 = vshrl.u32 %v2294_v41, 16  ;;  %v708_v45 = vshll.u32 %v2294_v41, 16  ;;  %v2300_v46 = vsel %vm2259_vm3, 0, %v551_v34 }
  0x27   : > { %v722_v47 = vrot.slane %v720_v39, 1  ;;  %v2304_v48 = vsel %vm2259_vm3, %v548_v20, 0  ;;  %v754_v49 = vshrl.u32 %v2300_v46, 16  ;;  %v756_v50 = vshll.u32 %v2300_v46, 16 }
  0x28   : > { %v747_v51 = vor.u32 %v746_v43, %v742_v35  ;;  %v710_v52 = vrot.slane %v708_v45, 1  ;;  %v761_v53 = vshll.u32 %v2304_v48, 16  ;;  %v345_v54 = vadd.f32 %v2234_v8, %v309_v16 }
  0x29   : > { %v723_v55 = vor.u32 %v722_v47, %v718_v38  ;;  %v758_v56 = vrot.slane %v756_v50, 1  ;;  %v346_v57 = vadd.f32 %v2234_v8, %v310_v17  ;;  %v351_v58 = vadd.f32 %v2234_v8, %v315_v21  ;;  %v2109_v17 = vld [vmem:[%s2221_s24 + $0x40] sm:$0xff]  }
  0x2a   : > { %v2314_v60 = vsel %vm696_vm2, %v747_v51, %v751_v37  ;;  %v711_v61 = vor.u32 %v710_v52, %v706_v44  ;;  %v763_v62 = vrot.slane %v761_v53, 1  ;;  %v377_v63 = vmax.f32 %v345_v54, 0.0 }
  0x2b   : > { %893 = vrot.lane.b32.xlu2 %v2314_v60, %s2162_s20  ;;  %v2319_v3 = vsel %vm696_vm2, %v723_v55, %v727_v40  ;;  %v759_v4 = vor.u32 %v758_v56, %v754_v49  ;;  %v378_v5 = vmax.f32 %v346_v57, 0.0  ;;  %v352_v6 = vadd.f32 %v2234_v8, %v316_v22 }
  0x2c   : > { %889 = vrot.lane.b32.xlu1 %v2319_v3, %s2162_s20  ;;  %v2326_v9 = vsel %vm696_vm2, %v711_v61, %v715_v42  ;;  %v409_v10 = vpack.c.bf16 %v377_v63, %v377_v63  ;;  %v383_v11 = vmax.f32 %v351_v58, 0.0  ;;  %v2068_v12 = vunpack.c.l.bf16 %v2108_v59 }
  0x2d   : > { %887 = vrot.lane.b32.xlu0 %v2326_v9, %s2162_s20  ;;  %v2331_v13 = vsel %vm696_vm2, %v759_v4, %v763_v62  ;;  %v410_v14 = vpack.c.bf16 %v378_v5, %v378_v5  ;;  %v384_v15 = vmax.f32 %v352_v6, 0.0  ;;  %v2069_v16 = vunpack.c.h.bf16 %v2108_v59 }
  0x2e   : > { %v473_v19 = vunpack.c.l.b16 %v409_v10  ;;  %v415_v20 = vpack.c.bf16 %v383_v11, %v383_v11  ;;  %v319_v21 = vmul.f32 %v2226_v2, %v2068_v12  ;;  %v2064_v22 = vunpack.c.l.bf16 %v2107_v7 }
  0x2f   : > { %v474_v23 = vunpack.c.l.b16 %v410_v14  ;;  %v416_v25 = vpack.c.bf16 %v384_v15, %v384_v15  ;;  %v320_v27 = vmul.f32 %v2226_v2, %v2069_v16  ;;  %v2065_v28 = vunpack.c.h.bf16 %v2107_v7 }
  0x30   : > { %v479_v29 = vunpack.c.l.b16 %v415_v20  ;;  %v355_v33 = vadd.f32 %v2234_v8, %v319_v21  ;;  %v317_v34 = vmul.f32 %v2226_v2, %v2064_v22  ;;  %v2072_v35 = vunpack.c.l.bf16 %v2109_v17 }
  0x31   : > { %v503_v36 = vpack.c.b16 %v474_v23, %v473_v19  ;;  %v480_v37 = vunpack.c.l.b16 %v416_v25  ;;  %v356_v38 = vadd.f32 %v2234_v8, %v320_v27  ;;  %v318_v39 = vmul.f32 %v2226_v2, %v2065_v28 }
  0x32   : > { %v387_v40 = vmax.f32 %v355_v33, 0.0  ;;  %v353_v42 = vadd.f32 %v2234_v8, %v317_v34  ;;  %v2073_v43 = vunpack.c.h.bf16 %v2109_v17  ;;  %v321_v44 = vmul.f32 %v2226_v2, %v2072_v35  ;;  %v2111_v33 = vld [vmem:[%s2221_s24 + $0x50] sm:$0xff]  }
  0x33   : > { %895 = vrot.lane.b32.xlu2 %v2331_v13, %s2162_s20  ;;  %v532_v45 = vshrl.u32 %v503_v36, 16  ;;  %v535_v47 = vshll.u32 %v503_v36, 16  ;;  %v506_v49 = vpack.c.b16 %v480_v37, %v479_v29  ;;  %v388_v50 = vmax.f32 %v356_v38, 0.0 }
  0x34   : > { %v419_v51 = vpack.c.bf16 %v387_v40, %v387_v40  ;;  %v354_v52 = vadd.f32 %v2234_v8, %v318_v39  ;;  %v385_v53 = vmax.f32 %v353_v42, 0.0  ;;  %v322_v54 = vmul.f32 %v2226_v2, %v2073_v43 }
  0x35   : > { %v534_v55 = vrot.slane %v532_v45, 7  ;;  %v553_v56 = vshrl.u32 %v506_v49, 16  ;;  %v556_v57 = vshll.u32 %v506_v49, 16  ;;  %v420_v58 = vpack.c.bf16 %v388_v50, %v388_v50 }
  0x36   : > { %v483_v59 = vunpack.c.l.b16 %v419_v51  ;;  %v386_v61 = vmax.f32 %v354_v52, 0.0  ;;  %v417_v62 = vpack.c.bf16 %v385_v53, %v385_v53  ;;  %v357_v63 = vadd.f32 %v2234_v8, %v321_v44 }
  0x37   : > { %v537_v4 = vor.u32 %v535_v47, %v534_v55  ;;  %v2349_v5 = vsel %vm2259_vm3, %v534_v55, 0  ;;  %v555_v6 = vrot.slane %v553_v56, 7  ;;  %v484_v7 = vunpack.c.l.b16 %v420_v58 }
  0x38   : > { %v737_v10 = vshll.u32 %v2349_v5, 16  ;;  %v418_v11 = vpack.c.bf16 %v386_v61, %v386_v61  ;;  %v481_v12 = vunpack.c.l.b16 %v417_v62  ;;  %v358_v14 = vadd.f32 %v2234_v8, %v322_v54 }
  0x39   : > { %v2355_v15 = vsel %vm2259_vm3, 0, %v537_v4  ;;  %v558_v16 = vor.u32 %v556_v57, %v555_v6  ;;  %v2359_v17 = vsel %vm2259_vm3, %v555_v6, 0  ;;  %v508_v19 = vpack.c.b16 %v484_v7, %v483_v59  ;;  %v2110_v7 = vld [vmem:[%s2221_s24 + $0x48] sm:$0xff]  }
  0x3a   : > { %v730_v20 = vshrl.u32 %v2355_v15, 16  ;;  %v732_v21 = vshll.u32 %v2355_v15, 16  ;;  %v739_v22 = vrot.slane %v737_v10, 1  ;;  %v773_v23 = vshll.u32 %v2359_v17, 16 }
  0x3b   : > { %v2366_v25 = vsel %vm2259_vm3, 0, %v558_v16  ;;  %v567_v27 = vshrl.u32 %v508_v19, 16  ;;  %v570_v28 = vshll.u32 %v508_v19, 16  ;;  %v482_v29 = vunpack.c.l.b16 %v418_v11 }
  0x3c   : > { %v734_v34 = vrot.slane %v732_v21, 1  ;;  %v766_v35 = vshrl.u32 %v2366_v25, 16  ;;  %v768_v36 = vshll.u32 %v2366_v25, 16  ;;  %v775_v37 = vrot.slane %v773_v23, 1 }
  0x3d   : > { %v569_v38 = vrot.slane %v567_v27, 7  ;;  %v507_v39 = vpack.c.b16 %v482_v29, %v481_v12  ;;  %v389_v40 = vmax.f32 %v357_v63, 0.0  ;;  %v390_v42 = vmax.f32 %v358_v14, 0.0 }
  0x3e   : > { %v735_v43 = vor.u32 %v734_v34, %v730_v20  ;;  %v770_v44 = vrot.slane %v768_v36, 1  ;;  %v2080_v45 = vunpack.c.l.bf16 %v2111_v33  ;;  %v2081_v47 = vunpack.c.h.bf16 %v2111_v33  ;;  %v2112_v36 = vld [vmem:[%s2221_s24 + $0x58] sm:$0xff]  }
  0x3f   : > { %v572_v49 = vor.u32 %v570_v28, %v569_v38  ;;  %v2373_v50 = vsel %vm2259_vm3, %v569_v38, 0  ;;  %v560_v51 = vshrl.u32 %v507_v39, 16  ;;  %v563_v52 = vshll.u32 %v507_v39, 16 }
  0x40   : > { %v2376_v53 = vsel %vm696_vm2, %v735_v43, %v739_v22  ;;  %v771_v54 = vor.u32 %v770_v44, %v766_v35  ;;  %v797_v55 = vshll.u32 %v2373_v50, 16  ;;  %v421_v56 = vpack.c.bf16 %v389_v40, %v389_v40 }
  0x41   : > { %891 = vrot.lane.b32.xlu1 %v2376_v53, %s2162_s20  ;;  %v2383_v57 = vsel %vm2259_vm3, 0, %v572_v49  ;;  %v562_v58 = vrot.slane %v560_v51, 7  ;;  %v422_v59 = vpack.c.bf16 %v390_v42, %v390_v42  ;;  %v325_v61 = vmul.f32 %v2226_v2, %v2080_v45 }
  0x42   : > { %v2387_v62 = vsel %vm696_vm2, %v771_v54, %v775_v37  ;;  %v790_v63 = vshrl.u32 %v2383_v57, 16  ;;  %v792_v4 = vshll.u32 %v2383_v57, 16  ;;  %v799_v6 = vrot.slane %v797_v55, 1 }
  0x43   : > { %897 = vrot.lane.b32.xlu0 %v2387_v62, %s2162_s20  ;;  %v565_v10 = vor.u32 %v563_v52, %v562_v58  ;;  %v2396_v11 = vsel %vm2259_vm3, %v562_v58, 0  ;;  %v485_v12 = vunpack.c.l.b16 %v421_v56  ;;  %v486_v14 = vunpack.c.l.b16 %v422_v59 }
  0x44   : > { %v794_v16 = vrot.slane %v792_v4, 1  ;;  %v785_v19 = vshll.u32 %v2396_v11, 16  ;;  %v326_v20 = vmul.f32 %v2226_v2, %v2081_v47  ;;  %v361_v21 = vadd.f32 %v2234_v8, %v325_v61 }
  0x45   : > { %v2403_v22 = vsel %vm2259_vm3, 0, %v565_v10  ;;  %v509_v23 = vpack.c.b16 %v486_v14, %v485_v12  ;;  %v2076_v27 = vunpack.c.l.bf16 %v2110_v7  ;;  %v2077_v28 = vunpack.c.h.bf16 %v2110_v7 }
  0x46   : > { %v795_v29 = vor.u32 %v794_v16, %v790_v63  ;;  %v778_v33 = vshrl.u32 %v2403_v22, 16  ;;  %v780_v34 = vshll.u32 %v2403_v22, 16  ;;  %v787_v35 = vrot.slane %v785_v19, 1 }
  0x47   : > { %v574_v37 = vshrl.u32 %v509_v23, 16  ;;  %v577_v38 = vshll.u32 %v509_v23, 16  ;;  %v362_v39 = vadd.f32 %v2234_v8, %v326_v20  ;;  %v393_v40 = vmax.f32 %v361_v21, 0.0  ;;  %v2114_v21 = vld [vmem:[%s2221_s24 + $0x68] sm:$0xff]  }
  0x48   : > { %v2410_v42 = vsel %vm696_vm2, %v795_v29, %v799_v6  ;;  %v782_v43 = vrot.slane %v780_v34, 1  ;;  %v323_v44 = vmul.f32 %v2226_v2, %v2076_v27  ;;  %v324_v45 = vmul.f32 %v2226_v2, %v2077_v28 }
  0x49   : > { %901 = vrot.lane.b32.xlu2 %v2410_v42, %s2162_s20  ;;  %v576_v47 = vrot.slane %v574_v37, 7  ;;  %v394_v49 = vmax.f32 %v362_v39, 0.0  ;;  %v425_v51 = vpack.c.bf16 %v393_v40, %v393_v40  ;;  %v2084_v52 = vunpack.c.l.bf16 %v2112_v36 }
  0x4a   : > { %v783_v54 = vor.u32 %v782_v43, %v778_v33  ;;  %v359_v55 = vadd.f32 %v2234_v8, %v323_v44  ;;  %v360_v56 = vadd.f32 %v2234_v8, %v324_v45  ;;  %v2085_v58 = vunpack.c.h.bf16 %v2112_v36  ;;  %v2113_v43 = vld [vmem:[%s2221_s24 + $0x60] sm:$0xff]  }
  0x4b   : > { %v579_v59 = vor.u32 %v577_v38, %v576_v47  ;;  %v2420_v61 = vsel %vm2259_vm3, %v576_v47, 0  ;;  %v426_v63 = vpack.c.bf16 %v394_v49, %v394_v49  ;;  %v489_v4 = vunpack.c.l.b16 %v425_v51 }
  0x4c   : > { %v2423_v6 = vsel %vm696_vm2, %v783_v54, %v787_v35  ;;  %v809_v7 = vshll.u32 %v2420_v61, 16  ;;  %v391_v10 = vmax.f32 %v359_v55, 0.0  ;;  %v392_v12 = vmax.f32 %v360_v56, 0.0 }
  0x4d   : > { %899 = vrot.lane.b32.xlu1 %v2423_v6, %s2162_s20  ;;  %v2430_v14 = vsel %vm2259_vm3, 0, %v579_v59  ;;  %v490_v16 = vunpack.c.l.b16 %v426_v63  ;;  %v327_v19 = vmul.f32 %v2226_v2, %v2084_v52  ;;  %v328_v20 = vmul.f32 %v2226_v2, %v2085_v58 }
  0x4e   : > { %v802_v23 = vshrl.u32 %v2430_v14, 16  ;;  %v804_v27 = vshll.u32 %v2430_v14, 16  ;;  %v811_v28 = vrot.slane %v809_v7, 1  ;;  %v423_v29 = vpack.c.bf16 %v391_v10, %v391_v10 }
  0x4f   : > { %v511_v33 = vpack.c.b16 %v490_v16, %v489_v4  ;;  %v424_v34 = vpack.c.bf16 %v392_v12, %v392_v12  ;;  %v363_v35 = vadd.f32 %v2234_v8, %v327_v19  ;;  %v364_v36 = vadd.f32 %v2234_v8, %v328_v20 }
  0x50   : > { %v806_v37 = vrot.slane %v804_v27, 1  ;;  %v487_v38 = vunpack.c.l.b16 %v423_v29  ;;  %v2092_v39 = vunpack.c.l.bf16 %v2114_v21  ;;  %v2093_v40 = vunpack.c.h.bf16 %v2114_v21 }
  0x51   : > { %v588_v44 = vshrl.u32 %v511_v33, 16  ;;  %v591_v45 = vshll.u32 %v511_v33, 16  ;;  %v488_v47 = vunpack.c.l.b16 %v424_v34  ;;  %v395_v49 = vmax.f32 %v363_v35, 0.0 }
  0x52   : > { %v807_v51 = vor.u32 %v806_v37, %v802_v23  ;;  %v396_v52 = vmax.f32 %v364_v36, 0.0  ;;  %v331_v54 = vmul.f32 %v2226_v2, %v2092_v39  ;;  %v332_v55 = vmul.f32 %v2226_v2, %v2093_v40 }
  0x53   : > { %v590_v56 = vrot.slane %v588_v44, 7  ;;  %v510_v58 = vpack.c.b16 %v488_v47, %v487_v38  ;;  %v427_v59 = vpack.c.bf16 %v395_v49, %v395_v49  ;;  %v2088_v63 = vunpack.c.l.bf16 %v2113_v43 }
  0x54   : > { %v2443_v4 = vsel %vm696_vm2, %v807_v51, %v811_v28  ;;  %v428_v7 = vpack.c.bf16 %v396_v52, %v396_v52  ;;  %v367_v10 = vadd.f32 %v2234_v8, %v331_v54  ;;  %v368_v12 = vadd.f32 %v2234_v8, %v332_v55 }
  0x55   : > { %903 = vrot.lane.b32.xlu0 %v2443_v4, %s2162_s20  ;;  %v593_v16 = vor.u32 %v591_v45, %v590_v56  ;;  %v2451_v19 = vsel %vm2259_vm3, %v590_v56, 0  ;;  %v581_v20 = vshrl.u32 %v510_v58, 16  ;;  %v584_v21 = vshll.u32 %v510_v58, 16 }
  0x56   : > { %v833_v23 = vshll.u32 %v2451_v19, 16  ;;  %v491_v27 = vunpack.c.l.b16 %v427_v59  ;;  %v492_v28 = vunpack.c.l.b16 %v428_v7  ;;  %v399_v29 = vmax.f32 %v367_v10, 0.0  ;;  %v2115_v7 = vld [vmem:[%s2221_s24 + $0x70] sm:$0xff]  }
  0x57   : > { %v2456_v33 = vsel %vm2259_vm3, 0, %v593_v16  ;;  %v583_v34 = vrot.slane %v581_v20, 7  ;;  %v400_v35 = vmax.f32 %v368_v12, 0.0  ;;  %v2089_v36 = vunpack.c.h.bf16 %v2113_v43 }
  0x58   : > { %v826_v37 = vshrl.u32 %v2456_v33, 16  ;;  %v828_v38 = vshll.u32 %v2456_v33, 16  ;;  %v835_v39 = vrot.slane %v833_v23, 1  ;;  %v512_v40 = vpack.c.b16 %v492_v28, %v491_v27 }
  0x59   : > { %v586_v44 = vor.u32 %v584_v21, %v583_v34  ;;  %v2462_v45 = vsel %vm2259_vm3, %v583_v34, 0  ;;  %v431_v47 = vpack.c.bf16 %v399_v29, %v399_v29  ;;  %v432_v49 = vpack.c.bf16 %v400_v35, %v400_v35 }
  0x5a   : > { %v830_v51 = vrot.slane %v828_v38, 1  ;;  %v821_v52 = vshll.u32 %v2462_v45, 16  ;;  %v595_v54 = vshrl.u32 %v512_v40, 16  ;;  %v598_v55 = vshll.u32 %v512_v40, 16 }
  0x5b   : > { %v2467_v43 = vsel %vm2259_vm3, 0, %v586_v44  ;;  %v495_v56 = vunpack.c.l.b16 %v431_v47  ;;  %v496_v58 = vunpack.c.l.b16 %v432_v49  ;;  %v329_v59 = vmul.f32 %v2226_v2, %v2088_v63 }
  0x5c   : > { %v831_v10 = vor.u32 %v830_v51, %v826_v37  ;;  %v814_v12 = vshrl.u32 %v2467_v43, 16  ;;  %v816_v16 = vshll.u32 %v2467_v43, 16  ;;  %v823_v20 = vrot.slane %v821_v52, 1 }
  0x5d   : > { %v597_v21 = vrot.slane %v595_v54, 7  ;;  %v514_v23 = vpack.c.b16 %v496_v58, %v495_v56  ;;  %v330_v27 = vmul.f32 %v2226_v2, %v2089_v36  ;;  %v365_v28 = vadd.f32 %v2234_v8, %v329_v59 }
  0x5e   : > { %v2476_v29 = vsel %vm696_vm2, %v831_v10, %v835_v39  ;;  %v818_v34 = vrot.slane %v816_v16, 1  ;;  %v2096_v35 = vunpack.c.l.bf16 %v2115_v7  ;;  %v2097_v38 = vunpack.c.h.bf16 %v2115_v7 }
  0x5f   : > { %907 = vrot.lane.b32.xlu2 %v2476_v29, %s2162_s20  ;;  %v600_v63 = vor.u32 %v598_v55, %v597_v21  ;;  %v2482_v37 = vsel %vm2259_vm3, %v597_v21, 0  ;;  %v609_v40 = vshrl.u32 %v514_v23, 16  ;;  %v612_v44 = vshll.u32 %v514_v23, 16 }
  0x60   : > { %v819_v47 = vor.u32 %v818_v34, %v814_v12  ;;  %v845_v36 = vshll.u32 %v2482_v37, 16  ;;  %v366_v49 = vadd.f32 %v2234_v8, %v330_v27  ;;  %v397_v39 = vmax.f32 %v365_v28, 0.0 }
  0x61   : > { %v2488_v51 = vsel %vm2259_vm3, 0, %v600_v63  ;;  %v611_v52 = vrot.slane %v609_v40, 7  ;;  %v333_v54 = vmul.f32 %v2226_v2, %v2096_v35  ;;  %v334_v55 = vmul.f32 %v2226_v2, %v2097_v38 }
  0x62   : > { %v2493_v56 = vsel %vm696_vm2, %v819_v47, %v823_v20  ;;  %v838_v58 = vshrl.u32 %v2488_v51, 16  ;;  %v840_v59 = vshll.u32 %v2488_v51, 16  ;;  %v847_v7 = vrot.slane %v845_v36, 1 }
  0x63   : > { %905 = vrot.lane.b32.xlu1 %v2493_v56, %s2162_s20  ;;  %v614_v10 = vor.u32 %v612_v44, %v611_v52  ;;  %v2501_v12 = vsel %vm2259_vm3, %v611_v52, 0  ;;  %v398_v16 = vmax.f32 %v366_v49, 0.0  ;;  %v429_v21 = vpack.c.bf16 %v397_v39, %v397_v39 }
  0x64   : > { %v842_v23 = vrot.slane %v840_v59, 1  ;;  %v869_v2 = vshll.u32 %v2501_v12, 16  ;;  %v369_v20 = vadd.f32 %v2234_v8, %v333_v54  ;;  %v370_v27 = vadd.f32 %v2234_v8, %v334_v55 }
  0x65   : > { %v2508_v28 = vsel %vm2259_vm3, 0, %v614_v10  ;;  %v430_v34 = vpack.c.bf16 %v398_v16, %v398_v16  ;;  %v493_v35 = vunpack.c.l.b16 %v429_v21  ;;  %vm1402_vm11 = vcmask 392192  }
  0x66   : > { %v843_v38 = vor.u32 %v842_v23, %v838_v58  ;;  %v862_v63 = vshrl.u32 %v2508_v28, 16  ;;  %v864_v40 = vshll.u32 %v2508_v28, 16  ;;  %v401_v47 = vmax.f32 %v369_v20, 0.0 }
  0x67   : > { %v494_v44 = vunpack.c.l.b16 %v430_v34  ;;  %v402_v36 = vmax.f32 %v370_v27, 0.0  ;;  %v871_v52 = vrot.slane %v869_v2, 1  ;;  %v951_v2 = vrot.slane %v2294_v41, 1 }
  0x68   : > { %v2513_v49 = vsel %vm696_vm2, %v843_v38, %v847_v7  ;;  %v866_v39 = vrot.slane %v864_v40, 1  ;;  %v433_v54 = vpack.c.bf16 %v401_v47, %v401_v47  ;;  %v952_v27 = vrot.slane %v2277_v30, 1 }
  0x69   : > { %909 = vrot.lane.b32.xlu0 %v2513_v49, %s2162_s20  ;;  %v513_v8 = vpack.c.b16 %v494_v44, %v493_v35  ;;  %v434_v55 = vpack.c.bf16 %v402_v36, %v402_v36  ;;  %vm1435_vm12 = vcmask 457728   ;;  %vm1468_vm13 = vcmask 523264  }
  0x6a   : > { %v867_v59 = vor.u32 %v866_v39, %v862_v63  ;;  %v497_v16 = vunpack.c.l.b16 %v433_v54  ;;  %v2536_v30 = vsel %vm948_vm4, %v951_v2, %v952_v27  ;;  %vm1537_vm14 = vcmask 588800  }
  0x6b   : > { %v602_v58 = vshrl.u32 %v513_v8, 16  ;;  %v605_v10 = vshll.u32 %v513_v8, 16  ;;  %v498_v21 = vunpack.c.l.b16 %v434_v55  ;;  %vm1869_vm15 = vcmask 60416  }
  0x6c   : > { %v2518_v23 = vsel %vm696_vm2, %v867_v59, %v871_v52  ;;  %vm1835_vm1 = vcmask 58368  }
  0x6d   : > { %913 = vrot.lane.b32.xlu2 %v2518_v23, %s2162_s20  ;;  %v604_v7 = vrot.slane %v602_v58, 7  ;;  %v515_v20 = vpack.c.b16 %v498_v21, %v497_v16 }
  0x6f   : > { %v607_v34 = vor.u32 %v605_v10, %v604_v7  ;;  %v2526_v35 = vsel %vm2259_vm3, %v604_v7, 0  ;;  %v616_v38 = vshrl.u32 %v515_v20, 16  ;;  %v619_v63 = vshll.u32 %v515_v20, 16 }
  0x70   : > { %v857_v40 = vshll.u32 %v2526_v35, 16  ;;  %v960_v10 = vrot.slane %v2281_v31, 1  ;;  %v961_v20 = vrot.slane %v2267_v24, 1  ;;  %v954_v24 = vrot.slane %v2285_v32, 1 }
  0x71   : > { %v2531_v44 = vsel %vm2259_vm3, 0, %v607_v34  ;;  %v618_v47 = vrot.slane %v616_v38, 7 }
  0x72   : > { %v850_v36 = vshrl.u32 %v2531_v44, 16  ;;  %v852_v39 = vshll.u32 %v2531_v44, 16  ;;  %v859_v55 = vrot.slane %v857_v40, 1 }
  0x73   : > { %v621_v52 = vor.u32 %v619_v63, %v618_v47  ;;  %v2540_v8 = vsel %vm2259_vm3, %v618_v47, 0  ;;  %v2559_v63 = vsel %vm948_vm4, %v960_v10, %v961_v20  ;;  %v955_v47 = vrot.slane %v2271_v26, 1 }
  0x74   : > { %v854_v54 = vrot.slane %v852_v39, 1  ;;  %v881_v59 = vshll.u32 %v2540_v8, 16  ;;  %v970_v39 = vrot.slane %v2396_v11, 1  ;;  %v963_v11 = vrot.slane %v2300_v46, 1 }
  0x75   : > { %v2545_v58 = vsel %vm2259_vm3, 0, %v621_v52  ;;  %998 = vrot.lane.b32.xlu2 %v2536_v30, %s2163_s29  ;;  %v957_v52 = vrot.slane %v2355_v15, 1  ;;  %v964_v10 = vrot.slane %v2304_v48, 1 }
  0x76   : > { %v855_v16 = vor.u32 %v854_v54, %v850_v36  ;;  %v874_v21 = vshrl.u32 %v2545_v58, 16  ;;  %v876_v7 = vshll.u32 %v2545_v58, 16  ;;  %v883_v34 = vrot.slane %v881_v59, 1 }
  0x77   : > { %v969_v36 = vrot.slane %v2403_v22, 1  ;;  %v958_v54 = vrot.slane %v2349_v5, 1  ;;  %v979_v5 = vrot.slane %v2462_v45, 1  ;;  %v2595_v20 = vsel %vm948_vm4, %v963_v11, %v964_v10 }
  0x78   : > { %v2554_v2 = vsel %vm696_vm2, %v855_v16, %v859_v55  ;;  %v878_v27 = vrot.slane %v876_v7, 1  ;;  %v956_v55 = vsel %vm948_vm4, %v954_v24, %v955_v47  ;;  %v978_v16 = vrot.slane %v2467_v43, 1 }
  0x79   : > { %911 = vrot.lane.b32.xlu1 %v2554_v2, %s2162_s20  ;;  %v2578_v59 = vsel %vm948_vm4, %v969_v36, %v970_v39  ;;  %v2582_v26 = vsel %vm948_vm4, %v957_v52, %v958_v54  ;;  %v967_v7 = vrot.slane %v2359_v17, 1  ;;  %v972_v45 = vrot.slane %v2383_v57, 1 }
  0x7a   : > { %v879_v38 = vor.u32 %v878_v27, %v874_v21  ;;  %v966_v21 = vrot.slane %v2366_v25, 1  ;;  %v2598_v27 = vsel %vm948_vm4, %v978_v16, %v979_v5  ;;  %v987_v17 = vrot.slane %v2531_v44, 1 }
  0x7b   : > { %v975_v47 = vrot.slane %v2430_v14, 1  ;;  %v976_v36 = vrot.slane %v2420_v61, 1  ;;  %v982_v52 = vrot.slane %v2451_v19, 1  ;;  %v984_v54 = vrot.slane %v2488_v51, 1 }
  0x7c   : > { %v2562_v40 = vsel %vm696_vm2, %v879_v38, %v883_v34  ;;  %v2603_v48 = vsel %vm948_vm4, %v966_v21, %v967_v7  ;;  %v973_v34 = vrot.slane %v2373_v50, 1  ;;  %v988_v38 = vrot.slane %v2526_v35, 1 }
  0x7d   : > { %915 = vrot.lane.b32.xlu0 %v2562_v40, %s2162_s20  ;;  %1004 = vrot.lane.b32.xlu2 %v2559_v63, %s2163_s29  ;;  %v2626_v50 = vsel %vm948_vm4, %v975_v47, %v976_v36  ;;  %v981_v35 = vrot.slane %v2456_v33, 1  ;;  %v985_v11 = vrot.slane %v2482_v37, 1  ;;  %v990_v19 = vrot.slane %v2508_v28, 1 }
  0x7e   : > { %v2614_v24 = vsel %vm948_vm4, %v972_v45, %v973_v34  ;;  %v2619_v39 = vsel %vm948_vm4, %v987_v17, %v988_v38  ;;  %v991_v16 = vrot.slane %v2501_v12, 1 }
  0x7f   : > { %v2633_v61 = vsel %vm948_vm4, %v981_v35, %v982_v52  ;;  %v2642_v10 = vsel %vm948_vm4, %v984_v54, %v985_v11 }
  0x80   : > { %v2649_v37 = vsel %vm948_vm4, %v990_v19, %v991_v16 }
  0x81   : > { %996 = vrot.lane.b32.xlu1 %v2209_v1, %s2163_s29 }
  0x85   : > { %1000 = vrot.lane.b32.xlu0 %v956_v55, %s2163_s29  ;;  %1010 = vrot.lane.b32.xlu2 %v2578_v59, %s2163_s29  ;;  %v894_v5 = vpop.permute.xlu2 %893 }
  0x86   : > { %v1247_v36 = vsel %vm1237_vm6, %v2281_v31, %v894_v5 }
  0x89   : > { %1002 = vrot.lane.b32.xlu1 %v2582_v26, %s2163_s29 }
  0x8d   : > { %1006 = vrot.lane.b32.xlu0 %v2595_v20, %s2163_s29  ;;  %1016 = vrot.lane.b32.xlu2 %v2598_v27, %s2163_s29 }
  0x91   : > { %1008 = vrot.lane.b32.xlu1 %v2603_v48, %s2163_s29 }
  0x95   : > { %1012 = vrot.lane.b32.xlu0 %v2614_v24, %s2163_s29  ;;  %1022 = vrot.lane.b32.xlu2 %v2619_v39, %s2163_s29 }
  0x99   : > { %1014 = vrot.lane.b32.xlu1 %v2626_v50, %s2163_s29 }
  0x9d   : > { %1018 = vrot.lane.b32.xlu0 %v2633_v61, %s2163_s29  ;;  %1073 = vrot.lane.b32.xlu2 %v2326_v9, %s2164_s30  ;;  %v2657_v9 = vpop.permute.xlu2 %895 }
  0x9e   : > { %v890_v7 = vpop.permute.xlu1 %889 }
  0xa1   : > { %1020 = vrot.lane.b32.xlu1 %v2642_v10, %s2163_s29 }
  0xa5   : > { %1024 = vrot.lane.b32.xlu0 %v2649_v37, %s2163_s29  ;;  %1173 = vrot.lane.b32.xlu2 %v2319_v3, %s2165_s6  ;;  %v2665_v12 = vpop.permute.xlu2 %901 }
  0xa9   : > { %1029 = vrot.lane.b32.xlu1 %v2294_v41, %s2166_s7 }
  0xad   : > { %1109 = vrot.lane.b32.xlu0 %v2536_v30, %s2167_s8  ;;  %1037 = vrot.lane.b32.xlu2 %v2300_v46, %s2166_s7  ;;  %v2673_v30 = vpop.permute.xlu0 %885 }
  0xb1   : > { %1141 = vrot.lane.b32.xlu1 %v2285_v32, %s2168_s9 }
  0xb5   : > { %1205 = vrot.lane.b32.xlu0 %v956_v55, %s2169_s10  ;;  %1111 = vrot.lane.b32.xlu2 %v956_v55, %s2167_s8  ;;  %v888_v55 = vpop.permute.xlu0 %887 }
  0xb6   : > { %v1241_v34 = vsel %vm1237_vm6, %v2294_v41, %v888_v55 }
  0xb9   : > { %1031 = vrot.lane.b32.xlu1 %v2285_v32, %s2166_s7  ;;  %v2677_v21 = vpop.permute.xlu2 %907 }
  0xbd   : > { %1075 = vrot.lane.b32.xlu0 %v2319_v3, %s2164_s30  ;;  %1149 = vrot.lane.b32.xlu2 %v2366_v25, %s2168_s9  ;;  %v892_v3 = vpop.permute.xlu1 %891  ;;  %v2700_v47 = vpop.permute.xlu0 %897 }
  0xc1   : > { %1081 = vrot.lane.b32.xlu1 %v2331_v13, %s2164_s30 }
  0xc5   : > { %1117 = vrot.lane.b32.xlu0 %v2595_v20, %s2167_s8  ;;  %1207 = vrot.lane.b32.xlu2 %v2582_v26, %s2169_s10  ;;  %v900_v35 = vpop.permute.xlu1 %899 }
  0xc6   : > { %v1253_v11 = vsel %vm1237_vm6, %v2403_v22, %v900_v35 }
  0xc7   : > { %v2685_v45 = vpop.permute.xlu2 %913  ;;  %v2713_v54 = vpop.permute.xlu0 %903 }
  0xc9   : > { %1143 = vrot.lane.b32.xlu1 %v2355_v15, %s2168_s9 }
  0xcd   : > { %1175 = vrot.lane.b32.xlu0 %v2376_v53, %s2165_s6  ;;  %1089 = vrot.lane.b32.xlu2 %v2443_v4, %s2164_s30 }
  0xcf   : > { %v999_v17 = vpop.permute.xlu2 %998 }
  0xd0   : > { %v2696_v38 = vsel %vm1270_vm5, %v1241_v34, %v999_v17 }
  0xd1   : > { %1181 = vrot.lane.b32.xlu1 %v2387_v62, %s2165_s6 }
  0xd5   : > { %1213 = vrot.lane.b32.xlu0 %v2603_v48, %s2169_s10  ;;  %1189 = vrot.lane.b32.xlu2 %v2493_v56, %s2165_s6  ;;  %v906_v5 = vpop.permute.xlu1 %905 }
  0xd6   : > { %v1259_v34 = vsel %vm1237_vm6, %v2467_v43, %v906_v5  ;;  %v1509_v5 = vld [vmem:[%s3364_s3 + $0x20] sm:$0xf] }
  0xd7   : > { %v1005_v41 = vpop.permute.xlu2 %1004 }
  0xd8   : > { %v2709_v52 = vsel %vm1270_vm5, %v1247_v36, %v1005_v41 }
  0xd9   : > { %1045 = vrot.lane.b32.xlu1 %v2430_v14, %s2166_s7 }
  0xdb   : > { %v2728_v55 = vpop.permute.xlu0 %909 }
  0xdd   : > { %1125 = vrot.lane.b32.xlu0 %v2626_v50, %s2167_s8  ;;  %1039 = vrot.lane.b32.xlu2 %v2366_v25, %s2166_s7 }
  0xdf   : > { %v1011_v19 = vpop.permute.xlu2 %1010 }
  0xe0   : > { %v2722_v16 = vsel %vm1270_vm5, %v1253_v11, %v1011_v19 }
  0xe1   : > { %1157 = vrot.lane.b32.xlu1 %v2467_v43, %s2168_s9 }
  0xe5   : > { %1221 = vrot.lane.b32.xlu0 %v2598_v27, %s2169_s10  ;;  %1113 = vrot.lane.b32.xlu2 %v2582_v26, %s2167_s8 }
  0xe7   : > { %v1017_v17 = vpop.permute.xlu2 %1016 }
  0xe8   : > { %v2735_v36 = vsel %vm1270_vm5, %v1259_v34, %v1017_v17  ;;  %v1527_v34 = vunpack.c.l.b16 %v1509_v5 }
  0xe9   : > { %1033 = vrot.lane.b32.xlu1 %v2355_v15, %s2166_s7 }
  0xea   : > { %v1532_v17 = vpack.c.b16 %v1527_v34, %v1527_v34  ;;  %v2036_v34 = vld [vmem:[%s3364_s3 + $0x10] sm:$0xff] }
  0xeb   : > { %v912_v35 = vpop.permute.xlu1 %911 }
  0xec   : > { %v1265_v26 = vsel %vm1237_vm6, %v2531_v44, %v912_v35  ;;  %v1243_v35 = vsel %vm1237_vm6, %v2285_v32, %v890_v7  ;;  %v1245_v32 = vsel %vm1237_vm6, %v2355_v15, %v892_v3  ;;  %v1249_v15 = vsel %vm1237_vm6, %v2300_v46, %v2657_v9 }
  0xed   : > { %1077 = vrot.lane.b32.xlu0 %v2376_v53, %s2164_s30  ;;  %1151 = vrot.lane.b32.xlu2 %v2403_v22, %s2168_s9  ;;  %v1251_v9 = vsel %vm1237_vm6, %v2366_v25, %v2700_v47  ;;  %v1255_v25 = vsel %vm1237_vm6, %v2383_v57, %v2665_v12 }
  0xef   : > { %v2745_v41 = vpop.permute.xlu0 %915  ;;  %v1023_v11 = vpop.permute.xlu2 %1022 }
  0xf0   : > { %v2748_v19 = vsel %vm1270_vm5, %v1265_v26, %v1023_v11  ;;  %v1572_v11 = vsel %vm1570_vm7, %v1532_v17, 0 }
  0xf1   : > { %1083 = vrot.lane.b32.xlu1 %v2387_v62, %s2164_s30  ;;  %1577 = vmatpush.bf16.msra.mxu0 %v1572_v11 }
  0xf2   : > { %2117 = vmatpush.bf16.msra.mxu1 %v1572_v11  ;;  %2118 = vmatpush.bf16.msra.mxu2 %v1572_v11 }
  0xf3   : > { %v2755_v53 = vpop.permute.xlu1 %996  ;;  %2119 = vmatpush.bf16.msra.mxu3 %v1572_v11 }
  0xf5   : > { %1119 = vrot.lane.b32.xlu0 %v2603_v48, %s2167_s8  ;;  %1209 = vrot.lane.b32.xlu2 %v2559_v63, %s2169_s10  ;;  %v2037_v48 = vld [vmem:[%s3364_s3 + $0x18] sm:$0xff] }
  0xf6   : > { %1578 = vmatpush.bf16.msra.mxu0 %v2037_v48  ;;  %2120 = vmatpush.bf16.msra.mxu1 %v2037_v48 }
  0xf7   : > { %v1001_v26 = vpop.permute.xlu0 %1000  ;;  %v2763_v62 = vpop.permute.xlu2 %1073  ;;  %2121 = vmatpush.bf16.msra.mxu2 %v2037_v48  ;;  %2122 = vmatpush.bf16.msra.mxu3 %v2037_v48 }
  0xf8   : > { %v2766_v0 = vsel %vm1270_vm5, %v1243_v35, %v1001_v26  ;;  %v2035_v26 = vld [vmem:[%s3364_s3 + $0x8] sm:$0xff] }
  0xf9   : > { %1145 = vrot.lane.b32.xlu1 %v2281_v31, %s2168_s9 }
  0xfa   : > { %1579 = vmatpush.bf16.msra.mxu0 %v2036_v34  ;;  %2123 = vmatpush.bf16.msra.mxu1 %v2036_v34 }
  0xfb   : > { %v1003_v7 = vpop.permute.xlu1 %1002  ;;  %2124 = vmatpush.bf16.msra.mxu2 %v2036_v34  ;;  %2125 = vmatpush.bf16.msra.mxu3 %v2036_v34 }
  0xfc   : > { %v2776_v5 = vsel %vm1270_vm5, %v1245_v32, %v1003_v7  ;;  %v2034_v32 = vld [vmem:[%s3364_s3] sm:$0xff] }
  0xfd   : > { %1177 = vrot.lane.b32.xlu0 %v2314_v60, %s2165_s6  ;;  %1053 = vrot.lane.b32.xlu2 %v2531_v44, %s2166_s7 }
  0xfe   : > { %1580 = vmatpush.bf16.msra.mxu0 %v2035_v26  ;;  %2126 = vmatpush.bf16.msra.mxu1 %v2035_v26 }
  0xff   : > { %v1007_v3 = vpop.permute.xlu0 %1006  ;;  %v2788_v17 = vpop.permute.xlu2 %1173  ;;  %2127 = vmatpush.bf16.msra.mxu2 %v2035_v26  ;;  %2128 = vmatpush.bf16.msra.mxu3 %v2035_v26 }
 0x100   : > { %v2791_v35 = vsel %vm1270_vm5, %v1249_v15, %v1007_v3 }
 0x101   : > { %1183 = vrot.lane.b32.xlu1 %v2423_v6, %s2165_s6 }
 0x102   : > { %1581 = vmatpush.bf16.msra.mxu0 %v2034_v32  ;;  %2129 = vmatpush.bf16.msra.mxu1 %v2034_v32 }
 0x103   : > { %v1009_v11 = vpop.permute.xlu1 %1008  ;;  %2130 = vmatpush.bf16.msra.mxu2 %v2034_v32  ;;  %2131 = vmatpush.bf16.msra.mxu3 %v2034_v32 }
 0x104   : > { %v2802_v48 = vsel %vm1270_vm5, %v1251_v9, %v1009_v11 }
 0x105   : > { %1215 = vrot.lane.b32.xlu0 %v2578_v59, %s2169_s10  ;;  %1127 = vrot.lane.b32.xlu2 %v2598_v27, %s2167_s8  ;;  %v1257_v27 = vsel %vm1237_vm6, %v2430_v14, %v2713_v54  ;;  %v1263_v54 = vsel %vm1237_vm6, %v2488_v51, %v2728_v55  ;;  %v1239_v55 = vsel %vm1237_vm6, 0, %v2673_v30 }
 0x107   : > { %v1013_v47 = vpop.permute.xlu0 %1012  ;;  %v2814_v7 = vpop.permute.xlu2 %1037 }
 0x108   : > { %v2817_v34 = vsel %vm1270_vm5, %v1255_v25, %v1013_v47 }
 0x109   : > { %1047 = vrot.lane.b32.xlu1 %v2467_v43, %s2166_s7  ;;  %v1261_v43 = vsel %vm1237_vm6, %v2456_v33, %v2677_v21  ;;  %v1267_v21 = vsel %vm1237_vm6, %v2508_v28, %v2685_v45 }
 0x10b   : > { %v1015_v15 = vpop.permute.xlu1 %1014 }
 0x10c   : > { %v2825_v12 = vsel %vm1270_vm5, %v1257_v27, %v1015_v15  ;;  %v1272_v15 = vsel %vm1270_vm5, %v1239_v55, %v2755_v53 }
 0x10d   : > { %1091 = vrot.lane.b32.xlu0 %v2493_v56, %s2164_s30  ;;  %1165 = vrot.lane.b32.xlu2 %v2508_v28, %s2168_s9 }
 0x10f   : > { %v1019_v3 = vpop.permute.xlu0 %1018  ;;  %v1112_v26 = vpop.permute.xlu2 %1111 }
 0x110   : > { %v2835_v9 = vsel %vm1270_vm5, %v1261_v43, %v1019_v3 }
 0x111   : > { %1097 = vrot.lane.b32.xlu1 %v2554_v2, %s2164_s30 }
 0x113   : > { %v1021_v56 = vpop.permute.xlu1 %1020 }
 0x114   : > { %v2843_v11 = vsel %vm1270_vm5, %v1263_v54, %v1021_v56 }
 0x115   : > { %1133 = vrot.lane.b32.xlu0 %v2619_v39, %s2167_s8  ;;  %1223 = vrot.lane.b32.xlu2 %v2633_v61, %s2169_s10 }
 0x117   : > { %v1025_v32 = vpop.permute.xlu0 %1024  ;;  %v1150_v25 = vpop.permute.xlu2 %1149 }
 0x118   : > { %v2853_v47 = vsel %vm1270_vm5, %v1267_v21, %v1025_v32 }
 0x119   : > { %1159 = vrot.lane.b32.xlu1 %v2456_v33, %s2168_s9 }
 0x11b   : > { %v1030_v27 = vpop.permute.xlu1 %1029 }
 0x11c   : > { %v1305_v45 = vsel %vm1303_vm8, %v1272_v15, %v1030_v27 }
 0x11d   : > { %1191 = vrot.lane.b32.xlu0 %v2476_v29, %s2165_s6  ;;  %1041 = vrot.lane.b32.xlu2 %v2403_v22, %s2166_s7  ;;  %v1338_v54 = vsel %vm1336_vm9, %v1305_v45, %v2763_v62 }
 0x11f   : > { %v1110_v43 = vpop.permute.xlu0 %1109  ;;  %v1208_v3 = vpop.permute.xlu2 %1207 }
 0x120   : > { %v1371_v30 = vsel %vm1369_vm10, %v1338_v54, %v1110_v43 }
 0x121   : > { %1197 = vrot.lane.b32.xlu1 %v2518_v23, %s2165_s6 }
 0x123   : > { %v1142_v53 = vpop.permute.xlu1 %1141 }
 0x124   : > { %v1404_v56 = vsel %vm1402_vm11, %v1371_v30, %v1142_v53 }
 0x125   : > { %1229 = vrot.lane.b32.xlu0 %v2649_v37, %s2169_s10  ;;  %v1437_v22 = vsel %vm1435_vm12, %v1404_v56, %v2788_v17  ;;  %1115 = vrot.lane.b32.xlu2 %v2559_v63, %s2167_s8 }
 0x127   : > { %v1206_v62 = vpop.permute.xlu0 %1205  ;;  %v1090_v21 = vpop.permute.xlu2 %1089 }
 0x128   : > { %v1470_v32 = vsel %vm1468_vm13, %v1437_v22, %v1206_v62 }
 0x129   : > { %2014 = vmatmul.msk.bf16.vlgmr.msra.gmra.mxu0 %vm1537_vm14, %v1470_v32  ;;  %1035 = vrot.lane.b32.xlu1 %v2281_v31, %s2166_s7 }
 0x12b   : > { %v1032_v55 = vpop.permute.xlu1 %1031 }
 0x12c   : > { %v1307_v31 = vsel %vm1303_vm8, %v2696_v38, %v1032_v55 }
 0x12d   : > { %1079 = vrot.lane.b32.xlu0 %v2314_v60, %s2164_s30  ;;  %1153 = vrot.lane.b32.xlu2 %v2383_v57, %s2168_s9 }
 0x12f   : > { %v1076_v17 = vpop.permute.xlu0 %1075  ;;  %v1190_v27 = vpop.permute.xlu2 %1189 }
 0x130   : > { %v1340_v45 = vsel %vm1336_vm9, %v1307_v31, %v1076_v17  ;;  %v2116_v31 = vld [vmem:[%s2221_s24 + $0x78] sm:$0xff]  }
 0x131   : > { %1085 = vrot.lane.b32.xlu1 %v2423_v6, %s2164_s30  ;;  %v1373_v6 = vsel %vm1369_vm10, %v1340_v45, %v1112_v26 }
 0x133   : > { %v1082_v63 = vpop.permute.xlu1 %1081 }
 0x135   : > { %1121 = vrot.lane.b32.xlu0 %v2578_v59, %s2167_s8  ;;  %1211 = vrot.lane.b32.xlu2 %v2595_v20, %s2169_s10  ;;  %v1313_v59 = vsel %vm1303_vm8, %v2709_v52, %v2814_v7 }
 0x136   : > { %v1346_v38 = vsel %vm1336_vm9, %v1313_v59, %v1082_v63 }
 0x137   : > { %v1118_v15 = vpop.permute.xlu0 %1117  ;;  %v2894_v60 = vpop.permute.xlu2 %1039 }
 0x138   : > { %v1379_v26 = vsel %vm1369_vm10, %v1346_v38, %v1118_v15  ;;  %v2101_v15 = vunpack.c.h.bf16 %v2116_v31  ;;  %v993_v38 = vrot.slane %v2545_v58, 1 }
 0x139   : > { %1147 = vrot.lane.b32.xlu1 %v2300_v46, %s2168_s9  ;;  %v1412_v52 = vsel %vm1402_vm11, %v1379_v26, %v1150_v25 }
 0x13b   : > { %v1144_v43 = vpop.permute.xlu1 %1143 }
 0x13c   : > { %v1406_v20 = vsel %vm1402_vm11, %v1373_v6, %v1144_v43  ;;  %v2152_v6 = vld [vmem:[%s3363_s2] ss:$0 sm:$0xff] }
 0x13d   : > { %1179 = vrot.lane.b32.xlu0 %v2331_v13, %s2165_s6  ;;  %1055 = vrot.lane.b32.xlu2 %v2508_v28, %s2166_s7 }
 0x13f   : > { %v1176_v54 = vpop.permute.xlu0 %1175  ;;  %v2909_v30 = vpop.permute.xlu2 %1113 }
 0x140   : > { %v1439_v46 = vsel %vm1435_vm12, %v1406_v20, %v1176_v54  ;;  %v994_v54 = vrot.slane %v2540_v8, 1 }
 0x141   : > { %v1472_v53 = vsel %vm1468_vm13, %v1439_v46, %v1208_v3  ;;  %1185 = vrot.lane.b32.xlu1 %v2410_v42, %s2165_s6 }
 0x142   : > { %2015 = vmatmul.msk.bf16.gmra.mxu0 %vm1537_vm14, %v1472_v53 }
 0x143   : > { %v1182_v13 = vpop.permute.xlu1 %1181 }
 0x144   : > { %v1445_v28 = vsel %vm1435_vm12, %v1412_v52, %v1182_v13 }
 0x145   : > { %1217 = vrot.lane.b32.xlu0 %v2614_v24, %s2169_s10  ;;  %1129 = vrot.lane.b32.xlu2 %v2633_v61, %s2167_s8 }
 0x147   : > { %v1214_v7 = vpop.permute.xlu0 %1213  ;;  %v2923_v56 = vpop.permute.xlu2 %1151 }
 0x148   : > { %v1478_v3 = vsel %vm1468_vm13, %v1445_v28, %v1214_v7 }
 0x149   : > { %2018 = vmatmul.msk.bf16.vlgmr.msra.gmra.mxu1 %vm1537_vm14, %v1478_v3  ;;  %1049 = vrot.lane.b32.xlu1 %v2456_v33, %s2166_s7 }
 0x14b   : > { %v1046_v22 = vpop.permute.xlu1 %1045 }
 0x14c   : > { %v1321_v25 = vsel %vm1303_vm8, %v2817_v34, %v1046_v22 }
 0x14d   : > { %1093 = vrot.lane.b32.xlu0 %v2476_v29, %s2164_s30  ;;  %1167 = vrot.lane.b32.xlu2 %v2545_v58, %s2168_s9  ;;  %v1354_v32 = vsel %vm1336_vm9, %v1321_v25, %v1090_v21 }
 0x14f   : > { %v1126_v61 = vpop.permute.xlu0 %1125  ;;  %v1210_v62 = vpop.permute.xlu2 %1209 }
 0x150   : > { %v1387_v33 = vsel %vm1369_vm10, %v1354_v32, %v1126_v61 }
 0x151   : > { %1099 = vrot.lane.b32.xlu1 %v2518_v23, %s2164_s30  ;;  %v2100_v23 = vunpack.c.l.bf16 %v2116_v31 }
 0x153   : > { %v1158_v55 = vpop.permute.xlu1 %1157 }
 0x154   : > { %v1420_v17 = vsel %vm1402_vm11, %v1387_v33, %v1158_v55 }
 0x155   : > { %1135 = vrot.lane.b32.xlu0 %v2649_v37, %s2167_s8  ;;  %v1453_v29 = vsel %vm1435_vm12, %v1420_v17, %v1190_v27  ;;  %1225 = vrot.lane.b32.xlu2 %v2642_v10, %s2169_s10  ;;  %v2151_v37 = vld [vmem:[%s3362_s1] ss:$0 sm:$0xff] }
 0x156   : > { %v335_v27 = vmul.f32 %v2151_v37, %v2100_v23  ;;  %v336_v43 = vmul.f32 %v2151_v37, %v2101_v15 }
 0x157   : > { %v1222_v34 = vpop.permute.xlu0 %1221  ;;  %v2945_v63 = vpop.permute.xlu2 %1053 }
 0x158   : > { %v1486_v21 = vsel %vm1468_vm13, %v1453_v29, %v1222_v34  ;;  %v371_v59 = vadd.f32 %v2152_v6, %v335_v27  ;;  %v372_v20 = vadd.f32 %v2152_v6, %v336_v43 }
 0x159   : > { %2022 = vmatmul.msk.bf16.vlgmr.msra.gmra.mxu2 %vm1537_vm14, %v1486_v21  ;;  %1161 = vrot.lane.b32.xlu1 %v2488_v51, %s2168_s9 }
 0x15a   : > { %v403_v53 = vmax.f32 %v371_v59, 0.0  ;;  %v404_v13 = vmax.f32 %v372_v20, 0.0 }
 0x15b   : > { %v1034_v45 = vpop.permute.xlu1 %1033 }
 0x15c   : > { %v435_v28 = vpack.c.bf16 %v403_v53, %v403_v53  ;;  %v436_v7 = vpack.c.bf16 %v404_v13, %v404_v13  ;;  %v1309_v8 = vsel %vm1303_vm8, %v2766_v0, %v1034_v45 }
 0x15d   : > { %1193 = vrot.lane.b32.xlu0 %v2513_v49, %s2165_s6  ;;  %1087 = vrot.lane.b32.xlu2 %v2410_v42, %s2164_s30  ;;  %v2969_v42 = vsel %vm948_vm4, %v993_v38, %v994_v54 }
 0x15e   : > { %v499_v22 = vunpack.c.l.b16 %v435_v28  ;;  %v500_v25 = vunpack.c.l.b16 %v436_v7 }
 0x15f   : > { %v1078_v46 = vpop.permute.xlu0 %1077  ;;  %v2964_v26 = vpop.permute.xlu2 %1127 }
 0x160   : > { %v1342_v61 = vsel %vm1336_vm9, %v1309_v8, %v1078_v46  ;;  %v516_v17 = vpack.c.b16 %v500_v25, %v499_v22 }
 0x161   : > { %1199 = vrot.lane.b32.xlu1 %v2562_v40, %s2165_s6  ;;  %v1375_v55 = vsel %vm1369_vm10, %v1342_v61, %v2909_v30 }
 0x162   : > { %v623_v21 = vshrl.u32 %v516_v17, 16  ;;  %v626_v15 = vshll.u32 %v516_v17, 16 }
 0x163   : > { %v1084_v52 = vpop.permute.xlu1 %1083 }
 0x164   : > { %v625_v23 = vrot.slane %v623_v21, 7 }
 0x165   : > { %1231 = vrot.lane.b32.xlu0 %v2969_v42, %s2169_s10  ;;  %1187 = vrot.lane.b32.xlu2 %v2443_v4, %s2165_s6  ;;  %v1315_v4 = vsel %vm1303_vm8, %v2791_v35, %v2894_v60 }
 0x166   : > { %v628_v37 = vor.u32 %v626_v15, %v625_v23 }
 0x167   : > { %v1120_v3 = vpop.permute.xlu0 %1119  ;;  %v2980_v32 = vpop.permute.xlu2 %1165 }
 0x168   : > { %v679_v27 = vsel %vm2259_vm3, 0, %v628_v37 }
 0x169   : > { %1043 = vrot.lane.b32.xlu1 %v2383_v57, %s2166_s7  ;;  %v1348_v57 = vsel %vm1336_vm9, %v1315_v4, %v1084_v52  ;;  %v1064_v43 = vshll.u32 %v679_v27, 16  ;;  %v1062_v59 = vshrl.u32 %v679_v27, 16  ;;  %v1106_v7 = vrot.slane %v679_v27, 1 }
 0x16a   : > { %v1381_v30 = vsel %vm1369_vm10, %v1348_v57, %v1120_v3 }
 0x16b   : > { %v1146_v33 = vpop.permute.xlu1 %1145  ;;  %v1414_v35 = vsel %vm1402_vm11, %v1381_v30, %v2923_v56  ;;  %v1066_v20 = vrot.slane %v1064_v43, 1 }
 0x16c   : > { %v1408_v0 = vsel %vm1402_vm11, %v1375_v55, %v1146_v33  ;;  %v3370_v55 = vmov 0  }
 0x16d   : > { %1123 = vrot.lane.b32.xlu0 %v2614_v24, %s2167_s8  ;;  %1057 = vrot.lane.b32.xlu2 %v2545_v58, %s2166_s7  ;;  %v1067_v18 = vor.u32 %v1066_v20, %v1062_v59 }
 0x16f   : > { %v1178_v29 = vpop.permute.xlu0 %1177  ;;  %v1224_v60 = vpop.permute.xlu2 %1223 }
 0x170   : > { %v1441_v34 = vsel %vm1435_vm12, %v1408_v0, %v1178_v29 }
 0x171   : > { %v1474_v31 = vsel %vm1468_vm13, %v1441_v34, %v1210_v62  ;;  %1155 = vrot.lane.b32.xlu1 %v2430_v14, %s2168_s9 }
 0x172   : > { %2016 = vmatmul.msk.bf16.gmra.mxu0 %vm1537_vm14, %v1474_v31 }
 0x173   : > { %v1184_v24 = vpop.permute.xlu1 %1183 }
 0x174   : > { %v1447_v45 = vsel %vm1435_vm12, %v1414_v35, %v1184_v24 }
 0x175   : > { %1219 = vrot.lane.b32.xlu0 %v2626_v50, %s2169_s10  ;;  %1131 = vrot.lane.b32.xlu2 %v2642_v10, %s2167_s8 }
 0x177   : > { %v1216_v62 = vpop.permute.xlu0 %1215  ;;  %v3015_v50 = vpop.permute.xlu2 %1041 }
 0x178   : > { %v1480_v14 = vsel %vm1468_vm13, %v1447_v45, %v1216_v62 }
 0x179   : > { %2019 = vmatmul.msk.bf16.gmra.mxu1 %vm1537_vm14, %v1480_v14  ;;  %1051 = vrot.lane.b32.xlu1 %v2488_v51, %s2166_s7  ;;  %v695_v51 = vsel %vm2259_vm3, %v625_v23, 0 }
 0x17a   : > { %v1069_v38 = vshll.u32 %v695_v51, 16  ;;  %v1107_v8 = vrot.slane %v695_v51, 1 }
 0x17b   : > { %v1048_v56 = vpop.permute.xlu1 %1047 }
 0x17c   : > { %v1071_v53 = vrot.slane %v1069_v38, 1 }
 0x17d   : > { %1095 = vrot.lane.b32.xlu0 %v2513_v49, %s2164_s30  ;;  %1169 = vrot.lane.b32.xlu2 %v679_v27, %s2168_s9  ;;  %v1323_v49 = vsel %vm1303_vm8, %v2825_v12, %v1048_v56 }
 0x17f   : > { %v1092_v10 = vpop.permute.xlu0 %1091  ;;  %v1116_v46 = vpop.permute.xlu2 %1115 }
 0x181   : > { %1101 = vrot.lane.b32.xlu1 %v2562_v40, %s2164_s30  ;;  %v1356_v40 = vsel %vm1336_vm9, %v1323_v49, %v1092_v10 }
 0x182   : > { %v1389_v52 = vsel %vm1369_vm10, %v1356_v40, %v2964_v26 }
 0x183   : > { %v1098_v6 = vpop.permute.xlu1 %1097 }
 0x185   : > { %1137 = vrot.lane.b32.xlu0 %v2969_v42, %s2167_s8  ;;  %1227 = vrot.lane.b32.xlu2 %v2619_v39, %s2169_s10  ;;  %v1329_v39 = vsel %vm1303_vm8, %v2843_v11, %v2945_v63 }
 0x186   : > { %v1362_v28 = vsel %vm1336_vm9, %v1329_v39, %v1098_v6 }
 0x187   : > { %v1134_v54 = vpop.permute.xlu0 %1133  ;;  %v1154_v63 = vpop.permute.xlu2 %1153 }
 0x188   : > { %v1395_v22 = vsel %vm1369_vm10, %v1362_v28, %v1134_v54 }
 0x189   : > { %1163 = vrot.lane.b32.xlu1 %v2531_v44, %s2168_s9  ;;  %v1072_v44 = vsel %vm696_vm2, %v1067_v18, %v1071_v53  ;;  %v1428_v61 = vsel %vm1402_vm11, %v1395_v22, %v2980_v32 }
 0x18b   : > { %v1160_v13 = vpop.permute.xlu1 %1159 }
 0x18c   : > { %v1422_v12 = vsel %vm1402_vm11, %v1389_v52, %v1160_v13 }
 0x18d   : > { %1195 = vrot.lane.b32.xlu0 %v2554_v2, %s2165_s6  ;;  %1059 = vrot.lane.b32.xlu2 %v679_v27, %s2166_s7  ;;  %v1108_v2 = vsel %vm948_vm4, %v1106_v7, %v1107_v8 }
 0x18f   : > { %v1192_v3 = vpop.permute.xlu0 %1191  ;;  %v1212_v57 = vpop.permute.xlu2 %1211 }
 0x190   : > { %v1455_v26 = vsel %vm1435_vm12, %v1422_v12, %v1192_v3 }
 0x191   : > { %v1488_v11 = vsel %vm1468_vm13, %v1455_v26, %v1224_v60  ;;  %1201 = vrot.lane.b32.xlu1 %v1072_v44, %s2165_s6 }
 0x192   : > { %2023 = vmatmul.msk.bf16.gmra.mxu2 %vm1537_vm14, %v1488_v11 }
 0x193   : > { %v1198_v25 = vpop.permute.xlu1 %1197 }
 0x194   : > { %v1461_v33 = vsel %vm1435_vm12, %v1428_v61, %v1198_v25 }
 0x195   : > { %1233 = vrot.lane.b32.xlu0 %v1108_v2, %s2169_s10  ;;  %1171 = vrot.lane.b32.xlu2 %v3370_v55, %s2168_s9  ;;  %s3066_s9 = scalar_lea.vmem %s3365_s4, %s2032_s21  ;;  %s1997_s21 = sshll.u32 %s3372_s19, 1 }
 0x197   : > { %v1230_v17 = vpop.permute.xlu0 %1229  ;;  %v3070_v34 = vpop.permute.xlu2 %1055 }
 0x198   : > { %v1494_v4 = vsel %vm1468_vm13, %v1461_v33, %v1230_v17 }
 0x199   : > { %2026 = vmatmul.msk.bf16.vlgmr.msra.gmra.mxu3 %vm1537_vm14, %v1494_v4  ;;  %1026 = vrot.lane.b32.xlu1 %v2969_v42, %s2163_s29 }
 0x19b   : > { %v1036_v0 = vpop.permute.xlu1 %1035 }
 0x19c   : > { %v1311_v42 = vsel %vm1303_vm8, %v2776_v5, %v1036_v0  ;;  %v1317_v5 = vsel %vm1303_vm8, %v2802_v48, %v3015_v50 }
 0x19d   : > { %1103 = vrot.lane.b32.xlu0 %v1072_v44, %s2164_s30 }
 0x19f   : > { %v1080_v32 = vpop.permute.xlu0 %1079  ;;  %v1130_v10 = vpop.permute.xlu2 %1129 }
 0x1a0   : > { %v1344_v24 = vsel %vm1336_vm9, %v1311_v42, %v1080_v32 }
 0x1a1   : > { %1139 = vrot.lane.b32.xlu1 %v1108_v2, %s2167_s8  ;;  %v1377_v60 = vsel %vm1369_vm10, %v1344_v24, %v1116_v46 }
 0x1a3   : > { %v1086_v29 = vpop.permute.xlu1 %1085 }
 0x1a4   : > { %v1350_v45 = vsel %vm1336_vm9, %v1317_v5, %v1086_v29  ;;  %v1331_v29 = vsel %vm1303_vm8, %v2748_v19, %v3070_v34 }
 0x1a5   : > { %1203 = vrot.lane.b32.xlu0 %v2209_v1, %s2165_s6  ;;  %s235_s6 = scalar_lea.vmem %s3366_s5, %s1997_s21 }
 0x1a6   : > { %v1583_v21 = vpop.f32.mrf.mxu0 }
 0x1a7   : > { %v1837_v30 = vpack.c.bf16 %v1583_v21, %v1583_v21  ;;  %v1122_v31 = vpop.permute.xlu0 %1121  ;;  %v1732_v23 = vmul.f32 %v1583_v21, %v1583_v21  ;;  %v1663_v14 = vsel %vm1237_vm6, %v1583_v21, 0.0  ;;  %v1168_v18 = vpop.permute.xlu2 %1167 }
 0x1a8   : > { %v1383_v50 = vsel %vm1369_vm10, %v1350_v45, %v1122_v31 }
 0x1a9   : > { %1870 = vst.msk [vmem:[%s3066_s9] sm:$0xf] %vm1869_vm15, %v1837_v30  ;;  %1235 = vrot.lane.b32.xlu1 %v2209_v1, %s2169_s10  ;;  %v1764_v48 = vsel %vm1237_vm6, %v1732_v23, 0.0  ;;  %v1416_v38 = vsel %vm1402_vm11, %v1383_v50, %v1154_v63 }
 0x1ab   : > { %v1148_v35 = vpop.permute.xlu1 %1147 }
 0x1ac   : > { %v1410_v15 = vsel %vm1402_vm11, %v1377_v60, %v1148_v35 }
 0x1ae   : > { %v1585_v62 = vpop.f32.mrf.mxu0 }
 0x1af   : > { %v1664_v37 = vsel %vm1237_vm6, %v1585_v62, 0.0  ;;  %v1733_v56 = vmul.f32 %v1585_v62, %v1585_v62  ;;  %v1838_v1 = vpack.c.bf16 %v1585_v62, %v1585_v62  ;;  %v1180_v27 = vpop.permute.xlu0 %1179  ;;  %v1226_v26 = vpop.permute.xlu2 %1225 }
 0x1b0   : > { %v1665_v43 = vadd.f32 %v1664_v37, %v1663_v14  ;;  %v1443_v6 = vsel %vm1435_vm12, %v1410_v15, %v1180_v27 }
 0x1b1   : > { %v1765_v51 = vsel %vm1237_vm6, %v1733_v56, 0.0  ;;  %1871 = vst.msk [vmem:[%s3066_s9 + $0x4] sm:$0xf] %vm1869_vm15, %v1838_v1  ;;  %v1476_v49 = vsel %vm1468_vm13, %v1443_v6, %v1212_v57 }
 0x1b2   : > { %v1766_v59 = vadd.f32 %v1765_v51, %v1764_v48  ;;  %2017 = vmatmul.msk.bf16.gmra.mxu0 %vm1537_vm14, %v1476_v49 }
 0x1b3   : > { %v1186_v20 = vpop.permute.xlu1 %1185 }
 0x1b4   : > { %v1449_v54 = vsel %vm1435_vm12, %v1416_v38, %v1186_v20 }
 0x1b7   : > { %v1218_v46 = vpop.permute.xlu0 %1217  ;;  %v1088_v30 = vpop.permute.xlu2 %1087 }
 0x1b8   : > { %v1482_v40 = vsel %vm1468_vm13, %v1449_v54, %v1218_v46 }
 0x1b9   : > { %2020 = vmatmul.msk.bf16.gmra.mxu1 %vm1537_vm14, %v1482_v40 }
 0x1bb   : > { %v1050_v53 = vpop.permute.xlu1 %1049 }
 0x1bc   : > { %v1325_v22 = vsel %vm1303_vm8, %v2735_v36, %v1050_v53 }
 0x1bf   : > { %v1588_v13 = vpop.f32.mrf.mxu0  ;;  %v1094_v52 = vpop.permute.xlu0 %1093 }
 0x1c0   : > { %v1666_v39 = vsel %vm1237_vm6, %v1588_v13, 0.0  ;;  %v1734_v12 = vmul.f32 %v1588_v13, %v1588_v13  ;;  %v1839_v28 = vpack.c.bf16 %v1588_v13, %v1588_v13  ;;  %v1358_v17 = vsel %vm1336_vm9, %v1325_v22, %v1094_v52  ;;  %v1188_v62 = vpop.permute.xlu2 %1187 }
 0x1c1   : > { %v1667_v44 = vadd.f32 %v1666_v39, %v1665_v43  ;;  %v1391_v32 = vsel %vm1369_vm10, %v1358_v17, %v1130_v10 }
 0x1c2   : > { %v1767_v7 = vsel %vm1237_vm6, %v1734_v12, 0.0  ;;  %1872 = vst.msk [vmem:[%s3066_s9 + $0x8] sm:$0xf] %vm1869_vm15, %v1839_v28 }
 0x1c3   : > { %v1768_v8 = vadd.f32 %v1767_v7, %v1766_v59  ;;  %v1100_v3 = vpop.permute.xlu1 %1099 }
 0x1c4   : > { %v1364_v21 = vsel %vm1336_vm9, %v1331_v29, %v1100_v3 }
 0x1c6   : > { %v3103_v11 = vpop.f32.mrf.mxu1 }
 0x1c7   : > { %v1845_v2 = vpack.c.bf16 %v3103_v11, %v3103_v11  ;;  %v1590_v63 = vpop.f32.mrf.mxu0  ;;  %v1136_v25 = vpop.permute.xlu0 %1135 }
 0x1c8   : > { %v1668_v61 = vsel %vm1237_vm6, %v1590_v63, 0.0  ;;  %v1735_v33 = vmul.f32 %v1590_v63, %v1590_v63  ;;  %v1840_v55 = vpack.c.bf16 %v1590_v63, %v1590_v63  ;;  %v1397_v5 = vsel %vm1369_vm10, %v1364_v21, %v1136_v25  ;;  %v1058_v6 = vpop.permute.xlu2 %1057 }
 0x1c9   : > { %1878 = vst.msk [vmem:[%s3066_s9 + $0x20] sm:$0xf] %vm1869_vm15, %v1845_v2  ;;  %v1669_v4 = vadd.f32 %v1668_v61, %v1667_v44  ;;  %v1430_v23 = vsel %vm1402_vm11, %v1397_v5, %v1168_v18 }
 0x1ca   : > { %v1769_v0 = vsel %vm1237_vm6, %v1735_v33, 0.0  ;;  %1873 = vst.msk [vmem:[%s3066_s9 + $0xc] sm:$0xf] %vm1869_vm15, %v1840_v55 }
 0x1cb   : > { %v1770_v36 = vadd.f32 %v1769_v0, %v1768_v8  ;;  %v1162_v57 = vpop.permute.xlu1 %1161 }
 0x1cc   : > { %v1424_v42 = vsel %vm1402_vm11, %v1391_v32, %v1162_v57 }
 0x1ce   : > { %v3120_v31 = vpop.f32.mrf.mxu1 }
 0x1cf   : > { %v1846_v24 = vpack.c.bf16 %v3120_v31, %v3120_v31  ;;  %v1194_v35 = vpop.permute.xlu0 %1193 }
 0x1d0   : > { %v1457_v60 = vsel %vm1435_vm12, %v1424_v42, %v1194_v35  ;;  %v1132_v54 = vpop.permute.xlu2 %1131 }
 0x1d1   : > { %1879 = vst.msk [vmem:[%s3066_s9 + $0x24] sm:$0xf] %vm1869_vm15, %v1846_v24  ;;  %v1490_v19 = vsel %vm1468_vm13, %v1457_v60, %v1226_v26 }
 0x1d2   : > { %2024 = vmatmul.msk.bf16.gmra.mxu2 %vm1537_vm14, %v1490_v19 }
 0x1d3   : > { %v1200_v34 = vpop.permute.xlu1 %1199 }
 0x1d4   : > { %v1463_v15 = vsel %vm1435_vm12, %v1430_v23, %v1200_v34 }
 0x1d7   : > { %v1232_v45 = vpop.permute.xlu0 %1231 }
 0x1d8   : > { %v1496_v14 = vsel %vm1468_vm13, %v1463_v15, %v1232_v45  ;;  %v1170_v7 = vpop.permute.xlu2 %1169 }
 0x1d9   : > { %2027 = vmatmul.msk.bf16.gmra.mxu3 %vm1537_vm14, %v1496_v14 }
 0x1db   : > { %v1044_v37 = vpop.permute.xlu1 %1043 }
 0x1dc   : > { %v3134_v56 = vpop.f32.mrf.mxu2  ;;  %v1319_v27 = vsel %vm1303_vm8, %v2722_v16, %v1044_v37 }
 0x1dd   : > { %v1853_v1 = vpack.c.bf16 %v3134_v56, %v3134_v56  ;;  %v1352_v43 = vsel %vm1336_vm9, %v1319_v27, %v1088_v30 }
 0x1df   : > { %1886 = vst.msk [vmem:[%s3066_s9 + $0x40] sm:$0xf] %vm1869_vm15, %v1853_v1  ;;  %v1124_v10 = vpop.permute.xlu0 %1123 }
 0x1e0   : > { %v1385_v48 = vsel %vm1369_vm10, %v1352_v43, %v1124_v10  ;;  %v1228_v42 = vpop.permute.xlu2 %1227 }
 0x1e3   : > { %v1156_v50 = vpop.permute.xlu1 %1155 }
 0x1e4   : > { %v3144_v51 = vpop.f32.mrf.mxu2  ;;  %v1418_v49 = vsel %vm1402_vm11, %v1385_v48, %v1156_v50 }
 0x1e5   : > { %v1854_v59 = vpack.c.bf16 %v3144_v51, %v3144_v51  ;;  %v1451_v20 = vsel %vm1435_vm12, %v1418_v49, %v1188_v62  ;;  %v1269_v62 = vsel %vm1237_vm6, %v2545_v58, %v2745_v41 }
 0x1e7   : > { %1887 = vst.msk [vmem:[%s3066_s9 + $0x44] sm:$0xf] %vm1869_vm15, %v1854_v59  ;;  %v1220_v16 = vpop.permute.xlu0 %1219 }
 0x1e8   : > { %v1484_v38 = vsel %vm1468_vm13, %v1451_v20, %v1220_v16  ;;  %v1060_v45 = vpop.permute.xlu2 %1059 }
 0x1e9   : > { %2021 = vmatmul.msk.bf16.gmra.mxu1 %vm1537_vm14, %v1484_v38 }
 0x1eb   : > { %v1052_v46 = vpop.permute.xlu1 %1051 }
 0x1ec   : > { %v1327_v8 = vsel %vm1303_vm8, %v2835_v9, %v1052_v46 }
 0x1ef   : > { %v1593_v40 = vpop.f32.mrf.mxu0  ;;  %v1096_v18 = vpop.permute.xlu0 %1095 }
 0x1f0   : > { %v1670_v53 = vsel %vm1237_vm6, %v1593_v40, 0.0  ;;  %v1736_v13 = vmul.f32 %v1593_v40, %v1593_v40  ;;  %v1841_v52 = vpack.c.bf16 %v1593_v40, %v1593_v40  ;;  %v1360_v33 = vsel %vm1336_vm9, %v1327_v8, %v1096_v18  ;;  %v1172_v48 = vpop.permute.xlu2 %1171 }
 0x1f1   : > { %v1671_v39 = vadd.f32 %v1670_v53, %v1669_v4  ;;  %v1393_v0 = vsel %vm1369_vm10, %v1360_v33, %v1132_v54  ;;  %v1678_v33 = vsel %vm1237_vm6, %v3103_v11, 0.0 }
 0x1f2   : > { %v1771_v12 = vsel %vm1237_vm6, %v1736_v13, 0.0  ;;  %1874 = vst.msk [vmem:[%s3066_s9 + $0x10] sm:$0xf] %vm1869_vm15, %v1841_v52 }
 0x1f3   : > { %v1772_v28 = vadd.f32 %v1771_v12, %v1770_v36  ;;  %v1102_v44 = vpop.permute.xlu1 %1101  ;;  %v1333_v36 = vsel %vm1303_vm8, %v2853_v47, %v1058_v6 }
 0x1f4   : > { %v1366_v32 = vsel %vm1336_vm9, %v1333_v36, %v1102_v44  ;;  %v1680_v36 = vsel %vm1237_vm6, %v3120_v31, 0.0 }
 0x1f6   : > { %v3160_v3 = vpop.f32.mrf.mxu1 }
 0x1f7   : > { %v1847_v26 = vpack.c.bf16 %v3160_v3, %v3160_v3  ;;  %v1595_v22 = vpop.f32.mrf.mxu0  ;;  %v1138_v2 = vpop.permute.xlu0 %1137 }
 0x1f8   : > { %v1672_v63 = vsel %vm1237_vm6, %v1595_v22, 0.0  ;;  %v1737_v25 = vmul.f32 %v1595_v22, %v1595_v22  ;;  %v1842_v61 = vpack.c.bf16 %v1595_v22, %v1595_v22  ;;  %v1399_v35 = vsel %vm1369_vm10, %v1366_v32, %v1138_v2 }
 0x1f9   : > { %1880 = vst.msk [vmem:[%s3066_s9 + $0x28] sm:$0xf] %vm1869_vm15, %v1847_v26  ;;  %v1673_v55 = vadd.f32 %v1672_v63, %v1671_v39  ;;  %v1432_v5 = vsel %vm1402_vm11, %v1399_v35, %v1170_v7  ;;  %v1740_v22 = vmul.f32 %v3103_v11, %v3103_v11 }
 0x1fa   : > { %v1773_v17 = vsel %vm1237_vm6, %v1737_v25, 0.0  ;;  %1875 = vst.msk [vmem:[%s3066_s9 + $0x14] sm:$0xf] %vm1869_vm15, %v1842_v61 }
 0x1fb   : > { %v1774_v9 = vadd.f32 %v1773_v17, %v1772_v28  ;;  %v1164_v4 = vpop.permute.xlu1 %1163 }
 0x1fc   : > { %v1426_v57 = vsel %vm1402_vm11, %v1393_v0, %v1164_v4  ;;  %v1779_v0 = vsel %vm1237_vm6, %v1740_v22, 0.0 }
 0x1fe   : > { %v3176_v29 = vpop.f32.mrf.mxu1 }
 0x1ff   : > { %v1848_v21 = vpack.c.bf16 %v3176_v29, %v3176_v29  ;;  %v1196_v30 = vpop.permute.xlu0 %1195 }
 0x200   : > { %v1459_v24 = vsel %vm1435_vm12, %v1426_v57, %v1196_v30  ;;  %v1742_v57 = vmul.f32 %v3160_v3, %v3160_v3  ;;  %v1743_v30 = vmul.f32 %v3176_v29, %v3176_v29 }
 0x201   : > { %1881 = vst.msk [vmem:[%s3066_s9 + $0x2c] sm:$0xf] %vm1869_vm15, %v1848_v21  ;;  %v1492_v60 = vsel %vm1468_vm13, %v1459_v24, %v1228_v42  ;;  %v1682_v21 = vsel %vm1237_vm6, %v3160_v3, 0.0 }
 0x202   : > { %2025 = vmatmul.msk.bf16.gmra.mxu2 %vm1537_vm14, %v1492_v60 }
 0x203   : > { %v1202_v47 = vpop.permute.xlu1 %1201 }
 0x204   : > { %v1465_v19 = vsel %vm1435_vm12, %v1432_v5, %v1202_v47  ;;  %v1783_v47 = vsel %vm1237_vm6, %v1742_v57, 0.0 }
 0x207   : > { %v1234_v34 = vpop.permute.xlu0 %1233 }
 0x208   : > { %v1498_v23 = vsel %vm1468_vm13, %v1465_v19, %v1234_v34 }
 0x209   : > { %2028 = vmatmul.msk.bf16.gmra.mxu3 %vm1537_vm14, %v1498_v23 }
 0x20b   : > { %v1027_v15 = vpop.permute.xlu1 %1026 }
 0x20c   : > { %v1302_v14 = vsel %vm1270_vm5, %v1269_v62, %v1027_v15  ;;  %v1785_v15 = vsel %vm1237_vm6, %v1743_v30, 0.0 }
 0x20d   : > { %v1335_v1 = vsel %vm1303_vm8, %v1302_v14, %v1060_v45 }
 0x20f   : > { %v1104_v37 = vpop.permute.xlu0 %1103 }
 0x210   : > { %v1368_v10 = vsel %vm1336_vm9, %v1335_v1, %v1104_v37 }
 0x213   : > { %v1140_v27 = vpop.permute.xlu1 %1139 }
 0x214   : > { %v1401_v6 = vsel %vm1369_vm10, %v1368_v10, %v1140_v27 }
 0x215   : > { %v3196_v43 = vpop.f32.mrf.mxu2  ;;  %v1434_v58 = vsel %vm1402_vm11, %v1401_v6, %v1172_v48 }
 0x216   : > { %v1855_v50 = vpack.c.bf16 %v3196_v43, %v3196_v43 }
 0x217   : > { %v1204_v41 = vpop.permute.xlu0 %1203 }
 0x218   : > { %1888 = vst.msk [vmem:[%s3066_s9 + $0x48] sm:$0xf] %vm1869_vm15, %v1855_v50  ;;  %v1467_v49 = vsel %vm1435_vm12, %v1434_v58, %v1204_v41 }
 0x21b   : > { %v1236_v59 = vpop.permute.xlu1 %1235 }
 0x21c   : > { %v3205_v20 = vpop.f32.mrf.mxu3  ;;  %v1500_v16 = vsel %vm1468_vm13, %v1467_v49, %v1236_v59 }
 0x21d   : > { %v1861_v38 = vpack.c.bf16 %v3205_v20, %v3205_v20  ;;  %v3210_v54 = vpop.f32.mrf.mxu2  ;;  %2029 = vmatmul.msk.bf16.gmra.mxu3 %vm1537_vm14, %v1500_v16 }
 0x21e   : > { %v1856_v46 = vpack.c.bf16 %v3210_v54, %v3210_v54  ;;  %v1751_v57 = vmul.f32 %v3210_v54, %v3210_v54 }
 0x21f   : > { %1894 = vst.msk [vmem:[%s3066_s9 + $0x60] sm:$0xf] %vm1869_vm15, %v1861_v38 }
 0x220   : > { %1889 = vst.msk [vmem:[%s3066_s9 + $0x4c] sm:$0xf] %vm1869_vm15, %v1856_v46 }
 0x224   : > { %v3219_v40 = vpop.f32.mrf.mxu3 }
 0x225   : > { %v1862_v18 = vpack.c.bf16 %v3219_v40, %v3219_v40 }
 0x227   : > { %1895 = vst.msk [vmem:[%s3066_s9 + $0x64] sm:$0xf] %vm1869_vm15, %v1862_v18 }
 0x22f   : > { %v1598_v53 = vpop.f32.mrf.mxu0 }
 0x230   : > { %v1674_v13 = vsel %vm1237_vm6, %v1598_v53, 0.0  ;;  %v1738_v52 = vmul.f32 %v1598_v53, %v1598_v53  ;;  %v1843_v39 = vpack.c.bf16 %v1598_v53, %v1598_v53 }
 0x231   : > { %v1675_v12 = vadd.f32 %v1674_v13, %v1673_v55  ;;  %v1741_v55 = vmul.f32 %v3120_v31, %v3120_v31  ;;  %v1684_v31 = vsel %vm1237_vm6, %v3176_v29, 0.0 }
 0x232   : > { %v1775_v28 = vsel %vm1237_vm6, %v1738_v52, 0.0  ;;  %1876 = vst.msk [vmem:[%s3066_s9 + $0x18] sm:$0xf] %vm1869_vm15, %v1843_v39 }
 0x233   : > { %v1776_v44 = vadd.f32 %v1775_v28, %v1774_v9  ;;  %v1781_v11 = vsel %vm1237_vm6, %v1741_v55, 0.0  ;;  %v1748_v28 = vmul.f32 %v3134_v56, %v3134_v56 }
 0x235   : > { %v1795_v55 = vsel %vm1237_vm6, %v1748_v28, 0.0 }
 0x236   : > { %v1613_v7 = vpop.f32.mrf.mxu1 }
 0x237   : > { %v1849_v8 = vpack.c.bf16 %v1613_v7, %v1613_v7  ;;  %v1600_v26 = vpop.f32.mrf.mxu0  ;;  %v1744_v5 = vmul.f32 %v1613_v7, %v1613_v7  ;;  %v1686_v3 = vsel %vm1237_vm6, %v1613_v7, 0.0 }
 0x238   : > { %v1676_v2 = vsel %vm1237_vm6, %v1600_v26, 0.0  ;;  %v1739_v63 = vmul.f32 %v1600_v26, %v1600_v26  ;;  %v1844_v25 = vpack.c.bf16 %v1600_v26, %v1600_v26 }
 0x239   : > { %1882 = vst.msk [vmem:[%s3066_s9 + $0x30] sm:$0xf] %vm1869_vm15, %v1849_v8  ;;  %v1677_v61 = vadd.f32 %v1676_v2, %v1675_v12  ;;  %v1787_v37 = vsel %vm1237_vm6, %v1744_v5, 0.0  ;;  %v1694_v2 = vsel %vm1237_vm6, %v3134_v56, 0.0 }
 0x23a   : > { %v1777_v17 = vsel %vm1237_vm6, %v1739_v63, 0.0  ;;  %1877 = vst.msk [vmem:[%s3066_s9 + $0x1c] sm:$0xf] %vm1869_vm15, %v1844_v25  ;;  %v1749_v63 = vmul.f32 %v3144_v51, %v3144_v51 }
 0x23b   : > { %v1679_v9 = vadd.f32 %v1678_v33, %v1677_v61  ;;  %v1778_v4 = vadd.f32 %v1777_v17, %v1776_v44  ;;  %v1696_v17 = vsel %vm1237_vm6, %v3144_v51, 0.0  ;;  %v1700_v51 = vsel %vm1237_vm6, %v3210_v54, 0.0 }
 0x23c   : > { %v1797_v56 = vsel %vm1237_vm6, %v1749_v63, 0.0 }
 0x23d   : > { %v1681_v32 = vadd.f32 %v1680_v36, %v1679_v9  ;;  %v1780_v42 = vadd.f32 %v1779_v0, %v1778_v4  ;;  %v1750_v9 = vmul.f32 %v3196_v43, %v3196_v43  ;;  %v1698_v36 = vsel %vm1237_vm6, %v3196_v43, 0.0 }
 0x23e   : > { %v1615_v24 = vpop.f32.mrf.mxu1 }
 0x23f   : > { %v1683_v35 = vadd.f32 %v1682_v21, %v1681_v32  ;;  %v1782_v60 = vadd.f32 %v1781_v11, %v1780_v42  ;;  %v1850_v19 = vpack.c.bf16 %v1615_v24, %v1615_v24  ;;  %v1745_v45 = vmul.f32 %v1615_v24, %v1615_v24 }
 0x240   : > { %v1688_v29 = vsel %vm1237_vm6, %v1615_v24, 0.0  ;;  %v1799_v11 = vsel %vm1237_vm6, %v1750_v9, 0.0  ;;  %v1801_v24 = vsel %vm1237_vm6, %v1751_v57, 0.0 }
 0x241   : > { %v1784_v34 = vadd.f32 %v1783_v47, %v1782_v60  ;;  %v1685_v23 = vadd.f32 %v1684_v31, %v1683_v35  ;;  %1883 = vst.msk [vmem:[%s3066_s9 + $0x34] sm:$0xf] %vm1869_vm15, %v1850_v19  ;;  %v1789_v10 = vsel %vm1237_vm6, %v1745_v45, 0.0 }
 0x243   : > { %v1687_v62 = vadd.f32 %v1686_v3, %v1685_v23  ;;  %v1786_v14 = vadd.f32 %v1785_v15, %v1784_v34 }
 0x245   : > { %v1689_v1 = vadd.f32 %v1688_v29, %v1687_v62  ;;  %v1788_v27 = vadd.f32 %v1787_v37, %v1786_v14 }
 0x247   : > { %v1790_v6 = vadd.f32 %v1789_v10, %v1788_v27 }
 0x255   : > { %v1633_v48 = vpop.f32.mrf.mxu2 }
 0x256   : > { %v1857_v50 = vpack.c.bf16 %v1633_v48, %v1633_v48  ;;  %v1752_v60 = vmul.f32 %v1633_v48, %v1633_v48  ;;  %v1702_v43 = vsel %vm1237_vm6, %v1633_v48, 0.0 }
 0x258   : > { %1890 = vst.msk [vmem:[%s3066_s9 + $0x50] sm:$0xf] %vm1869_vm15, %v1857_v50  ;;  %v1803_v19 = vsel %vm1237_vm6, %v1752_v60, 0.0 }
 0x25c   : > { %v3263_v58 = vpop.f32.mrf.mxu3 }
 0x25d   : > { %v1863_v41 = vpack.c.bf16 %v3263_v58, %v3263_v58  ;;  %v1635_v49 = vpop.f32.mrf.mxu2 }
 0x25e   : > { %v1858_v59 = vpack.c.bf16 %v1635_v49, %v1635_v49  ;;  %v1753_v34 = vmul.f32 %v1635_v49, %v1635_v49  ;;  %v1704_v54 = vsel %vm1237_vm6, %v1635_v49, 0.0 }
 0x25f   : > { %1896 = vst.msk [vmem:[%s3066_s9 + $0x68] sm:$0xf] %vm1869_vm15, %v1863_v41 }
 0x260   : > { %1891 = vst.msk [vmem:[%s3066_s9 + $0x54] sm:$0xf] %vm1869_vm15, %v1858_v59  ;;  %v1805_v62 = vsel %vm1237_vm6, %v1753_v34, 0.0 }
 0x264   : > { %v3271_v16 = vpop.f32.mrf.mxu3 }
 0x265   : > { %v1864_v38 = vpack.c.bf16 %v3271_v16, %v3271_v16 }
 0x266   : > { %v1618_v46 = vpop.f32.mrf.mxu1 }
 0x267   : > { %1897 = vst.msk [vmem:[%s3066_s9 + $0x6c] sm:$0xf] %vm1869_vm15, %v1864_v38  ;;  %v1851_v18 = vpack.c.bf16 %v1618_v46, %v1618_v46  ;;  %v1746_v53 = vmul.f32 %v1618_v46, %v1618_v46  ;;  %v1690_v13 = vsel %vm1237_vm6, %v1618_v46, 0.0  ;;  %v1710_v38 = vsel %vm1237_vm6, %v3205_v20, 0.0 }
 0x268   : > { %v1691_v39 = vadd.f32 %v1690_v13, %v1689_v1  ;;  %v1757_v46 = vmul.f32 %v3219_v40, %v3219_v40 }
 0x269   : > { %1884 = vst.msk [vmem:[%s3066_s9 + $0x38] sm:$0xf] %vm1869_vm15, %v1851_v18  ;;  %v1791_v52 = vsel %vm1237_vm6, %v1746_v53, 0.0 }
 0x26a   : > { %v1792_v26 = vadd.f32 %v1791_v52, %v1790_v6  ;;  %v1756_v6 = vmul.f32 %v3205_v20, %v3205_v20 }
 0x26c   : > { %v1811_v52 = vsel %vm1237_vm6, %v1756_v6, 0.0 }
 0x26e   : > { %v1620_v12 = vpop.f32.mrf.mxu1 }
 0x26f   : > { %v1692_v44 = vsel %vm1237_vm6, %v1620_v12, 0.0  ;;  %v1747_v7 = vmul.f32 %v1620_v12, %v1620_v12  ;;  %v1852_v8 = vpack.c.bf16 %v1620_v12, %v1620_v12  ;;  %v1758_v12 = vmul.f32 %v3263_v58, %v3263_v58 }
 0x270   : > { %v1693_v22 = vadd.f32 %v1692_v44, %v1691_v39  ;;  %v1712_v39 = vsel %vm1237_vm6, %v3219_v40, 0.0  ;;  %v1813_v44 = vsel %vm1237_vm6, %v1757_v46, 0.0  ;;  %v1759_v40 = vmul.f32 %v3271_v16, %v3271_v16 }
 0x271   : > { %v1793_v25 = vsel %vm1237_vm6, %v1747_v7, 0.0  ;;  %1885 = vst.msk [vmem:[%s3066_s9 + $0x3c] sm:$0xf] %vm1869_vm15, %v1852_v8  ;;  %v1714_v7 = vsel %vm1237_vm6, %v3263_v58, 0.0 }
 0x272   : > { %v1695_v61 = vadd.f32 %v1694_v2, %v1693_v22  ;;  %v1794_v33 = vadd.f32 %v1793_v25, %v1792_v26  ;;  %v1815_v2 = vsel %vm1237_vm6, %v1758_v12, 0.0 }
 0x274   : > { %v1697_v4 = vadd.f32 %v1696_v17, %v1695_v61  ;;  %v1796_v0 = vadd.f32 %v1795_v55, %v1794_v33  ;;  %v1716_v61 = vsel %vm1237_vm6, %v3271_v16, 0.0  ;;  %v1817_v55 = vsel %vm1237_vm6, %v1759_v40, 0.0 }
 0x276   : > { %v1699_v32 = vadd.f32 %v1698_v36, %v1697_v4  ;;  %v1798_v42 = vadd.f32 %v1797_v56, %v1796_v0 }
 0x278   : > { %v1800_v21 = vadd.f32 %v1799_v11, %v1798_v42  ;;  %v1701_v30 = vadd.f32 %v1700_v51, %v1699_v32 }
 0x27a   : > { %v1802_v35 = vadd.f32 %v1801_v24, %v1800_v21  ;;  %v1703_v5 = vadd.f32 %v1702_v43, %v1701_v30 }
 0x27c   : > { %v1804_v15 = vadd.f32 %v1803_v19, %v1802_v35  ;;  %v1705_v45 = vadd.f32 %v1704_v54, %v1703_v5 }
 0x27e   : > { %v1806_v1 = vadd.f32 %v1805_v62, %v1804_v15 }
 0x285   : > { %v1638_v47 = vpop.f32.mrf.mxu2 }
 0x286   : > { %v1859_v31 = vpack.c.bf16 %v1638_v47, %v1638_v47  ;;  %v1754_v23 = vmul.f32 %v1638_v47, %v1638_v47  ;;  %v1706_v3 = vsel %vm1237_vm6, %v1638_v47, 0.0 }
 0x287   : > { %v1707_v29 = vadd.f32 %v1706_v3, %v1705_v45 }
 0x288   : > { %1892 = vst.msk [vmem:[%s3066_s9 + $0x58] sm:$0xf] %vm1869_vm15, %v1859_v31  ;;  %v1807_v14 = vsel %vm1237_vm6, %v1754_v23, 0.0 }
 0x289   : > { %v1808_v49 = vadd.f32 %v1807_v14, %v1806_v1 }
 0x28c   : > { %v1653_v37 = vpop.f32.mrf.mxu3 }
 0x28d   : > { %v1865_v27 = vpack.c.bf16 %v1653_v37, %v1653_v37  ;;  %v1640_v10 = vpop.f32.mrf.mxu2  ;;  %v1760_v58 = vmul.f32 %v1653_v37, %v1653_v37  ;;  %v1718_v4 = vsel %vm1237_vm6, %v1653_v37, 0.0 }
 0x28e   : > { %v1708_v48 = vsel %vm1237_vm6, %v1640_v10, 0.0  ;;  %v1755_v50 = vmul.f32 %v1640_v10, %v1640_v10  ;;  %v1860_v41 = vpack.c.bf16 %v1640_v10, %v1640_v10 }
 0x28f   : > { %1898 = vst.msk [vmem:[%s3066_s9 + $0x70] sm:$0xf] %vm1869_vm15, %v1865_v27  ;;  %v1709_v59 = vadd.f32 %v1708_v48, %v1707_v29  ;;  %v1819_v36 = vsel %vm1237_vm6, %v1760_v58, 0.0 }
 0x290   : > { %v1809_v18 = vsel %vm1237_vm6, %v1755_v50, 0.0  ;;  %1893 = vst.msk [vmem:[%s3066_s9 + $0x5c] sm:$0xf] %vm1869_vm15, %v1860_v41 }
 0x291   : > { %v1711_v53 = vadd.f32 %v1710_v38, %v1709_v59  ;;  %v1810_v13 = vadd.f32 %v1809_v18, %v1808_v49 }
 0x293   : > { %v1713_v28 = vadd.f32 %v1712_v39, %v1711_v53  ;;  %v1812_v20 = vadd.f32 %v1811_v52, %v1810_v13 }
 0x294   : > { %v1655_v8 = vpop.f32.mrf.mxu3 }
 0x295   : > { %v1715_v26 = vadd.f32 %v1714_v7, %v1713_v28  ;;  %v1814_v22 = vadd.f32 %v1813_v44, %v1812_v20  ;;  %v1866_v63 = vpack.c.bf16 %v1655_v8, %v1655_v8  ;;  %v1761_v57 = vmul.f32 %v1655_v8, %v1655_v8 }
 0x296   : > { %v1720_v16 = vsel %vm1237_vm6, %v1655_v8, 0.0 }
 0x297   : > { %v1816_v25 = vadd.f32 %v1815_v2, %v1814_v22  ;;  %1899 = vst.msk [vmem:[%s3066_s9 + $0x74] sm:$0xf] %vm1869_vm15, %v1866_v63  ;;  %v1717_v33 = vadd.f32 %v1716_v61, %v1715_v26  ;;  %v1821_v21 = vsel %vm1237_vm6, %v1761_v57, 0.0 }
 0x299   : > { %v1818_v17 = vadd.f32 %v1817_v55, %v1816_v25  ;;  %v1719_v56 = vadd.f32 %v1718_v4, %v1717_v33 }
 0x29b   : > { %v1820_v42 = vadd.f32 %v1819_v36, %v1818_v17  ;;  %v1721_v51 = vadd.f32 %v1720_v16, %v1719_v56 }
 0x29d   : > { %v1822_v24 = vadd.f32 %v1821_v21, %v1820_v42 }
 0x2a0   : > { %v1658_v9 = vpop.f32.mrf.mxu3 }
 0x2a1   : > { %v1867_v0 = vpack.c.bf16 %v1658_v9, %v1658_v9  ;;  %v1762_v32 = vmul.f32 %v1658_v9, %v1658_v9  ;;  %v1722_v11 = vsel %vm1237_vm6, %v1658_v9, 0.0 }
 0x2a2   : > { %v1723_v35 = vadd.f32 %v1722_v11, %v1721_v51 }
 0x2a3   : > { %1900 = vst.msk [vmem:[%s3066_s9 + $0x78] sm:$0xf] %vm1869_vm15, %v1867_v0  ;;  %v1823_v30 = vsel %vm1237_vm6, %v1762_v32, 0.0 }
 0x2a4   : > { %v1824_v5 = vadd.f32 %v1823_v30, %v1822_v24 }
 0x2a8   : > { %v1660_v60 = vpop.f32.mrf.mxu3 }
 0x2a9   : > { %v1724_v47 = vsel %vm1237_vm6, %v1660_v60, 0.0  ;;  %v1763_v43 = vmul.f32 %v1660_v60, %v1660_v60  ;;  %v1868_v31 = vpack.c.bf16 %v1660_v60, %v1660_v60 }
 0x2aa   : > { %v1725_v19 = vadd.f32 %v1724_v47, %v1723_v35 }
 0x2ab   : > { %v1825_v34 = vsel %vm1237_vm6, %v1763_v43, 0.0  ;;  %1901 = vst.msk [vmem:[%s3066_s9 + $0x7c] sm:$0xf] %vm1869_vm15, %v1868_v31 }
 0x2ac   : > { %v1726_v23 = vrot.slane %v1725_v19, 4  ;;  %v1826_v15 = vadd.f32 %v1825_v34, %v1824_v5 }
 0x2ae   : > { %v1727_v54 = vadd.f32 %v1726_v23, %v1725_v19  ;;  %v1827_v3 = vrot.slane %v1826_v15, 4 }
 0x2b0   : > { %v1728_v45 = vrot.slane %v1727_v54, 2  ;;  %v1828_v62 = vadd.f32 %v1827_v3, %v1826_v15 }
 0x2b2   : > { %v1729_v14 = vadd.f32 %v1728_v45, %v1727_v54  ;;  %v1829_v37 = vrot.slane %v1828_v62, 2 }
 0x2b4   : > { %v1730_v29 = vrot.slane %v1729_v14, 1  ;;  %v1830_v1 = vadd.f32 %v1829_v37, %v1828_v62 }
 0x2b6   : > { %v1831_v27 = vrot.slane %v1830_v1, 1  ;;  %v1731_v10 = vadd.f32 %v1730_v29, %v1729_v14 }
 0x2b8   : > { %v1832_v6 = vadd.f32 %v1831_v27, %v1830_v1 }
 0x2ba   : > { %v1834_v48 = vsel %vm661_vm0, %v1731_v10, %v1832_v6 }
 0x2bb   : > { %1836 = vst.msk [vmem:[%s235_s6] sm:$0x3] %vm1835_vm1, %v1834_v48 }
 0x2bc PF: > { %s16_s18 = sadd.s32 1, %s2159_s18  }
 0x2bd   : > { %p13_p4 = scmp.ge.s32.totalorder %s16_s18, 4  }
 0x2bf   :  { %15 = sbr.rel (!%p13_p4) target bundleno = 1 (0x1), region = 78 }

</bundles_post_ra>
